<compile_context>
chip_gen: v6e
topology: v6e:2x2x1
jax: 0.10.0
libtpu: 0.0.40
codegen_flags: <defaults>
</compile_context>

<pallas_src>
import functools

import jax
import jax.numpy as jnp
import numpy as np
from jax.experimental import pallas as pl
from jax.experimental.pallas import tpu as pltpu

FILL_VALUE = -9000000000000000.0


# ------------------------- small matmul helper (MXU) --------------------------
def _mm(a, b):      # a @ b  (contract last dim of a with first of b), f32 acc
    return jax.lax.dot_general(a, b, (((1,), (0,)), ((), ())),
                               preferred_element_type=jnp.float32)


# --------------------------- fused SymBiGCN kernel -----------------------------
# grid = (NB,): one step processes a whole batch block for ALL branch*head
# combinations (head loop unrolled in-kernel, weights VMEM resident) and
# writes the final out_proj + LeakyReLU result.
def fused_sym_bigcn_kernel(x_ref, topic_ref, z_ref, maskb_ref,
                           wx_ref, bx_ref, wm_ref, bm_ref, wz_ref, bz_ref,
                           wo_ref, bo_ref, out_ref,
                           *, bb, n_x, n_t, n_z, n_heads, n_branches):
    BH = n_heads * n_branches
    D = wo_ref.shape[-1]
    temp = float(D) ** 0.5

    x2 = x_ref[...]                  # (bb*n_x, D)   batch folded into rows
    z2 = z_ref[...]                  # (bb*n_z, D)
    topic = topic_ref[...]           # (n_branches*n_t, D)
    maskb = maskb_ref[...]           # (bb, 1, n_x)  additive bias (0 or FILL)

    wx_f, bx_f = wx_ref[...], bx_ref[...]     # (D, BH*D), (1, BH*D)
    wm_f, bm_f = wm_ref[...], bm_ref[...]
    wz_f, bz_f = wz_ref[...], bz_ref[...]

    # ---- head-folded projections of head-invariant inputs (lane-dense) ----
    hx_f = _mm(x2, wx_f) + bx_f               # (bb*n_x, BH*D)
    hy_f = _mm(topic, wx_f) + bx_f            # (n_branches*n_t, BH*D)
    hz_f = _mm(z2, wz_f) + bz_f               # (bb*n_z, BH*D)

    acc = jnp.zeros((bb * n_z, D), jnp.float32)

    # Fully unrolled head loop (BH is small); per-head weight slices are static.
    for h in range(BH):
        br = h // n_heads
        lo = h * D
        hx = hx_f[:, lo:lo + D].reshape(bb, n_x, D)      # (bb, n_x, D)
        hz = hz_f[:, lo:lo + D].reshape(bb, n_z, D)      # (bb, n_z, D)
        hy = hy_f[br * n_t:(br + 1) * n_t, lo:lo + D]    # (n_t, D) batch-invariant

        # ---------- x2y (include_y=True, masked): lane-axis softmax ----------
        hy_b = jnp.broadcast_to(hy[None], (bb, n_t, D))
        s = jnp.einsum('btd,bxd->btx', hy_b, hx,
                       preferred_element_type=jnp.float32) / temp + maskb
        syy = (jnp.sum(hy * hy, axis=1, keepdims=True) / temp)[None]  # (1,n_t,1)
        m = jnp.maximum(jnp.max(s, axis=-1, keepdims=True), syy)
        e_s = jnp.exp(s - m)
        e_yy = jnp.exp(syy - m)
        inv = 1.0 / (jnp.sum(e_s, axis=-1, keepdims=True) + e_yy)     # exact
        # second term is a (bb, 1, D) row broadcast to all n_t rows (as torch)
        y_hat = (jnp.einsum('btx,bxd->btd', e_s * inv, hx,
                            preferred_element_type=jnp.float32)
                 + jnp.sum((e_yy * inv) * hy[None], axis=1, keepdims=True))

        # ---------- y2y (include_y=False, x is y) ----------
        wm_h = wm_f[:, lo:lo + D]
        bm_h = bm_f[:, lo:lo + D]
        hm = (_mm(y_hat.reshape(bb * n_t, D), wm_h) + bm_h).reshape(bb, n_t, D)
        a2 = jnp.einsum('byd,bxd->byx', hm, hm,
                        preferred_element_type=jnp.float32) / temp
        m2 = jnp.max(a2, axis=-1, keepdims=True)
        e2 = jnp.exp(a2 - m2)
        p2 = e2 / jnp.sum(e2, axis=-1, keepdims=True)
        y2 = jnp.einsum('byx,bxd->byd', p2, hm,
                        preferred_element_type=jnp.float32)

        # ---------- y2z (include_y=True, no mask) ----------
        wz_h = wz_f[:, lo:lo + D]
        bz_h = bz_f[:, lo:lo + D]
        hx2 = (_mm(y2.reshape(bb * n_t, D), wz_h) + bz_h).reshape(bb, n_t, D)
        szz = jnp.sum(hz * hz, axis=-1, keepdims=True) / temp        # (bb,n_z,1)
        s2 = jnp.einsum('bzd,btd->bzt', hz, hx2,
                        preferred_element_type=jnp.float32) / temp
        m3 = jnp.maximum(jnp.max(s2, axis=-1, keepdims=True), szz)
        e_s2 = jnp.exp(s2 - m3)
        e_zz = jnp.exp(szz - m3)
        inv3 = 1.0 / (jnp.sum(e_s2, axis=-1, keepdims=True) + e_zz)  # exact
        z_hat = (jnp.einsum('bzt,btd->bzd', e_s2 * inv3, hx2,
                            preferred_element_type=jnp.float32)
                 + jnp.sum((e_zz * inv3) * hz, axis=1, keepdims=True))

        # ---------- fused out_proj: accumulate this head's contribution ------
        acc = acc + _mm(z_hat.reshape(bb * n_z, D), wo_ref[lo:lo + D, :])

    r = acc + bo_ref[...]
    out_ref[...] = jnp.where(r >= 0, r, 0.2 * r).astype(out_ref.dtype)


# --------------------------------- wrapper ------------------------------------
def multi_branch_sym_bigcn(x, z, params, mask=None, *, n_branches, n_heads,
                           num_batch_blocks=1):
    B, n_x, D = x.shape
    n_z = z.shape[1]
    topic = params["topic_nodes"]                    # (n_branches, n_t, D)
    n_t = topic.shape[1]
    BH = n_branches * n_heads

    # Default: single grid step (all batches folded into matmul rows) -- best
    # for single-TensorCore parts and tiny problem sizes.  On v7x pass
    # num_batch_blocks=2 (or more) to shard the "parallel" axis across cores.
    NB = max(1, min(num_batch_blocks, B))
    while B % NB:
        NB -= 1
    bb = B // NB

    if mask is None:
        mask_bias = jnp.zeros((B, 1, n_x), jnp.float32)
    else:
        mask_bias = mask.astype(jnp.float32).reshape(B, 1, n_x) * FILL_VALUE

    x2d = x.reshape(B * n_x, D).astype(jnp.float32)
    z2d = z.reshape(B * n_z, D).astype(jnp.float32)
    topic2d = topic.reshape(n_branches * n_t, D).astype(jnp.float32)

    # Fold the BH per-head weights along the output (lane) dim: (D, BH*D).
    def fold(w, b):
        return (jnp.transpose(w, (1, 0, 2)).reshape(D, BH * D),
                b.reshape(1, BH * D))

    wx_f, bx_f = fold(params["w_x2y"], params["b_x2y"])
    wm_f, bm_f = fold(params["w_y2y"], params["b_y2y"])
    wz_f, bz_f = fold(params["w_y2z"], params["b_y2z"])

    # Advisory cost estimate for the XLA scheduler.
    proj_flops = 2 * D * BH * D * (B * n_x + n_branches * n_t + B * n_z
                                   + 2 * B * n_t + B * n_z)
    attn_flops = 4 * B * BH * D * (n_t * n_x + n_t * n_t + n_z * n_t)
    transcendentals = B * BH * (n_t * (n_x + 1) + n_t * n_t + n_z * (n_t + 1))
    bytes_accessed = 4 * (2 * B * n_x * D + 2 * B * n_z * D
                          + n_branches * n_t * D + 4 * BH * D * D + B * n_x)

    kernel = functools.partial(fused_sym_bigcn_kernel, bb=bb, n_x=n_x,
                               n_t=n_t, n_z=n_z, n_heads=n_heads,
                               n_branches=n_branches)

    out2d = pl.pallas_call(
        kernel,
        out_shape=jax.ShapeDtypeStruct((B * n_z, D), jnp.float32),
        grid_spec=pltpu.PrefetchScalarGridSpec(
            num_scalar_prefetch=0,
            grid=(NB,),
            in_specs=[
                pl.BlockSpec((bb * n_x, D), lambda i: (i, 0)),            # x (batch folded)
                pl.BlockSpec((n_branches * n_t, D), lambda i: (0, 0)),    # topic nodes
                pl.BlockSpec((bb * n_z, D), lambda i: (i, 0)),            # z (batch folded)
                pl.BlockSpec((bb, 1, n_x), lambda i: (i, 0, 0)),          # additive mask bias
                pl.BlockSpec((D, BH * D), lambda i: (0, 0)),              # W x2y (head folded)
                pl.BlockSpec((1, BH * D), lambda i: (0, 0)),              # b x2y
                pl.BlockSpec((D, BH * D), lambda i: (0, 0)),              # W y2y
                pl.BlockSpec((1, BH * D), lambda i: (0, 0)),              # b y2y
                pl.BlockSpec((D, BH * D), lambda i: (0, 0)),              # W y2z
                pl.BlockSpec((1, BH * D), lambda i: (0, 0)),              # b y2z
                pl.BlockSpec((BH * D, D), lambda i: (0, 0)),              # W out_proj
                pl.BlockSpec((1, D), lambda i: (0, 0)),                   # b out_proj
            ],
            out_specs=pl.BlockSpec((bb * n_z, D), lambda i: (i, 0)),
        ),
        compiler_params=pltpu.CompilerParams(
            dimension_semantics=("parallel",)),
        cost_estimate=pl.CostEstimate(flops=proj_flops + attn_flops,
                                      transcendentals=transcendentals,
                                      bytes_accessed=bytes_accessed),
    )(x2d, topic2d, z2d, mask_bias,
      wx_f, bx_f, wm_f, bm_f, wz_f, bz_f,
      params["w_out"], params["b_out"])

    return out2d.reshape(B, n_z, D)


# ---------------------------- pure-JAX reference ------------------------------
def reference_forward(x, z, params, mask, *, n_branches, n_heads):
    B, n_x, D = x.shape
    temp = D ** 0.5
    BH = n_branches * n_heads
    outs = []
    for h in range(BH):
        br = h // n_heads
        y = params["topic_nodes"][br]
        wx, bx = params["w_x2y"][h], params["b_x2y"][h]
        wm, bm = params["w_y2y"][h], params["b_y2y"][h]
        wz, bz = params["w_y2z"][h], params["b_y2z"][h]

        # x2y
        hx = x @ wx + bx                                          # (B, n_x, D)
        hy = jnp.broadcast_to(y @ wx + bx, (B,) + (y.shape))      # (B, n_t, D)
        n_t = hy.shape[1]
        a_xy = jnp.einsum("bxd,btd->bxt", hx, hy) / temp
        if mask is not None:
            a_xy = jnp.where(mask[..., None] > 0.5, FILL_VALUE, a_xy)
        a_yy = jnp.sum(hy * hy, axis=-1, keepdims=True).transpose(0, 2, 1) / temp
        a = jax.nn.softmax(jnp.concatenate([a_xy, a_yy], axis=1), axis=1)
        p_xy, p_yy = a[:, :n_x], a[:, n_x:]
        y_hat = (jnp.einsum("bxt,bxd->btd", p_xy, hx)
                 + jnp.einsum("bot,btd->bod", p_yy, hy))

        # y2y
        hh = y_hat @ wm + bm
        aa = jnp.einsum("bxd,byd->bxy", hh, hh) / temp
        pp = jax.nn.softmax(aa, axis=1)
        y_hat2 = jnp.einsum("bxy,bxd->byd", pp, hh)

        # y2z
        hx2 = y_hat2 @ wz + bz
        hy2 = z @ wz + bz
        n_zz = hy2.shape[1]
        a_xy2 = jnp.einsum("btd,bzd->btz", hx2, hy2) / temp
        a_yy2 = jnp.sum(hy2 * hy2, axis=-1, keepdims=True).transpose(0, 2, 1) / temp
        a2 = jax.nn.softmax(jnp.concatenate([a_xy2, a_yy2], axis=1), axis=1)
        p_xy2, p_yy2 = a2[:, :n_t], a2[:, n_t:]
        z_hat = (jnp.einsum("btz,btd->bzd", p_xy2, hx2)
                 + jnp.einsum("boz,bzd->bod", p_yy2, hy2))
        outs.append(z_hat)

    rets = jnp.concatenate(outs, axis=-1)
    h = rets @ params["w_out"] + params["b_out"]
    return jnp.where(h >= 0, h, 0.2 * h)


# ------------------------------- param init -----------------------------------
def init_params(key, *, n_branches, n_heads, n_topics, in_size):
    BH = n_branches * n_heads
    D = in_size
    ks = jax.random.split(key, 16)

    def xavier(k, shape, fan_in, fan_out):
        bound = (6.0 / (fan_in + fan_out)) ** 0.5
        return jax.random.uniform(k, shape, jnp.float32, -bound, bound)

    def lin_bias(k, shape, fan_in):
        bound = 1.0 / (fan_in ** 0.5)
        return jax.random.uniform(k, shape, jnp.float32, -bound, bound)

    return dict(
        topic_nodes=xavier(ks[0], (n_branches, n_topics, D), n_topics, D),
        # nn.Linear weights stored pre-transposed: kernel computes x @ W + b
        w_x2y=xavier(ks[1], (BH, D, D), D, D),
        b_x2y=lin_bias(ks[2], (BH, 1, D), D),
        w_y2y=xavier(ks[3], (BH, D, D), D, D),
        b_y2y=lin_bias(ks[4], (BH, 1, D), D),
        w_y2z=xavier(ks[5], (BH, D, D), D, D),
        b_y2z=lin_bias(ks[6], (BH, 1, D), D),
        w_out=xavier(ks[7], (BH * D, D), BH * D, D),
        b_out=lin_bias(ks[8], (1, D), BH * D),
    )
    # TODO(synk): nn.Dropout layers are treated as identity (inference mode).


# ----------------------------------- main --------------------------------------
if __name__ == "__main__":
    B, n_x, n_z = 4, 8, 8
    D = 32
    n_topics, n_heads, n_branches = 8, 2, 2

    key = jax.random.PRNGKey(0)
    kx, kz, kp = jax.random.split(key, 3)
    x = jax.random.normal(kx, (B, n_x, D), jnp.float32)
    z = jax.random.normal(kz, (B, n_z, D), jnp.float32)
    mask = (jnp.zeros((B, n_x), jnp.float32)
            .at[1, 6:].set(1.0)
            .at[3, 5:].set(1.0))                 # mask a few x-nodes

    params = init_params(kp, n_branches=n_branches, n_heads=n_heads,
                         n_topics=n_topics, in_size=D)

    fwd = jax.jit(functools.partial(multi_branch_sym_bigcn,
                                    n_branches=n_branches, n_heads=n_heads))
    out = jax.block_until_ready(fwd(x, z, params, mask))

    ref = reference_forward(x, z, params, mask,
                            n_branches=n_branches, n_heads=n_heads)
    # Exact softmax normalization -> interpret mode matches to ~1e-6; the
    # tolerance only covers MXU f32 (bf16-pass) matmul precision on hardware.
    np.testing.assert_allclose(np.asarray(out), np.asarray(ref),
                               rtol=1e-2, atol=1e-2)

    assert out.shape == (B, n_z, D)
    print("KERNEL_OK")
</pallas_src>

<mosaic_0001>
module attributes {stable_mosaic.version = 11 : i64} {
  func.func @fused_sym_bigcn_kernel(%arg0: i32, %arg1: memref<32x32xf32, #tpu.memory_space<vmem>>, %arg2: memref<16x32xf32, #tpu.memory_space<vmem>>, %arg3: memref<32x32xf32, #tpu.memory_space<vmem>>, %arg4: memref<4x1x8xf32, #tpu.memory_space<vmem>>, %arg5: memref<32x128xf32, #tpu.memory_space<vmem>>, %arg6: memref<1x128xf32, #tpu.memory_space<vmem>>, %arg7: memref<32x128xf32, #tpu.memory_space<vmem>>, %arg8: memref<1x128xf32, #tpu.memory_space<vmem>>, %arg9: memref<32x128xf32, #tpu.memory_space<vmem>>, %arg10: memref<1x128xf32, #tpu.memory_space<vmem>>, %arg11: memref<128x32xf32, #tpu.memory_space<vmem>>, %arg12: memref<1x32xf32, #tpu.memory_space<vmem>>, %arg13: memref<32x32xf32, #tpu.memory_space<vmem>>) attributes {dimension_semantics = [#tpu.dimension_semantics<parallel>], iteration_bounds = array<i64: 1>, scalar_prefetch = 0 : i64, scratch_operands = 0 : i64, tpu.core_type = #tpu.core_type<tc>, window_params = [{transform_indices = @transform_0, window_bounds = array<i64: 32, 32>}, {pipeline_mode = #tpu.pipeline_mode<synchronous>, transform_indices = @transform_1, window_bounds = array<i64: 16, 32>}, {transform_indices = @transform_2, window_bounds = array<i64: 32, 32>}, {transform_indices = @transform_3, window_bounds = array<i64: 4, 1, 8>}, {pipeline_mode = #tpu.pipeline_mode<synchronous>, transform_indices = @transform_4, window_bounds = array<i64: 32, 128>}, {pipeline_mode = #tpu.pipeline_mode<synchronous>, transform_indices = @transform_5, window_bounds = array<i64: 1, 128>}, {pipeline_mode = #tpu.pipeline_mode<synchronous>, transform_indices = @transform_6, window_bounds = array<i64: 32, 128>}, {pipeline_mode = #tpu.pipeline_mode<synchronous>, transform_indices = @transform_7, window_bounds = array<i64: 1, 128>}, {pipeline_mode = #tpu.pipeline_mode<synchronous>, transform_indices = @transform_8, window_bounds = array<i64: 32, 128>}, {pipeline_mode = #tpu.pipeline_mode<synchronous>, transform_indices = @transform_9, window_bounds = array<i64: 1, 128>}, {pipeline_mode = #tpu.pipeline_mode<synchronous>, transform_indices = @transform_10, window_bounds = array<i64: 128, 32>}, {pipeline_mode = #tpu.pipeline_mode<synchronous>, transform_indices = @transform_11, window_bounds = array<i64: 1, 32>}, {transform_indices = @transform_12, window_bounds = array<i64: 32, 32>}]} {
    %c0 = arith.constant 0 : index
    %c0_0 = arith.constant 0 : index
    %0 = vector.load %arg1[%c0, %c0_0] : memref<32x32xf32, #tpu.memory_space<vmem>>, vector<32x32xf32>
    %c0_1 = arith.constant 0 : index
    %c0_2 = arith.constant 0 : index
    %1 = vector.load %arg3[%c0_1, %c0_2] : memref<32x32xf32, #tpu.memory_space<vmem>>, vector<32x32xf32>
    %c0_3 = arith.constant 0 : index
    %c0_4 = arith.constant 0 : index
    %2 = vector.load %arg2[%c0_3, %c0_4] : memref<16x32xf32, #tpu.memory_space<vmem>>, vector<16x32xf32>
    %c0_5 = arith.constant 0 : index
    %c0_6 = arith.constant 0 : index
    %c0_7 = arith.constant 0 : index
    %3 = vector.load %arg4[%c0_5, %c0_6, %c0_7] : memref<4x1x8xf32, #tpu.memory_space<vmem>>, vector<4x1x8xf32>
    %c0_8 = arith.constant 0 : index
    %c0_9 = arith.constant 0 : index
    %4 = vector.load %arg5[%c0_8, %c0_9] : memref<32x128xf32, #tpu.memory_space<vmem>>, vector<32x128xf32>
    %c0_10 = arith.constant 0 : index
    %c0_11 = arith.constant 0 : index
    %5 = vector.load %arg6[%c0_10, %c0_11] : memref<1x128xf32, #tpu.memory_space<vmem>>, vector<1x128xf32>
    %c0_12 = arith.constant 0 : index
    %c0_13 = arith.constant 0 : index
    %6 = vector.load %arg7[%c0_12, %c0_13] : memref<32x128xf32, #tpu.memory_space<vmem>>, vector<32x128xf32>
    %c0_14 = arith.constant 0 : index
    %c0_15 = arith.constant 0 : index
    %7 = vector.load %arg8[%c0_14, %c0_15] : memref<1x128xf32, #tpu.memory_space<vmem>>, vector<1x128xf32>
    %c0_16 = arith.constant 0 : index
    %c0_17 = arith.constant 0 : index
    %8 = vector.load %arg9[%c0_16, %c0_17] : memref<32x128xf32, #tpu.memory_space<vmem>>, vector<32x128xf32>
    %c0_18 = arith.constant 0 : index
    %c0_19 = arith.constant 0 : index
    %9 = vector.load %arg10[%c0_18, %c0_19] : memref<1x128xf32, #tpu.memory_space<vmem>>, vector<1x128xf32>
    %cst = arith.constant dense<0.000000e+00> : vector<32x128xf32>
    %10 = tpu.matmul %0, %4, %cst {dimension_numbers = #tpu.dot_dimension_numbers<[1], [0], [0], [1], [0, 0, 1, 1], [], []>} : vector<32x32xf32>, vector<32x128xf32>, vector<32x128xf32> -> vector<32x128xf32>
    %11 = vector.broadcast %5 : vector<1x128xf32> to vector<32x128xf32>
    %12 = arith.addf %10, %11 : vector<32x128xf32>
    %cst_20 = arith.constant dense<0.000000e+00> : vector<16x128xf32>
    %13 = tpu.matmul %2, %4, %cst_20 {dimension_numbers = #tpu.dot_dimension_numbers<[1], [0], [0], [1], [0, 0, 1, 1], [], []>} : vector<16x32xf32>, vector<32x128xf32>, vector<16x128xf32> -> vector<16x128xf32>
    %14 = vector.broadcast %5 : vector<1x128xf32> to vector<16x128xf32>
    %15 = arith.addf %13, %14 : vector<16x128xf32>
    %cst_21 = arith.constant dense<0.000000e+00> : vector<32x128xf32>
    %16 = tpu.matmul %1, %8, %cst_21 {dimension_numbers = #tpu.dot_dimension_numbers<[1], [0], [0], [1], [0, 0, 1, 1], [], []>} : vector<32x32xf32>, vector<32x128xf32>, vector<32x128xf32> -> vector<32x128xf32>
    %17 = vector.broadcast %9 : vector<1x128xf32> to vector<32x128xf32>
    %18 = arith.addf %16, %17 : vector<32x128xf32>
    %cst_22 = arith.constant 0.000000e+00 : f32
    %19 = vector.broadcast %cst_22 : f32 to vector<32x32xf32>
    %20 = vector.extract_strided_slice %12 {offsets = [0, 0], sizes = [32, 32], strides = [1, 1]} : vector<32x128xf32> to vector<32x32xf32>
    %21 = vector.shape_cast %20 : vector<32x32xf32> to vector<4x8x32xf32>
    %22 = vector.extract_strided_slice %18 {offsets = [0, 0], sizes = [32, 32], strides = [1, 1]} : vector<32x128xf32> to vector<32x32xf32>
    %23 = vector.shape_cast %22 : vector<32x32xf32> to vector<4x8x32xf32>
    %24 = vector.extract_strided_slice %15 {offsets = [0, 0], sizes = [8, 32], strides = [1, 1]} : vector<16x128xf32> to vector<8x32xf32>
    %25 = vector.shape_cast %24 : vector<8x32xf32> to vector<1x8x32xf32>
    %26 = vector.shape_cast %25 : vector<1x8x32xf32> to vector<1x8x32xf32>
    %27 = vector.broadcast %26 : vector<1x8x32xf32> to vector<4x8x32xf32>
    "tpu.trace_start"() <{level = 10 : i32, message = "btd,bxd->btx"}> : () -> ()
    %cst_23 = arith.constant dense<0.000000e+00> : vector<4x8x8xf32>
    %28 = tpu.matmul %27, %21, %cst_23 {dimension_numbers = #tpu.dot_dimension_numbers<[2], [2], [1], [1], [0, 0, 0, 1, 1, 1], [0], [0]>} : vector<4x8x32xf32>, vector<4x8x32xf32>, vector<4x8x8xf32> -> vector<4x8x8xf32>
    "tpu.trace_stop"() : () -> ()
    %cst_24 = arith.constant 5.65685415 : f32
    %29 = vector.broadcast %cst_24 : f32 to vector<4x8x8xf32>
    %30 = arith.divf %28, %29 : vector<4x8x8xf32>
    %31 = vector.broadcast %3 : vector<4x1x8xf32> to vector<4x8x8xf32>
    %32 = arith.addf %30, %31 : vector<4x8x8xf32>
    %33 = arith.mulf %24, %24 : vector<8x32xf32>
    %cst_25 = arith.constant dense<0.000000e+00> : vector<8xf32>
    %34 = vector.multi_reduction <add>, %33, %cst_25 [1] : vector<8x32xf32> to vector<8xf32>
    %35 = vector.shape_cast %34 : vector<8xf32> to vector<8x1xf32>
    %cst_26 = arith.constant 5.65685415 : f32
    %36 = vector.broadcast %cst_26 : f32 to vector<8x1xf32>
    %37 = arith.divf %35, %36 : vector<8x1xf32>
    %38 = vector.shape_cast %37 : vector<8x1xf32> to vector<1x8x1xf32>
    %cst_27 = arith.constant dense<0xFF800000> : vector<4x8xf32>
    %39 = vector.multi_reduction <maximumf>, %32, %cst_27 [2] : vector<4x8x8xf32> to vector<4x8xf32>
    %40 = vector.shape_cast %39 : vector<4x8xf32> to vector<4x8x1xf32>
    %41 = vector.broadcast %38 : vector<1x8x1xf32> to vector<4x8x1xf32>
    %42 = arith.maximumf %40, %41 : vector<4x8x1xf32>
    %43 = vector.broadcast %42 : vector<4x8x1xf32> to vector<4x8x8xf32>
    %44 = arith.subf %32, %43 : vector<4x8x8xf32>
    %45 = math.exp %44 : vector<4x8x8xf32>
    %46 = vector.broadcast %38 : vector<1x8x1xf32> to vector<4x8x1xf32>
    %47 = arith.subf %46, %42 : vector<4x8x1xf32>
    %48 = math.exp %47 : vector<4x8x1xf32>
    %cst_28 = arith.constant dense<0.000000e+00> : vector<4x8xf32>
    %49 = vector.multi_reduction <add>, %45, %cst_28 [2] : vector<4x8x8xf32> to vector<4x8xf32>
    %50 = vector.shape_cast %49 : vector<4x8xf32> to vector<4x8x1xf32>
    %51 = arith.addf %50, %48 : vector<4x8x1xf32>
    %cst_29 = arith.constant 1.000000e+00 : f32
    %52 = vector.broadcast %cst_29 : f32 to vector<4x8x1xf32>
    %53 = arith.divf %52, %51 : vector<4x8x1xf32>
    %54 = vector.broadcast %53 : vector<4x8x1xf32> to vector<4x8x8xf32>
    %55 = arith.mulf %45, %54 : vector<4x8x8xf32>
    "tpu.trace_start"() <{level = 10 : i32, message = "btx,bxd->btd"}> : () -> ()
    %cst_30 = arith.constant dense<0.000000e+00> : vector<4x8x32xf32>
    %56 = tpu.matmul %55, %21, %cst_30 {dimension_numbers = #tpu.dot_dimension_numbers<[2], [1], [1], [2], [0, 0, 0, 1, 1, 2], [0], [0]>} : vector<4x8x8xf32>, vector<4x8x32xf32>, vector<4x8x32xf32> -> vector<4x8x32xf32>
    "tpu.trace_stop"() : () -> ()
    %57 = arith.mulf %48, %53 : vector<4x8x1xf32>
    %58 = vector.shape_cast %24 : vector<8x32xf32> to vector<1x8x32xf32>
    %59 = vector.broadcast %57 : vector<4x8x1xf32> to vector<4x8x32xf32>
    %60 = vector.broadcast %58 : vector<1x8x32xf32> to vector<4x8x32xf32>
    %61 = arith.mulf %59, %60 : vector<4x8x32xf32>
    %cst_31 = arith.constant dense<0.000000e+00> : vector<4x32xf32>
    %62 = vector.multi_reduction <add>, %61, %cst_31 [1] : vector<4x8x32xf32> to vector<4x32xf32>
    %63 = vector.shape_cast %62 : vector<4x32xf32> to vector<4x1x32xf32>
    %64 = vector.broadcast %63 : vector<4x1x32xf32> to vector<4x8x32xf32>
    %65 = arith.addf %56, %64 : vector<4x8x32xf32>
    %66 = vector.extract_strided_slice %6 {offsets = [0, 0], sizes = [32, 32], strides = [1, 1]} : vector<32x128xf32> to vector<32x32xf32>
    %67 = vector.extract_strided_slice %7 {offsets = [0, 0], sizes = [1, 32], strides = [1, 1]} : vector<1x128xf32> to vector<1x32xf32>
    %68 = vector.shape_cast %65 : vector<4x8x32xf32> to vector<32x32xf32>
    %cst_32 = arith.constant dense<0.000000e+00> : vector<32x32xf32>
    %69 = tpu.matmul %68, %66, %cst_32 {dimension_numbers = #tpu.dot_dimension_numbers<[1], [0], [0], [1], [0, 0, 1, 1], [], []>} : vector<32x32xf32>, vector<32x32xf32>, vector<32x32xf32> -> vector<32x32xf32>
    %70 = vector.broadcast %67 : vector<1x32xf32> to vector<32x32xf32>
    %71 = arith.addf %69, %70 : vector<32x32xf32>
    %72 = vector.shape_cast %71 : vector<32x32xf32> to vector<4x8x32xf32>
    "tpu.trace_start"() <{level = 10 : i32, message = "byd,bxd->byx"}> : () -> ()
    %cst_33 = arith.constant dense<0.000000e+00> : vector<4x8x8xf32>
    %73 = tpu.matmul %72, %72, %cst_33 {dimension_numbers = #tpu.dot_dimension_numbers<[2], [2], [1], [1], [0, 0, 0, 1, 1, 1], [0], [0]>} : vector<4x8x32xf32>, vector<4x8x32xf32>, vector<4x8x8xf32> -> vector<4x8x8xf32>
    "tpu.trace_stop"() : () -> ()
    %cst_34 = arith.constant 5.65685415 : f32
    %74 = vector.broadcast %cst_34 : f32 to vector<4x8x8xf32>
    %75 = arith.divf %73, %74 : vector<4x8x8xf32>
    %cst_35 = arith.constant dense<0xFF800000> : vector<4x8xf32>
    %76 = vector.multi_reduction <maximumf>, %75, %cst_35 [2] : vector<4x8x8xf32> to vector<4x8xf32>
    %77 = vector.shape_cast %76 : vector<4x8xf32> to vector<4x8x1xf32>
    %78 = vector.broadcast %77 : vector<4x8x1xf32> to vector<4x8x8xf32>
    %79 = arith.subf %75, %78 : vector<4x8x8xf32>
    %80 = math.exp %79 : vector<4x8x8xf32>
    %cst_36 = arith.constant dense<0.000000e+00> : vector<4x8xf32>
    %81 = vector.multi_reduction <add>, %80, %cst_36 [2] : vector<4x8x8xf32> to vector<4x8xf32>
    %82 = vector.shape_cast %81 : vector<4x8xf32> to vector<4x8x1xf32>
    %83 = vector.broadcast %82 : vector<4x8x1xf32> to vector<4x8x8xf32>
    %84 = arith.divf %80, %83 : vector<4x8x8xf32>
    "tpu.trace_start"() <{level = 10 : i32, message = "byx,bxd->byd"}> : () -> ()
    %cst_37 = arith.constant dense<0.000000e+00> : vector<4x8x32xf32>
    %85 = tpu.matmul %84, %72, %cst_37 {dimension_numbers = #tpu.dot_dimension_numbers<[2], [1], [1], [2], [0, 0, 0, 1, 1, 2], [0], [0]>} : vector<4x8x8xf32>, vector<4x8x32xf32>, vector<4x8x32xf32> -> vector<4x8x32xf32>
    "tpu.trace_stop"() : () -> ()
    %86 = vector.extract_strided_slice %8 {offsets = [0, 0], sizes = [32, 32], strides = [1, 1]} : vector<32x128xf32> to vector<32x32xf32>
    %87 = vector.extract_strided_slice %9 {offsets = [0, 0], sizes = [1, 32], strides = [1, 1]} : vector<1x128xf32> to vector<1x32xf32>
    %88 = vector.shape_cast %85 : vector<4x8x32xf32> to vector<32x32xf32>
    %cst_38 = arith.constant dense<0.000000e+00> : vector<32x32xf32>
    %89 = tpu.matmul %88, %86, %cst_38 {dimension_numbers = #tpu.dot_dimension_numbers<[1], [0], [0], [1], [0, 0, 1, 1], [], []>} : vector<32x32xf32>, vector<32x32xf32>, vector<32x32xf32> -> vector<32x32xf32>
    %90 = vector.broadcast %87 : vector<1x32xf32> to vector<32x32xf32>
    %91 = arith.addf %89, %90 : vector<32x32xf32>
    %92 = vector.shape_cast %91 : vector<32x32xf32> to vector<4x8x32xf32>
    %93 = arith.mulf %23, %23 : vector<4x8x32xf32>
    %cst_39 = arith.constant dense<0.000000e+00> : vector<4x8xf32>
    %94 = vector.multi_reduction <add>, %93, %cst_39 [2] : vector<4x8x32xf32> to vector<4x8xf32>
    %95 = vector.shape_cast %94 : vector<4x8xf32> to vector<4x8x1xf32>
    %cst_40 = arith.constant 5.65685415 : f32
    %96 = vector.broadcast %cst_40 : f32 to vector<4x8x1xf32>
    %97 = arith.divf %95, %96 : vector<4x8x1xf32>
    "tpu.trace_start"() <{level = 10 : i32, message = "bzd,btd->bzt"}> : () -> ()
    %cst_41 = arith.constant dense<0.000000e+00> : vector<4x8x8xf32>
    %98 = tpu.matmul %23, %92, %cst_41 {dimension_numbers = #tpu.dot_dimension_numbers<[2], [2], [1], [1], [0, 0, 0, 1, 1, 1], [0], [0]>} : vector<4x8x32xf32>, vector<4x8x32xf32>, vector<4x8x8xf32> -> vector<4x8x8xf32>
    "tpu.trace_stop"() : () -> ()
    %cst_42 = arith.constant 5.65685415 : f32
    %99 = vector.broadcast %cst_42 : f32 to vector<4x8x8xf32>
    %100 = arith.divf %98, %99 : vector<4x8x8xf32>
    %cst_43 = arith.constant dense<0xFF800000> : vector<4x8xf32>
    %101 = vector.multi_reduction <maximumf>, %100, %cst_43 [2] : vector<4x8x8xf32> to vector<4x8xf32>
    %102 = vector.shape_cast %101 : vector<4x8xf32> to vector<4x8x1xf32>
    %103 = arith.maximumf %102, %97 : vector<4x8x1xf32>
    %104 = vector.broadcast %103 : vector<4x8x1xf32> to vector<4x8x8xf32>
    %105 = arith.subf %100, %104 : vector<4x8x8xf32>
    %106 = math.exp %105 : vector<4x8x8xf32>
    %107 = arith.subf %97, %103 : vector<4x8x1xf32>
    %108 = math.exp %107 : vector<4x8x1xf32>
    %cst_44 = arith.constant dense<0.000000e+00> : vector<4x8xf32>
    %109 = vector.multi_reduction <add>, %106, %cst_44 [2] : vector<4x8x8xf32> to vector<4x8xf32>
    %110 = vector.shape_cast %109 : vector<4x8xf32> to vector<4x8x1xf32>
    %111 = arith.addf %110, %108 : vector<4x8x1xf32>
    %cst_45 = arith.constant 1.000000e+00 : f32
    %112 = vector.broadcast %cst_45 : f32 to vector<4x8x1xf32>
    %113 = arith.divf %112, %111 : vector<4x8x1xf32>
    %114 = vector.broadcast %113 : vector<4x8x1xf32> to vector<4x8x8xf32>
    %115 = arith.mulf %106, %114 : vector<4x8x8xf32>
    "tpu.trace_start"() <{level = 10 : i32, message = "bzt,btd->bzd"}> : () -> ()
    %cst_46 = arith.constant dense<0.000000e+00> : vector<4x8x32xf32>
    %116 = tpu.matmul %115, %92, %cst_46 {dimension_numbers = #tpu.dot_dimension_numbers<[2], [1], [1], [2], [0, 0, 0, 1, 1, 2], [0], [0]>} : vector<4x8x8xf32>, vector<4x8x32xf32>, vector<4x8x32xf32> -> vector<4x8x32xf32>
    "tpu.trace_stop"() : () -> ()
    %117 = arith.mulf %108, %113 : vector<4x8x1xf32>
    %118 = vector.broadcast %117 : vector<4x8x1xf32> to vector<4x8x32xf32>
    %119 = arith.mulf %118, %23 : vector<4x8x32xf32>
    %cst_47 = arith.constant dense<0.000000e+00> : vector<4x32xf32>
    %120 = vector.multi_reduction <add>, %119, %cst_47 [1] : vector<4x8x32xf32> to vector<4x32xf32>
    %121 = vector.shape_cast %120 : vector<4x32xf32> to vector<4x1x32xf32>
    %122 = vector.broadcast %121 : vector<4x1x32xf32> to vector<4x8x32xf32>
    %123 = arith.addf %116, %122 : vector<4x8x32xf32>
    %124 = vector.shape_cast %123 : vector<4x8x32xf32> to vector<32x32xf32>
    %c0_48 = arith.constant 0 : index
    %c0_49 = arith.constant 0 : index
    %125 = vector.load %arg11[%c0_48, %c0_49] : memref<128x32xf32, #tpu.memory_space<vmem>>, vector<32x32xf32>
    %cst_50 = arith.constant dense<0.000000e+00> : vector<32x32xf32>
    %126 = tpu.matmul %124, %125, %cst_50 {dimension_numbers = #tpu.dot_dimension_numbers<[1], [0], [0], [1], [0, 0, 1, 1], [], []>} : vector<32x32xf32>, vector<32x32xf32>, vector<32x32xf32> -> vector<32x32xf32>
    %127 = arith.addf %19, %126 : vector<32x32xf32>
    %128 = vector.extract_strided_slice %12 {offsets = [0, 32], sizes = [32, 32], strides = [1, 1]} : vector<32x128xf32> to vector<32x32xf32>
    %129 = vector.shape_cast %128 : vector<32x32xf32> to vector<4x8x32xf32>
    %130 = vector.extract_strided_slice %18 {offsets = [0, 32], sizes = [32, 32], strides = [1, 1]} : vector<32x128xf32> to vector<32x32xf32>
    %131 = vector.shape_cast %130 : vector<32x32xf32> to vector<4x8x32xf32>
    %132 = vector.extract_strided_slice %15 {offsets = [0, 32], sizes = [8, 32], strides = [1, 1]} : vector<16x128xf32> to vector<8x32xf32>
    %133 = vector.shape_cast %132 : vector<8x32xf32> to vector<1x8x32xf32>
    %134 = vector.shape_cast %133 : vector<1x8x32xf32> to vector<1x8x32xf32>
    %135 = vector.broadcast %134 : vector<1x8x32xf32> to vector<4x8x32xf32>
    "tpu.trace_start"() <{level = 10 : i32, message = "btd,bxd->btx"}> : () -> ()
    %cst_51 = arith.constant dense<0.000000e+00> : vector<4x8x8xf32>
    %136 = tpu.matmul %135, %129, %cst_51 {dimension_numbers = #tpu.dot_dimension_numbers<[2], [2], [1], [1], [0, 0, 0, 1, 1, 1], [0], [0]>} : vector<4x8x32xf32>, vector<4x8x32xf32>, vector<4x8x8xf32> -> vector<4x8x8xf32>
    "tpu.trace_stop"() : () -> ()
    %cst_52 = arith.constant 5.65685415 : f32
    %137 = vector.broadcast %cst_52 : f32 to vector<4x8x8xf32>
    %138 = arith.divf %136, %137 : vector<4x8x8xf32>
    %139 = vector.broadcast %3 : vector<4x1x8xf32> to vector<4x8x8xf32>
    %140 = arith.addf %138, %139 : vector<4x8x8xf32>
    %141 = arith.mulf %132, %132 : vector<8x32xf32>
    %cst_53 = arith.constant dense<0.000000e+00> : vector<8xf32>
    %142 = vector.multi_reduction <add>, %141, %cst_53 [1] : vector<8x32xf32> to vector<8xf32>
    %143 = vector.shape_cast %142 : vector<8xf32> to vector<8x1xf32>
    %cst_54 = arith.constant 5.65685415 : f32
    %144 = vector.broadcast %cst_54 : f32 to vector<8x1xf32>
    %145 = arith.divf %143, %144 : vector<8x1xf32>
    %146 = vector.shape_cast %145 : vector<8x1xf32> to vector<1x8x1xf32>
    %cst_55 = arith.constant dense<0xFF800000> : vector<4x8xf32>
    %147 = vector.multi_reduction <maximumf>, %140, %cst_55 [2] : vector<4x8x8xf32> to vector<4x8xf32>
    %148 = vector.shape_cast %147 : vector<4x8xf32> to vector<4x8x1xf32>
    %149 = vector.broadcast %146 : vector<1x8x1xf32> to vector<4x8x1xf32>
    %150 = arith.maximumf %148, %149 : vector<4x8x1xf32>
    %151 = vector.broadcast %150 : vector<4x8x1xf32> to vector<4x8x8xf32>
    %152 = arith.subf %140, %151 : vector<4x8x8xf32>
    %153 = math.exp %152 : vector<4x8x8xf32>
    %154 = vector.broadcast %146 : vector<1x8x1xf32> to vector<4x8x1xf32>
    %155 = arith.subf %154, %150 : vector<4x8x1xf32>
    %156 = math.exp %155 : vector<4x8x1xf32>
    %cst_56 = arith.constant dense<0.000000e+00> : vector<4x8xf32>
    %157 = vector.multi_reduction <add>, %153, %cst_56 [2] : vector<4x8x8xf32> to vector<4x8xf32>
    %158 = vector.shape_cast %157 : vector<4x8xf32> to vector<4x8x1xf32>
    %159 = arith.addf %158, %156 : vector<4x8x1xf32>
    %cst_57 = arith.constant 1.000000e+00 : f32
    %160 = vector.broadcast %cst_57 : f32 to vector<4x8x1xf32>
    %161 = arith.divf %160, %159 : vector<4x8x1xf32>
    %162 = vector.broadcast %161 : vector<4x8x1xf32> to vector<4x8x8xf32>
    %163 = arith.mulf %153, %162 : vector<4x8x8xf32>
    "tpu.trace_start"() <{level = 10 : i32, message = "btx,bxd->btd"}> : () -> ()
    %cst_58 = arith.constant dense<0.000000e+00> : vector<4x8x32xf32>
    %164 = tpu.matmul %163, %129, %cst_58 {dimension_numbers = #tpu.dot_dimension_numbers<[2], [1], [1], [2], [0, 0, 0, 1, 1, 2], [0], [0]>} : vector<4x8x8xf32>, vector<4x8x32xf32>, vector<4x8x32xf32> -> vector<4x8x32xf32>
    "tpu.trace_stop"() : () -> ()
    %165 = arith.mulf %156, %161 : vector<4x8x1xf32>
    %166 = vector.shape_cast %132 : vector<8x32xf32> to vector<1x8x32xf32>
    %167 = vector.broadcast %165 : vector<4x8x1xf32> to vector<4x8x32xf32>
    %168 = vector.broadcast %166 : vector<1x8x32xf32> to vector<4x8x32xf32>
    %169 = arith.mulf %167, %168 : vector<4x8x32xf32>
    %cst_59 = arith.constant dense<0.000000e+00> : vector<4x32xf32>
    %170 = vector.multi_reduction <add>, %169, %cst_59 [1] : vector<4x8x32xf32> to vector<4x32xf32>
    %171 = vector.shape_cast %170 : vector<4x32xf32> to vector<4x1x32xf32>
    %172 = vector.broadcast %171 : vector<4x1x32xf32> to vector<4x8x32xf32>
    %173 = arith.addf %164, %172 : vector<4x8x32xf32>
    %174 = vector.extract_strided_slice %6 {offsets = [0, 32], sizes = [32, 32], strides = [1, 1]} : vector<32x128xf32> to vector<32x32xf32>
    %175 = vector.extract_strided_slice %7 {offsets = [0, 32], sizes = [1, 32], strides = [1, 1]} : vector<1x128xf32> to vector<1x32xf32>
    %176 = vector.shape_cast %173 : vector<4x8x32xf32> to vector<32x32xf32>
    %cst_60 = arith.constant dense<0.000000e+00> : vector<32x32xf32>
    %177 = tpu.matmul %176, %174, %cst_60 {dimension_numbers = #tpu.dot_dimension_numbers<[1], [0], [0], [1], [0, 0, 1, 1], [], []>} : vector<32x32xf32>, vector<32x32xf32>, vector<32x32xf32> -> vector<32x32xf32>
    %178 = vector.broadcast %175 : vector<1x32xf32> to vector<32x32xf32>
    %179 = arith.addf %177, %178 : vector<32x32xf32>
    %180 = vector.shape_cast %179 : vector<32x32xf32> to vector<4x8x32xf32>
    "tpu.trace_start"() <{level = 10 : i32, message = "byd,bxd->byx"}> : () -> ()
    %cst_61 = arith.constant dense<0.000000e+00> : vector<4x8x8xf32>
    %181 = tpu.matmul %180, %180, %cst_61 {dimension_numbers = #tpu.dot_dimension_numbers<[2], [2], [1], [1], [0, 0, 0, 1, 1, 1], [0], [0]>} : vector<4x8x32xf32>, vector<4x8x32xf32>, vector<4x8x8xf32> -> vector<4x8x8xf32>
    "tpu.trace_stop"() : () -> ()
    %cst_62 = arith.constant 5.65685415 : f32
    %182 = vector.broadcast %cst_62 : f32 to vector<4x8x8xf32>
    %183 = arith.divf %181, %182 : vector<4x8x8xf32>
    %cst_63 = arith.constant dense<0xFF800000> : vector<4x8xf32>
    %184 = vector.multi_reduction <maximumf>, %183, %cst_63 [2] : vector<4x8x8xf32> to vector<4x8xf32>
    %185 = vector.shape_cast %184 : vector<4x8xf32> to vector<4x8x1xf32>
    %186 = vector.broadcast %185 : vector<4x8x1xf32> to vector<4x8x8xf32>
    %187 = arith.subf %183, %186 : vector<4x8x8xf32>
    %188 = math.exp %187 : vector<4x8x8xf32>
    %cst_64 = arith.constant dense<0.000000e+00> : vector<4x8xf32>
    %189 = vector.multi_reduction <add>, %188, %cst_64 [2] : vector<4x8x8xf32> to vector<4x8xf32>
    %190 = vector.shape_cast %189 : vector<4x8xf32> to vector<4x8x1xf32>
    %191 = vector.broadcast %190 : vector<4x8x1xf32> to vector<4x8x8xf32>
    %192 = arith.divf %188, %191 : vector<4x8x8xf32>
    "tpu.trace_start"() <{level = 10 : i32, message = "byx,bxd->byd"}> : () -> ()
    %cst_65 = arith.constant dense<0.000000e+00> : vector<4x8x32xf32>
    %193 = tpu.matmul %192, %180, %cst_65 {dimension_numbers = #tpu.dot_dimension_numbers<[2], [1], [1], [2], [0, 0, 0, 1, 1, 2], [0], [0]>} : vector<4x8x8xf32>, vector<4x8x32xf32>, vector<4x8x32xf32> -> vector<4x8x32xf32>
    "tpu.trace_stop"() : () -> ()
    %194 = vector.extract_strided_slice %8 {offsets = [0, 32], sizes = [32, 32], strides = [1, 1]} : vector<32x128xf32> to vector<32x32xf32>
    %195 = vector.extract_strided_slice %9 {offsets = [0, 32], sizes = [1, 32], strides = [1, 1]} : vector<1x128xf32> to vector<1x32xf32>
    %196 = vector.shape_cast %193 : vector<4x8x32xf32> to vector<32x32xf32>
    %cst_66 = arith.constant dense<0.000000e+00> : vector<32x32xf32>
    %197 = tpu.matmul %196, %194, %cst_66 {dimension_numbers = #tpu.dot_dimension_numbers<[1], [0], [0], [1], [0, 0, 1, 1], [], []>} : vector<32x32xf32>, vector<32x32xf32>, vector<32x32xf32> -> vector<32x32xf32>
    %198 = vector.broadcast %195 : vector<1x32xf32> to vector<32x32xf32>
    %199 = arith.addf %197, %198 : vector<32x32xf32>
    %200 = vector.shape_cast %199 : vector<32x32xf32> to vector<4x8x32xf32>
    %201 = arith.mulf %131, %131 : vector<4x8x32xf32>
    %cst_67 = arith.constant dense<0.000000e+00> : vector<4x8xf32>
    %202 = vector.multi_reduction <add>, %201, %cst_67 [2] : vector<4x8x32xf32> to vector<4x8xf32>
    %203 = vector.shape_cast %202 : vector<4x8xf32> to vector<4x8x1xf32>
    %cst_68 = arith.constant 5.65685415 : f32
    %204 = vector.broadcast %cst_68 : f32 to vector<4x8x1xf32>
    %205 = arith.divf %203, %204 : vector<4x8x1xf32>
    "tpu.trace_start"() <{level = 10 : i32, message = "bzd,btd->bzt"}> : () -> ()
    %cst_69 = arith.constant dense<0.000000e+00> : vector<4x8x8xf32>
    %206 = tpu.matmul %131, %200, %cst_69 {dimension_numbers = #tpu.dot_dimension_numbers<[2], [2], [1], [1], [0, 0, 0, 1, 1, 1], [0], [0]>} : vector<4x8x32xf32>, vector<4x8x32xf32>, vector<4x8x8xf32> -> vector<4x8x8xf32>
    "tpu.trace_stop"() : () -> ()
    %cst_70 = arith.constant 5.65685415 : f32
    %207 = vector.broadcast %cst_70 : f32 to vector<4x8x8xf32>
    %208 = arith.divf %206, %207 : vector<4x8x8xf32>
    %cst_71 = arith.constant dense<0xFF800000> : vector<4x8xf32>
    %209 = vector.multi_reduction <maximumf>, %208, %cst_71 [2] : vector<4x8x8xf32> to vector<4x8xf32>
    %210 = vector.shape_cast %209 : vector<4x8xf32> to vector<4x8x1xf32>
    %211 = arith.maximumf %210, %205 : vector<4x8x1xf32>
    %212 = vector.broadcast %211 : vector<4x8x1xf32> to vector<4x8x8xf32>
    %213 = arith.subf %208, %212 : vector<4x8x8xf32>
    %214 = math.exp %213 : vector<4x8x8xf32>
    %215 = arith.subf %205, %211 : vector<4x8x1xf32>
    %216 = math.exp %215 : vector<4x8x1xf32>
    %cst_72 = arith.constant dense<0.000000e+00> : vector<4x8xf32>
    %217 = vector.multi_reduction <add>, %214, %cst_72 [2] : vector<4x8x8xf32> to vector<4x8xf32>
    %218 = vector.shape_cast %217 : vector<4x8xf32> to vector<4x8x1xf32>
    %219 = arith.addf %218, %216 : vector<4x8x1xf32>
    %cst_73 = arith.constant 1.000000e+00 : f32
    %220 = vector.broadcast %cst_73 : f32 to vector<4x8x1xf32>
    %221 = arith.divf %220, %219 : vector<4x8x1xf32>
    %222 = vector.broadcast %221 : vector<4x8x1xf32> to vector<4x8x8xf32>
    %223 = arith.mulf %214, %222 : vector<4x8x8xf32>
    "tpu.trace_start"() <{level = 10 : i32, message = "bzt,btd->bzd"}> : () -> ()
    %cst_74 = arith.constant dense<0.000000e+00> : vector<4x8x32xf32>
    %224 = tpu.matmul %223, %200, %cst_74 {dimension_numbers = #tpu.dot_dimension_numbers<[2], [1], [1], [2], [0, 0, 0, 1, 1, 2], [0], [0]>} : vector<4x8x8xf32>, vector<4x8x32xf32>, vector<4x8x32xf32> -> vector<4x8x32xf32>
    "tpu.trace_stop"() : () -> ()
    %225 = arith.mulf %216, %221 : vector<4x8x1xf32>
    %226 = vector.broadcast %225 : vector<4x8x1xf32> to vector<4x8x32xf32>
    %227 = arith.mulf %226, %131 : vector<4x8x32xf32>
    %cst_75 = arith.constant dense<0.000000e+00> : vector<4x32xf32>
    %228 = vector.multi_reduction <add>, %227, %cst_75 [1] : vector<4x8x32xf32> to vector<4x32xf32>
    %229 = vector.shape_cast %228 : vector<4x32xf32> to vector<4x1x32xf32>
    %230 = vector.broadcast %229 : vector<4x1x32xf32> to vector<4x8x32xf32>
    %231 = arith.addf %224, %230 : vector<4x8x32xf32>
    %232 = vector.shape_cast %231 : vector<4x8x32xf32> to vector<32x32xf32>
    %c32 = arith.constant 32 : index
    %c0_76 = arith.constant 0 : index
    %233 = vector.load %arg11[%c32, %c0_76] : memref<128x32xf32, #tpu.memory_space<vmem>>, vector<32x32xf32>
    %cst_77 = arith.constant dense<0.000000e+00> : vector<32x32xf32>
    %234 = tpu.matmul %232, %233, %cst_77 {dimension_numbers = #tpu.dot_dimension_numbers<[1], [0], [0], [1], [0, 0, 1, 1], [], []>} : vector<32x32xf32>, vector<32x32xf32>, vector<32x32xf32> -> vector<32x32xf32>
    %235 = arith.addf %127, %234 : vector<32x32xf32>
    %236 = vector.extract_strided_slice %12 {offsets = [0, 64], sizes = [32, 32], strides = [1, 1]} : vector<32x128xf32> to vector<32x32xf32>
    %237 = vector.shape_cast %236 : vector<32x32xf32> to vector<4x8x32xf32>
    %238 = vector.extract_strided_slice %18 {offsets = [0, 64], sizes = [32, 32], strides = [1, 1]} : vector<32x128xf32> to vector<32x32xf32>
    %239 = vector.shape_cast %238 : vector<32x32xf32> to vector<4x8x32xf32>
    %240 = vector.extract_strided_slice %15 {offsets = [8, 64], sizes = [8, 32], strides = [1, 1]} : vector<16x128xf32> to vector<8x32xf32>
    %241 = vector.shape_cast %240 : vector<8x32xf32> to vector<1x8x32xf32>
    %242 = vector.shape_cast %241 : vector<1x8x32xf32> to vector<1x8x32xf32>
    %243 = vector.broadcast %242 : vector<1x8x32xf32> to vector<4x8x32xf32>
    "tpu.trace_start"() <{level = 10 : i32, message = "btd,bxd->btx"}> : () -> ()
    %cst_78 = arith.constant dense<0.000000e+00> : vector<4x8x8xf32>
    %244 = tpu.matmul %243, %237, %cst_78 {dimension_numbers = #tpu.dot_dimension_numbers<[2], [2], [1], [1], [0, 0, 0, 1, 1, 1], [0], [0]>} : vector<4x8x32xf32>, vector<4x8x32xf32>, vector<4x8x8xf32> -> vector<4x8x8xf32>
    "tpu.trace_stop"() : () -> ()
    %cst_79 = arith.constant 5.65685415 : f32
    %245 = vector.broadcast %cst_79 : f32 to vector<4x8x8xf32>
    %246 = arith.divf %244, %245 : vector<4x8x8xf32>
    %247 = vector.broadcast %3 : vector<4x1x8xf32> to vector<4x8x8xf32>
    %248 = arith.addf %246, %247 : vector<4x8x8xf32>
    %249 = arith.mulf %240, %240 : vector<8x32xf32>
    %cst_80 = arith.constant dense<0.000000e+00> : vector<8xf32>
    %250 = vector.multi_reduction <add>, %249, %cst_80 [1] : vector<8x32xf32> to vector<8xf32>
    %251 = vector.shape_cast %250 : vector<8xf32> to vector<8x1xf32>
    %cst_81 = arith.constant 5.65685415 : f32
    %252 = vector.broadcast %cst_81 : f32 to vector<8x1xf32>
    %253 = arith.divf %251, %252 : vector<8x1xf32>
    %254 = vector.shape_cast %253 : vector<8x1xf32> to vector<1x8x1xf32>
    %cst_82 = arith.constant dense<0xFF800000> : vector<4x8xf32>
    %255 = vector.multi_reduction <maximumf>, %248, %cst_82 [2] : vector<4x8x8xf32> to vector<4x8xf32>
    %256 = vector.shape_cast %255 : vector<4x8xf32> to vector<4x8x1xf32>
    %257 = vector.broadcast %254 : vector<1x8x1xf32> to vector<4x8x1xf32>
    %258 = arith.maximumf %256, %257 : vector<4x8x1xf32>
    %259 = vector.broadcast %258 : vector<4x8x1xf32> to vector<4x8x8xf32>
    %260 = arith.subf %248, %259 : vector<4x8x8xf32>
    %261 = math.exp %260 : vector<4x8x8xf32>
    %262 = vector.broadcast %254 : vector<1x8x1xf32> to vector<4x8x1xf32>
    %263 = arith.subf %262, %258 : vector<4x8x1xf32>
    %264 = math.exp %263 : vector<4x8x1xf32>
    %cst_83 = arith.constant dense<0.000000e+00> : vector<4x8xf32>
    %265 = vector.multi_reduction <add>, %261, %cst_83 [2] : vector<4x8x8xf32> to vector<4x8xf32>
    %266 = vector.shape_cast %265 : vector<4x8xf32> to vector<4x8x1xf32>
    %267 = arith.addf %266, %264 : vector<4x8x1xf32>
    %cst_84 = arith.constant 1.000000e+00 : f32
    %268 = vector.broadcast %cst_84 : f32 to vector<4x8x1xf32>
    %269 = arith.divf %268, %267 : vector<4x8x1xf32>
    %270 = vector.broadcast %269 : vector<4x8x1xf32> to vector<4x8x8xf32>
    %271 = arith.mulf %261, %270 : vector<4x8x8xf32>
    "tpu.trace_start"() <{level = 10 : i32, message = "btx,bxd->btd"}> : () -> ()
    %cst_85 = arith.constant dense<0.000000e+00> : vector<4x8x32xf32>
    %272 = tpu.matmul %271, %237, %cst_85 {dimension_numbers = #tpu.dot_dimension_numbers<[2], [1], [1], [2], [0, 0, 0, 1, 1, 2], [0], [0]>} : vector<4x8x8xf32>, vector<4x8x32xf32>, vector<4x8x32xf32> -> vector<4x8x32xf32>
    "tpu.trace_stop"() : () -> ()
    %273 = arith.mulf %264, %269 : vector<4x8x1xf32>
    %274 = vector.shape_cast %240 : vector<8x32xf32> to vector<1x8x32xf32>
    %275 = vector.broadcast %273 : vector<4x8x1xf32> to vector<4x8x32xf32>
    %276 = vector.broadcast %274 : vector<1x8x32xf32> to vector<4x8x32xf32>
    %277 = arith.mulf %275, %276 : vector<4x8x32xf32>
    %cst_86 = arith.constant dense<0.000000e+00> : vector<4x32xf32>
    %278 = vector.multi_reduction <add>, %277, %cst_86 [1] : vector<4x8x32xf32> to vector<4x32xf32>
    %279 = vector.shape_cast %278 : vector<4x32xf32> to vector<4x1x32xf32>
    %280 = vector.broadcast %279 : vector<4x1x32xf32> to vector<4x8x32xf32>
    %281 = arith.addf %272, %280 : vector<4x8x32xf32>
    %282 = vector.extract_strided_slice %6 {offsets = [0, 64], sizes = [32, 32], strides = [1, 1]} : vector<32x128xf32> to vector<32x32xf32>
    %283 = vector.extract_strided_slice %7 {offsets = [0, 64], sizes = [1, 32], strides = [1, 1]} : vector<1x128xf32> to vector<1x32xf32>
    %284 = vector.shape_cast %281 : vector<4x8x32xf32> to vector<32x32xf32>
    %cst_87 = arith.constant dense<0.000000e+00> : vector<32x32xf32>
    %285 = tpu.matmul %284, %282, %cst_87 {dimension_numbers = #tpu.dot_dimension_numbers<[1], [0], [0], [1], [0, 0, 1, 1], [], []>} : vector<32x32xf32>, vector<32x32xf32>, vector<32x32xf32> -> vector<32x32xf32>
    %286 = vector.broadcast %283 : vector<1x32xf32> to vector<32x32xf32>
    %287 = arith.addf %285, %286 : vector<32x32xf32>
    %288 = vector.shape_cast %287 : vector<32x32xf32> to vector<4x8x32xf32>
    "tpu.trace_start"() <{level = 10 : i32, message = "byd,bxd->byx"}> : () -> ()
    %cst_88 = arith.constant dense<0.000000e+00> : vector<4x8x8xf32>
    %289 = tpu.matmul %288, %288, %cst_88 {dimension_numbers = #tpu.dot_dimension_numbers<[2], [2], [1], [1], [0, 0, 0, 1, 1, 1], [0], [0]>} : vector<4x8x32xf32>, vector<4x8x32xf32>, vector<4x8x8xf32> -> vector<4x8x8xf32>
    "tpu.trace_stop"() : () -> ()
    %cst_89 = arith.constant 5.65685415 : f32
    %290 = vector.broadcast %cst_89 : f32 to vector<4x8x8xf32>
    %291 = arith.divf %289, %290 : vector<4x8x8xf32>
    %cst_90 = arith.constant dense<0xFF800000> : vector<4x8xf32>
    %292 = vector.multi_reduction <maximumf>, %291, %cst_90 [2] : vector<4x8x8xf32> to vector<4x8xf32>
    %293 = vector.shape_cast %292 : vector<4x8xf32> to vector<4x8x1xf32>
    %294 = vector.broadcast %293 : vector<4x8x1xf32> to vector<4x8x8xf32>
    %295 = arith.subf %291, %294 : vector<4x8x8xf32>
    %296 = math.exp %295 : vector<4x8x8xf32>
    %cst_91 = arith.constant dense<0.000000e+00> : vector<4x8xf32>
    %297 = vector.multi_reduction <add>, %296, %cst_91 [2] : vector<4x8x8xf32> to vector<4x8xf32>
    %298 = vector.shape_cast %297 : vector<4x8xf32> to vector<4x8x1xf32>
    %299 = vector.broadcast %298 : vector<4x8x1xf32> to vector<4x8x8xf32>
    %300 = arith.divf %296, %299 : vector<4x8x8xf32>
    "tpu.trace_start"() <{level = 10 : i32, message = "byx,bxd->byd"}> : () -> ()
    %cst_92 = arith.constant dense<0.000000e+00> : vector<4x8x32xf32>
    %301 = tpu.matmul %300, %288, %cst_92 {dimension_numbers = #tpu.dot_dimension_numbers<[2], [1], [1], [2], [0, 0, 0, 1, 1, 2], [0], [0]>} : vector<4x8x8xf32>, vector<4x8x32xf32>, vector<4x8x32xf32> -> vector<4x8x32xf32>
    "tpu.trace_stop"() : () -> ()
    %302 = vector.extract_strided_slice %8 {offsets = [0, 64], sizes = [32, 32], strides = [1, 1]} : vector<32x128xf32> to vector<32x32xf32>
    %303 = vector.extract_strided_slice %9 {offsets = [0, 64], sizes = [1, 32], strides = [1, 1]} : vector<1x128xf32> to vector<1x32xf32>
    %304 = vector.shape_cast %301 : vector<4x8x32xf32> to vector<32x32xf32>
    %cst_93 = arith.constant dense<0.000000e+00> : vector<32x32xf32>
    %305 = tpu.matmul %304, %302, %cst_93 {dimension_numbers = #tpu.dot_dimension_numbers<[1], [0], [0], [1], [0, 0, 1, 1], [], []>} : vector<32x32xf32>, vector<32x32xf32>, vector<32x32xf32> -> vector<32x32xf32>
    %306 = vector.broadcast %303 : vector<1x32xf32> to vector<32x32xf32>
    %307 = arith.addf %305, %306 : vector<32x32xf32>
    %308 = vector.shape_cast %307 : vector<32x32xf32> to vector<4x8x32xf32>
    %309 = arith.mulf %239, %239 : vector<4x8x32xf32>
    %cst_94 = arith.constant dense<0.000000e+00> : vector<4x8xf32>
    %310 = vector.multi_reduction <add>, %309, %cst_94 [2] : vector<4x8x32xf32> to vector<4x8xf32>
    %311 = vector.shape_cast %310 : vector<4x8xf32> to vector<4x8x1xf32>
    %cst_95 = arith.constant 5.65685415 : f32
    %312 = vector.broadcast %cst_95 : f32 to vector<4x8x1xf32>
    %313 = arith.divf %311, %312 : vector<4x8x1xf32>
    "tpu.trace_start"() <{level = 10 : i32, message = "bzd,btd->bzt"}> : () -> ()
    %cst_96 = arith.constant dense<0.000000e+00> : vector<4x8x8xf32>
    %314 = tpu.matmul %239, %308, %cst_96 {dimension_numbers = #tpu.dot_dimension_numbers<[2], [2], [1], [1], [0, 0, 0, 1, 1, 1], [0], [0]>} : vector<4x8x32xf32>, vector<4x8x32xf32>, vector<4x8x8xf32> -> vector<4x8x8xf32>
    "tpu.trace_stop"() : () -> ()
    %cst_97 = arith.constant 5.65685415 : f32
    %315 = vector.broadcast %cst_97 : f32 to vector<4x8x8xf32>
    %316 = arith.divf %314, %315 : vector<4x8x8xf32>
    %cst_98 = arith.constant dense<0xFF800000> : vector<4x8xf32>
    %317 = vector.multi_reduction <maximumf>, %316, %cst_98 [2] : vector<4x8x8xf32> to vector<4x8xf32>
    %318 = vector.shape_cast %317 : vector<4x8xf32> to vector<4x8x1xf32>
    %319 = arith.maximumf %318, %313 : vector<4x8x1xf32>
    %320 = vector.broadcast %319 : vector<4x8x1xf32> to vector<4x8x8xf32>
    %321 = arith.subf %316, %320 : vector<4x8x8xf32>
    %322 = math.exp %321 : vector<4x8x8xf32>
    %323 = arith.subf %313, %319 : vector<4x8x1xf32>
    %324 = math.exp %323 : vector<4x8x1xf32>
    %cst_99 = arith.constant dense<0.000000e+00> : vector<4x8xf32>
    %325 = vector.multi_reduction <add>, %322, %cst_99 [2] : vector<4x8x8xf32> to vector<4x8xf32>
    %326 = vector.shape_cast %325 : vector<4x8xf32> to vector<4x8x1xf32>
    %327 = arith.addf %326, %324 : vector<4x8x1xf32>
    %cst_100 = arith.constant 1.000000e+00 : f32
    %328 = vector.broadcast %cst_100 : f32 to vector<4x8x1xf32>
    %329 = arith.divf %328, %327 : vector<4x8x1xf32>
    %330 = vector.broadcast %329 : vector<4x8x1xf32> to vector<4x8x8xf32>
    %331 = arith.mulf %322, %330 : vector<4x8x8xf32>
    "tpu.trace_start"() <{level = 10 : i32, message = "bzt,btd->bzd"}> : () -> ()
    %cst_101 = arith.constant dense<0.000000e+00> : vector<4x8x32xf32>
    %332 = tpu.matmul %331, %308, %cst_101 {dimension_numbers = #tpu.dot_dimension_numbers<[2], [1], [1], [2], [0, 0, 0, 1, 1, 2], [0], [0]>} : vector<4x8x8xf32>, vector<4x8x32xf32>, vector<4x8x32xf32> -> vector<4x8x32xf32>
    "tpu.trace_stop"() : () -> ()
    %333 = arith.mulf %324, %329 : vector<4x8x1xf32>
    %334 = vector.broadcast %333 : vector<4x8x1xf32> to vector<4x8x32xf32>
    %335 = arith.mulf %334, %239 : vector<4x8x32xf32>
    %cst_102 = arith.constant dense<0.000000e+00> : vector<4x32xf32>
    %336 = vector.multi_reduction <add>, %335, %cst_102 [1] : vector<4x8x32xf32> to vector<4x32xf32>
    %337 = vector.shape_cast %336 : vector<4x32xf32> to vector<4x1x32xf32>
    %338 = vector.broadcast %337 : vector<4x1x32xf32> to vector<4x8x32xf32>
    %339 = arith.addf %332, %338 : vector<4x8x32xf32>
    %340 = vector.shape_cast %339 : vector<4x8x32xf32> to vector<32x32xf32>
    %c64 = arith.constant 64 : index
    %c0_103 = arith.constant 0 : index
    %341 = vector.load %arg11[%c64, %c0_103] : memref<128x32xf32, #tpu.memory_space<vmem>>, vector<32x32xf32>
    %cst_104 = arith.constant dense<0.000000e+00> : vector<32x32xf32>
    %342 = tpu.matmul %340, %341, %cst_104 {dimension_numbers = #tpu.dot_dimension_numbers<[1], [0], [0], [1], [0, 0, 1, 1], [], []>} : vector<32x32xf32>, vector<32x32xf32>, vector<32x32xf32> -> vector<32x32xf32>
    %343 = arith.addf %235, %342 : vector<32x32xf32>
    %344 = vector.extract_strided_slice %12 {offsets = [0, 96], sizes = [32, 32], strides = [1, 1]} : vector<32x128xf32> to vector<32x32xf32>
    %345 = vector.shape_cast %344 : vector<32x32xf32> to vector<4x8x32xf32>
    %346 = vector.extract_strided_slice %18 {offsets = [0, 96], sizes = [32, 32], strides = [1, 1]} : vector<32x128xf32> to vector<32x32xf32>
    %347 = vector.shape_cast %346 : vector<32x32xf32> to vector<4x8x32xf32>
    %348 = vector.extract_strided_slice %15 {offsets = [8, 96], sizes = [8, 32], strides = [1, 1]} : vector<16x128xf32> to vector<8x32xf32>
    %349 = vector.shape_cast %348 : vector<8x32xf32> to vector<1x8x32xf32>
    %350 = vector.shape_cast %349 : vector<1x8x32xf32> to vector<1x8x32xf32>
    %351 = vector.broadcast %350 : vector<1x8x32xf32> to vector<4x8x32xf32>
    "tpu.trace_start"() <{level = 10 : i32, message = "btd,bxd->btx"}> : () -> ()
    %cst_105 = arith.constant dense<0.000000e+00> : vector<4x8x8xf32>
    %352 = tpu.matmul %351, %345, %cst_105 {dimension_numbers = #tpu.dot_dimension_numbers<[2], [2], [1], [1], [0, 0, 0, 1, 1, 1], [0], [0]>} : vector<4x8x32xf32>, vector<4x8x32xf32>, vector<4x8x8xf32> -> vector<4x8x8xf32>
    "tpu.trace_stop"() : () -> ()
    %cst_106 = arith.constant 5.65685415 : f32
    %353 = vector.broadcast %cst_106 : f32 to vector<4x8x8xf32>
    %354 = arith.divf %352, %353 : vector<4x8x8xf32>
    %355 = vector.broadcast %3 : vector<4x1x8xf32> to vector<4x8x8xf32>
    %356 = arith.addf %354, %355 : vector<4x8x8xf32>
    %357 = arith.mulf %348, %348 : vector<8x32xf32>
    %cst_107 = arith.constant dense<0.000000e+00> : vector<8xf32>
    %358 = vector.multi_reduction <add>, %357, %cst_107 [1] : vector<8x32xf32> to vector<8xf32>
    %359 = vector.shape_cast %358 : vector<8xf32> to vector<8x1xf32>
    %cst_108 = arith.constant 5.65685415 : f32
    %360 = vector.broadcast %cst_108 : f32 to vector<8x1xf32>
    %361 = arith.divf %359, %360 : vector<8x1xf32>
    %362 = vector.shape_cast %361 : vector<8x1xf32> to vector<1x8x1xf32>
    %cst_109 = arith.constant dense<0xFF800000> : vector<4x8xf32>
    %363 = vector.multi_reduction <maximumf>, %356, %cst_109 [2] : vector<4x8x8xf32> to vector<4x8xf32>
    %364 = vector.shape_cast %363 : vector<4x8xf32> to vector<4x8x1xf32>
    %365 = vector.broadcast %362 : vector<1x8x1xf32> to vector<4x8x1xf32>
    %366 = arith.maximumf %364, %365 : vector<4x8x1xf32>
    %367 = vector.broadcast %366 : vector<4x8x1xf32> to vector<4x8x8xf32>
    %368 = arith.subf %356, %367 : vector<4x8x8xf32>
    %369 = math.exp %368 : vector<4x8x8xf32>
    %370 = vector.broadcast %362 : vector<1x8x1xf32> to vector<4x8x1xf32>
    %371 = arith.subf %370, %366 : vector<4x8x1xf32>
    %372 = math.exp %371 : vector<4x8x1xf32>
    %cst_110 = arith.constant dense<0.000000e+00> : vector<4x8xf32>
    %373 = vector.multi_reduction <add>, %369, %cst_110 [2] : vector<4x8x8xf32> to vector<4x8xf32>
    %374 = vector.shape_cast %373 : vector<4x8xf32> to vector<4x8x1xf32>
    %375 = arith.addf %374, %372 : vector<4x8x1xf32>
    %cst_111 = arith.constant 1.000000e+00 : f32
    %376 = vector.broadcast %cst_111 : f32 to vector<4x8x1xf32>
    %377 = arith.divf %376, %375 : vector<4x8x1xf32>
    %378 = vector.broadcast %377 : vector<4x8x1xf32> to vector<4x8x8xf32>
    %379 = arith.mulf %369, %378 : vector<4x8x8xf32>
    "tpu.trace_start"() <{level = 10 : i32, message = "btx,bxd->btd"}> : () -> ()
    %cst_112 = arith.constant dense<0.000000e+00> : vector<4x8x32xf32>
    %380 = tpu.matmul %379, %345, %cst_112 {dimension_numbers = #tpu.dot_dimension_numbers<[2], [1], [1], [2], [0, 0, 0, 1, 1, 2], [0], [0]>} : vector<4x8x8xf32>, vector<4x8x32xf32>, vector<4x8x32xf32> -> vector<4x8x32xf32>
    "tpu.trace_stop"() : () -> ()
    %381 = arith.mulf %372, %377 : vector<4x8x1xf32>
    %382 = vector.shape_cast %348 : vector<8x32xf32> to vector<1x8x32xf32>
    %383 = vector.broadcast %381 : vector<4x8x1xf32> to vector<4x8x32xf32>
    %384 = vector.broadcast %382 : vector<1x8x32xf32> to vector<4x8x32xf32>
    %385 = arith.mulf %383, %384 : vector<4x8x32xf32>
    %cst_113 = arith.constant dense<0.000000e+00> : vector<4x32xf32>
    %386 = vector.multi_reduction <add>, %385, %cst_113 [1] : vector<4x8x32xf32> to vector<4x32xf32>
    %387 = vector.shape_cast %386 : vector<4x32xf32> to vector<4x1x32xf32>
    %388 = vector.broadcast %387 : vector<4x1x32xf32> to vector<4x8x32xf32>
    %389 = arith.addf %380, %388 : vector<4x8x32xf32>
    %390 = vector.extract_strided_slice %6 {offsets = [0, 96], sizes = [32, 32], strides = [1, 1]} : vector<32x128xf32> to vector<32x32xf32>
    %391 = vector.extract_strided_slice %7 {offsets = [0, 96], sizes = [1, 32], strides = [1, 1]} : vector<1x128xf32> to vector<1x32xf32>
    %392 = vector.shape_cast %389 : vector<4x8x32xf32> to vector<32x32xf32>
    %cst_114 = arith.constant dense<0.000000e+00> : vector<32x32xf32>
    %393 = tpu.matmul %392, %390, %cst_114 {dimension_numbers = #tpu.dot_dimension_numbers<[1], [0], [0], [1], [0, 0, 1, 1], [], []>} : vector<32x32xf32>, vector<32x32xf32>, vector<32x32xf32> -> vector<32x32xf32>
    %394 = vector.broadcast %391 : vector<1x32xf32> to vector<32x32xf32>
    %395 = arith.addf %393, %394 : vector<32x32xf32>
    %396 = vector.shape_cast %395 : vector<32x32xf32> to vector<4x8x32xf32>
    "tpu.trace_start"() <{level = 10 : i32, message = "byd,bxd->byx"}> : () -> ()
    %cst_115 = arith.constant dense<0.000000e+00> : vector<4x8x8xf32>
    %397 = tpu.matmul %396, %396, %cst_115 {dimension_numbers = #tpu.dot_dimension_numbers<[2], [2], [1], [1], [0, 0, 0, 1, 1, 1], [0], [0]>} : vector<4x8x32xf32>, vector<4x8x32xf32>, vector<4x8x8xf32> -> vector<4x8x8xf32>
    "tpu.trace_stop"() : () -> ()
    %cst_116 = arith.constant 5.65685415 : f32
    %398 = vector.broadcast %cst_116 : f32 to vector<4x8x8xf32>
    %399 = arith.divf %397, %398 : vector<4x8x8xf32>
    %cst_117 = arith.constant dense<0xFF800000> : vector<4x8xf32>
    %400 = vector.multi_reduction <maximumf>, %399, %cst_117 [2] : vector<4x8x8xf32> to vector<4x8xf32>
    %401 = vector.shape_cast %400 : vector<4x8xf32> to vector<4x8x1xf32>
    %402 = vector.broadcast %401 : vector<4x8x1xf32> to vector<4x8x8xf32>
    %403 = arith.subf %399, %402 : vector<4x8x8xf32>
    %404 = math.exp %403 : vector<4x8x8xf32>
    %cst_118 = arith.constant dense<0.000000e+00> : vector<4x8xf32>
    %405 = vector.multi_reduction <add>, %404, %cst_118 [2] : vector<4x8x8xf32> to vector<4x8xf32>
    %406 = vector.shape_cast %405 : vector<4x8xf32> to vector<4x8x1xf32>
    %407 = vector.broadcast %406 : vector<4x8x1xf32> to vector<4x8x8xf32>
    %408 = arith.divf %404, %407 : vector<4x8x8xf32>
    "tpu.trace_start"() <{level = 10 : i32, message = "byx,bxd->byd"}> : () -> ()
    %cst_119 = arith.constant dense<0.000000e+00> : vector<4x8x32xf32>
    %409 = tpu.matmul %408, %396, %cst_119 {dimension_numbers = #tpu.dot_dimension_numbers<[2], [1], [1], [2], [0, 0, 0, 1, 1, 2], [0], [0]>} : vector<4x8x8xf32>, vector<4x8x32xf32>, vector<4x8x32xf32> -> vector<4x8x32xf32>
    "tpu.trace_stop"() : () -> ()
    %410 = vector.extract_strided_slice %8 {offsets = [0, 96], sizes = [32, 32], strides = [1, 1]} : vector<32x128xf32> to vector<32x32xf32>
    %411 = vector.extract_strided_slice %9 {offsets = [0, 96], sizes = [1, 32], strides = [1, 1]} : vector<1x128xf32> to vector<1x32xf32>
    %412 = vector.shape_cast %409 : vector<4x8x32xf32> to vector<32x32xf32>
    %cst_120 = arith.constant dense<0.000000e+00> : vector<32x32xf32>
    %413 = tpu.matmul %412, %410, %cst_120 {dimension_numbers = #tpu.dot_dimension_numbers<[1], [0], [0], [1], [0, 0, 1, 1], [], []>} : vector<32x32xf32>, vector<32x32xf32>, vector<32x32xf32> -> vector<32x32xf32>
    %414 = vector.broadcast %411 : vector<1x32xf32> to vector<32x32xf32>
    %415 = arith.addf %413, %414 : vector<32x32xf32>
    %416 = vector.shape_cast %415 : vector<32x32xf32> to vector<4x8x32xf32>
    %417 = arith.mulf %347, %347 : vector<4x8x32xf32>
    %cst_121 = arith.constant dense<0.000000e+00> : vector<4x8xf32>
    %418 = vector.multi_reduction <add>, %417, %cst_121 [2] : vector<4x8x32xf32> to vector<4x8xf32>
    %419 = vector.shape_cast %418 : vector<4x8xf32> to vector<4x8x1xf32>
    %cst_122 = arith.constant 5.65685415 : f32
    %420 = vector.broadcast %cst_122 : f32 to vector<4x8x1xf32>
    %421 = arith.divf %419, %420 : vector<4x8x1xf32>
    "tpu.trace_start"() <{level = 10 : i32, message = "bzd,btd->bzt"}> : () -> ()
    %cst_123 = arith.constant dense<0.000000e+00> : vector<4x8x8xf32>
    %422 = tpu.matmul %347, %416, %cst_123 {dimension_numbers = #tpu.dot_dimension_numbers<[2], [2], [1], [1], [0, 0, 0, 1, 1, 1], [0], [0]>} : vector<4x8x32xf32>, vector<4x8x32xf32>, vector<4x8x8xf32> -> vector<4x8x8xf32>
    "tpu.trace_stop"() : () -> ()
    %cst_124 = arith.constant 5.65685415 : f32
    %423 = vector.broadcast %cst_124 : f32 to vector<4x8x8xf32>
    %424 = arith.divf %422, %423 : vector<4x8x8xf32>
    %cst_125 = arith.constant dense<0xFF800000> : vector<4x8xf32>
    %425 = vector.multi_reduction <maximumf>, %424, %cst_125 [2] : vector<4x8x8xf32> to vector<4x8xf32>
    %426 = vector.shape_cast %425 : vector<4x8xf32> to vector<4x8x1xf32>
    %427 = arith.maximumf %426, %421 : vector<4x8x1xf32>
    %428 = vector.broadcast %427 : vector<4x8x1xf32> to vector<4x8x8xf32>
    %429 = arith.subf %424, %428 : vector<4x8x8xf32>
    %430 = math.exp %429 : vector<4x8x8xf32>
    %431 = arith.subf %421, %427 : vector<4x8x1xf32>
    %432 = math.exp %431 : vector<4x8x1xf32>
    %cst_126 = arith.constant dense<0.000000e+00> : vector<4x8xf32>
    %433 = vector.multi_reduction <add>, %430, %cst_126 [2] : vector<4x8x8xf32> to vector<4x8xf32>
    %434 = vector.shape_cast %433 : vector<4x8xf32> to vector<4x8x1xf32>
    %435 = arith.addf %434, %432 : vector<4x8x1xf32>
    %cst_127 = arith.constant 1.000000e+00 : f32
    %436 = vector.broadcast %cst_127 : f32 to vector<4x8x1xf32>
    %437 = arith.divf %436, %435 : vector<4x8x1xf32>
    %438 = vector.broadcast %437 : vector<4x8x1xf32> to vector<4x8x8xf32>
    %439 = arith.mulf %430, %438 : vector<4x8x8xf32>
    "tpu.trace_start"() <{level = 10 : i32, message = "bzt,btd->bzd"}> : () -> ()
    %cst_128 = arith.constant dense<0.000000e+00> : vector<4x8x32xf32>
    %440 = tpu.matmul %439, %416, %cst_128 {dimension_numbers = #tpu.dot_dimension_numbers<[2], [1], [1], [2], [0, 0, 0, 1, 1, 2], [0], [0]>} : vector<4x8x8xf32>, vector<4x8x32xf32>, vector<4x8x32xf32> -> vector<4x8x32xf32>
    "tpu.trace_stop"() : () -> ()
    %441 = arith.mulf %432, %437 : vector<4x8x1xf32>
    %442 = vector.broadcast %441 : vector<4x8x1xf32> to vector<4x8x32xf32>
    %443 = arith.mulf %442, %347 : vector<4x8x32xf32>
    %cst_129 = arith.constant dense<0.000000e+00> : vector<4x32xf32>
    %444 = vector.multi_reduction <add>, %443, %cst_129 [1] : vector<4x8x32xf32> to vector<4x32xf32>
    %445 = vector.shape_cast %444 : vector<4x32xf32> to vector<4x1x32xf32>
    %446 = vector.broadcast %445 : vector<4x1x32xf32> to vector<4x8x32xf32>
    %447 = arith.addf %440, %446 : vector<4x8x32xf32>
    %448 = vector.shape_cast %447 : vector<4x8x32xf32> to vector<32x32xf32>
    %c96 = arith.constant 96 : index
    %c0_130 = arith.constant 0 : index
    %449 = vector.load %arg11[%c96, %c0_130] : memref<128x32xf32, #tpu.memory_space<vmem>>, vector<32x32xf32>
    %cst_131 = arith.constant dense<0.000000e+00> : vector<32x32xf32>
    %450 = tpu.matmul %448, %449, %cst_131 {dimension_numbers = #tpu.dot_dimension_numbers<[1], [0], [0], [1], [0, 0, 1, 1], [], []>} : vector<32x32xf32>, vector<32x32xf32>, vector<32x32xf32> -> vector<32x32xf32>
    %451 = arith.addf %343, %450 : vector<32x32xf32>
    %c0_132 = arith.constant 0 : index
    %c0_133 = arith.constant 0 : index
    %452 = vector.load %arg12[%c0_132, %c0_133] : memref<1x32xf32, #tpu.memory_space<vmem>>, vector<1x32xf32>
    %453 = vector.broadcast %452 : vector<1x32xf32> to vector<32x32xf32>
    %454 = arith.addf %451, %453 : vector<32x32xf32>
    %cst_134 = arith.constant 0.000000e+00 : f32
    %455 = vector.broadcast %cst_134 : f32 to vector<32x32xf32>
    %456 = arith.cmpf oge, %454, %455 : vector<32x32xf32>
    %cst_135 = arith.constant 2.000000e-01 : f32
    %457 = vector.broadcast %cst_135 : f32 to vector<32x32xf32>
    %458 = arith.mulf %457, %454 : vector<32x32xf32>
    %459 = arith.select %456, %454, %458 : vector<32x32xi1>, vector<32x32xf32>
    %c0_136 = arith.constant 0 : index
    %c0_137 = arith.constant 0 : index
    %460 = vector.load %arg13[%c0_136, %c0_137] : memref<32x32xf32, #tpu.memory_space<vmem>>, vector<32x32xf32>
    tpu.vector_store %arg13[%c0_136, %c0_137], %459 {strides = array<i32>} : memref<32x32xf32, #tpu.memory_space<vmem>>, vector<32x32xf32>,
    return
  }
  func.func @transform_0(%arg0: i32) -> (i32, i32) {
    %c0_i32 = arith.constant 0 : i32
    %c0_i32_0 = arith.constant 0 : i32
    return %arg0, %c0_i32 : i32, i32
  }
  func.func @transform_1(%arg0: i32) -> (i32, i32) {
    %c0_i32 = arith.constant 0 : i32
    %c0_i32_0 = arith.constant 0 : i32
    %c0_i32_1 = arith.constant 0 : i32
    return %c0_i32, %c0_i32_0 : i32, i32
  }
  func.func @transform_2(%arg0: i32) -> (i32, i32) {
    %c0_i32 = arith.constant 0 : i32
    %c0_i32_0 = arith.constant 0 : i32
    return %arg0, %c0_i32 : i32, i32
  }
  func.func @transform_3(%arg0: i32) -> (i32, i32, i32) {
    %c0_i32 = arith.constant 0 : i32
    %c0_i32_0 = arith.constant 0 : i32
    %c0_i32_1 = arith.constant 0 : i32
    return %arg0, %c0_i32, %c0_i32_0 : i32, i32, i32
  }
  func.func @transform_4(%arg0: i32) -> (i32, i32) {
    %c0_i32 = arith.constant 0 : i32
    %c0_i32_0 = arith.constant 0 : i32
    %c0_i32_1 = arith.constant 0 : i32
    return %c0_i32, %c0_i32_0 : i32, i32
  }
  func.func @transform_5(%arg0: i32) -> (i32, i32) {
    %c0_i32 = arith.constant 0 : i32
    %c0_i32_0 = arith.constant 0 : i32
    %c0_i32_1 = arith.constant 0 : i32
    return %c0_i32, %c0_i32_0 : i32, i32
  }
  func.func @transform_6(%arg0: i32) -> (i32, i32) {
    %c0_i32 = arith.constant 0 : i32
    %c0_i32_0 = arith.constant 0 : i32
    %c0_i32_1 = arith.constant 0 : i32
    return %c0_i32, %c0_i32_0 : i32, i32
  }
  func.func @transform_7(%arg0: i32) -> (i32, i32) {
    %c0_i32 = arith.constant 0 : i32
    %c0_i32_0 = arith.constant 0 : i32
    %c0_i32_1 = arith.constant 0 : i32
    return %c0_i32, %c0_i32_0 : i32, i32
  }
  func.func @transform_8(%arg0: i32) -> (i32, i32) {
    %c0_i32 = arith.constant 0 : i32
    %c0_i32_0 = arith.constant 0 : i32
    %c0_i32_1 = arith.constant 0 : i32
    return %c0_i32, %c0_i32_0 : i32, i32
  }
  func.func @transform_9(%arg0: i32) -> (i32, i32) {
    %c0_i32 = arith.constant 0 : i32
    %c0_i32_0 = arith.constant 0 : i32
    %c0_i32_1 = arith.constant 0 : i32
    return %c0_i32, %c0_i32_0 : i32, i32
  }
  func.func @transform_10(%arg0: i32) -> (i32, i32) {
    %c0_i32 = arith.constant 0 : i32
    %c0_i32_0 = arith.constant 0 : i32
    %c0_i32_1 = arith.constant 0 : i32
    return %c0_i32, %c0_i32_0 : i32, i32
  }
  func.func @transform_11(%arg0: i32) -> (i32, i32) {
    %c0_i32 = arith.constant 0 : i32
    %c0_i32_0 = arith.constant 0 : i32
    %c0_i32_1 = arith.constant 0 : i32
    return %c0_i32, %c0_i32_0 : i32, i32
  }
  func.func @transform_12(%arg0: i32) -> (i32, i32) {
    %c0_i32 = arith.constant 0 : i32
    %c0_i32_0 = arith.constant 0 : i32
    return %arg0, %c0_i32 : i32, i32
  }
}

</mosaic_0001>

<bundles_post_ra>
// kernel: multi_branch_sym_bigcn.1
= control target key start
LH: loop header
LB: loop body
LE: loop exit
PB: predicated region body
PF: predicated region fallthrough
CT: control target
= control target key end

     0   :  { %vm77_vm0 = vcmask 261120   ;;  %s13156_s0 = inlined_call_operand.vmem [shape: f32[32,32], index: 0, kind: input, shape index: {}]   ;;  %s13157_s1 = inlined_call_operand.vmem [shape: f32[16,32], index: 1, kind: input, shape index: {}]   ;;  %s13158_s2 = inlined_call_operand.vmem [shape: f32[32,32], index: 2, kind: input, shape index: {}]   ;;  %s13159_s3 = inlined_call_operand.vmem [shape: f32[4,1,8], index: 3, kind: input, shape index: {}]   ;;  %s13160_s4 = inlined_call_operand.vmem [shape: f32[32,128], index: 4, kind: input, shape index: {}]   ;;  %s13161_s5 = inlined_call_operand.vmem [shape: f32[1,128], index: 5, kind: input, shape index: {}]   ;;  %s13162_s6 = inlined_call_operand.vmem [shape: f32[32,128], index: 6, kind: input, shape index: {}]   ;;  %s13163_s7 = inlined_call_operand.vmem [shape: f32[1,128], index: 7, kind: input, shape index: {}]   ;;  %s13164_s8 = inlined_call_operand.vmem [shape: f32[32,128], index: 8, kind: input, shape index: {}]   ;;  %s13165_s9 = inlined_call_operand.vmem [shape: f32[1,128], index: 9, kind: input, shape index: {}]   ;;  %s13166_s10 = inlined_call_operand.vmem [shape: f32[128,32], index: 10, kind: input, shape index: {}]   ;;  %s13167_s11 = inlined_call_operand.vmem [shape: f32[1,32], index: 11, kind: input, shape index: {}]   ;;  %s13168_s12 = inlined_call_operand.hbm [shape: f32[32,32], index: 12, kind: output, shape index: {}]  }
   0x1   :  { %v59_v0 = vld [vmem:[%s13160_s4 + $0x18] sm:$0xff]  ;;  %v58_v1 = vld [vmem:[%s13160_s4 + $0x10] sm:$0xff]  ;;  %v42_v2 = vld [vmem:[%s13156_s0] sm:$0xff] }
   0x2   :  { %10656 = vmatprep.subr.mxu1 %v59_v0  ;;  %v57_v3 = vld [vmem:[%s13160_s4 + $0x8] sm:$0xff]  ;;  %10664 = vmatprep.mubr.msk.f32.mxu1 %vm77_vm0, %v42_v2  ;;  %v11757_v4 = vld [vmem:[%s13164_s8 + $0x18] sm:$0xff]  ;;  %v11762_v5 = vld [vmem:[%s13164_s8 + $0x10] sm:$0xff] }
   0x3   :  { %10657 = vmatpush3.msra.mxu1 %v59_v0  ;;  %v56_v6 = vld [vmem:[%s13160_s4] sm:$0xff]  ;;  %10681 = vmatprep.subr.mxu0 %v11757_v4 }
   0x4   :  { %10658 = vmatprep.subr.mxu1 %v58_v1 }
   0x5   :  { %10659 = vmatpush3.msra.mxu1 %v58_v1 }
   0x6   :  { %17 = vsyncpa [#allocation3], 0  ;;  %10660 = vmatprep.subr.mxu1 %v57_v3  ;;  %10682 = vmatpush3.msra.mxu0 %v11757_v4  ;;  %v43_v7 = vld [vmem:[%s13156_s0 + $0x8] sm:$0xff]  ;;  %v44_v8 = vld [vmem:[%s13156_s0 + $0x10] sm:$0xff]  ;;  %v11668_v16 = vmov 0.0   ;;  %vm11669_vm1 = vmmov 0  }
   0x7   :  { %10661 = vmatpush3.msra.mxu1 %v57_v3  ;;  %10683 = vmatprep.subr.mxu0 %v11762_v5  ;;  %v45_v9 = vld [vmem:[%s13156_s0 + $0x18] sm:$0xff]  ;;  %v50_v10 = vld [vmem:[%s13157_s1] sm:$0xff]  ;;  %v51_v11 = vld [vmem:[%s13157_s1 + $0x8] sm:$0xff]  ;;  %vm692_vm2 = vcmask 64512   ;;  %s11670_s17 = smov 96   ;;  %vm3041_vm3 = vcmask 523520  }
   0x8   :  { %10662 = vmatprep.subr.mxu1 %v56_v6  ;;  %10684 = vmatpush3.msra.mxu0 %v11762_v5  ;;  %v11794_v12 = vld [vmem:[%s13164_s8 + $0x8] sm:$0xff]  ;;  %v11801_v13 = vld [vmem:[%s13164_s8] sm:$0xff]  ;;  %v48_v17 = vld [vmem:[%s13158_s2 + $0x10] sm:$0xff]  ;;  %s11671_s23 = smov 64   ;;  %vm5594_vm4 = vcmask 785920   ;;  %s11672_s18 = smov 32  }
   0x9   :  { %10663 = vmatpush3.msra.mxu1 %v56_v6  ;;  %10685 = vmatprep.subr.mxu0 %v11794_v12  ;;  %v46_v14 = vld [vmem:[%s13158_s2] sm:$0xff]  ;;  %v47_v15 = vld [vmem:[%s13158_s2 + $0x8] sm:$0xff]  ;;  %v49_v18 = vld [vmem:[%s13158_s2 + $0x18] sm:$0xff]  ;;  %vm8039_vm5 = vcmask 1048320  }
   0xa   :  { %10665 = vmatmul.mubr.msk.f32.vlgmr.msra.gmra.mxu1 %vm77_vm0, %v43_v7  ;;  %10670 = vmatprep.subr.mxu1 %v59_v0  ;;  %v10136_v20 = vld [vmem:[%s13161_s5] ss:$0 sm:$0xff]  ;;  %v10159_v45 = vld [vmem:[%s13159_s3 + $0x3] ss:$0 sm:$0xff]  ;;  %v10157_v48 = vld [vmem:[%s13159_s3 + $0x1] ss:$0 sm:$0xff] }
   0xb   :  { %10671 = vmatpush3.msra.mxu1 %v59_v0  ;;  %10667 = vmatprep.mubr.msk.f32.mxu1 %vm77_vm0, %v44_v8  ;;  %v10156_v40 = vld [vmem:[%s13159_s3] ss:$0 sm:$0xff]  ;;  %v10158_v55 = vld [vmem:[%s13159_s3 + $0x2] ss:$0 sm:$0xff] }
   0xc   :  { %10672 = vmatprep.subr.mxu1 %v58_v1  ;;  %10686 = vmatpush3.msra.mxu0 %v11794_v12 }
   0xd   :  { %10673 = vmatpush3.msra.mxu1 %v58_v1  ;;  %10687 = vmatprep.subr.mxu0 %v11801_v13 }
   0xe   :  { %10668 = vmatmul.mubr.msk.f32.gmra.mxu1 %vm77_vm0, %v45_v9  ;;  %10674 = vmatprep.subr.mxu1 %v57_v3 }
   0xf   :  { %10675 = vmatpush3.msra.mxu1 %v57_v3  ;;  %10678 = vmatprep.mubr.msk.f32.mxu1 %vm77_vm0, %v50_v10 }
  0x10   :  { %10676 = vmatprep.subr.mxu1 %v56_v6  ;;  %10688 = vmatpush3.msra.mxu0 %v11801_v13 }
  0x11   :  { %10677 = vmatpush3.msra.mxu1 %v56_v6  ;;  %10689 = vmatprep.mubr.msk.f32.mxu0 %vm77_vm0, %v46_v14 }
  0x12   :  { %10679 = vmatmul.mubr.msk.f32.vlgmr.msra.gmra.mxu1 %vm77_vm0, %v51_v11  ;;  %10695 = vmatprep.subr.mxu1 %v11668_v16 }
  0x13   :  { %10690 = vmatmul.mubr.msk.f32.vlgmr.msra.gmra.mxu0 %vm77_vm0, %v47_v15  ;;  %10710 = vmatprep.subr.mxu0 %v11668_v16 }
  0x14   :  { %10692 = vmatprep.mubr.msk.f32.mxu0 %vm77_vm0, %v48_v17  ;;  %10697 = vmatprep.mubr.msk.f32.mxu1 %vm11669_vm1, %v11668_v16 }
  0x17   :  { %10693 = vmatmul.mubr.msk.f32.gmra.mxu0 %vm77_vm0, %v49_v18 }
  0x18   :  { %10712 = vmatprep.mubr.msk.f32.mxu0 %vm11669_vm1, %v11668_v16 }
  0xca   :  { %v10666_v19 = vpop.f32.mrf.mxu1 }
  0xcb   :  { %v11844_v30 = vadd.f32 %v10666_v19, %v10136_v20 }
  0xcc   :  { %v156_v21 = vpop.f32.mrf.mxu1 }
  0xcd   :  { %v11830_v22 = vadd.f32 %v10136_v20, %v156_v21 }
  0xce   :  { %v10669_v23 = vpop.f32.mrf.mxu1 }
  0xcf   :  { %v11832_v24 = vadd.f32 %v10669_v23, %v10136_v20  ;;  %10696 = vmatpush3.xpose.msk.msra.mxu1 %vm77_vm0, %v11830_v22 }
  0xd0   :  { %v166_v25 = vpop.f32.mrf.mxu1  ;;  %10700 = vmatprep.subr.mxu1 %v11668_v16 }
  0xd1   :  { %10711 = vmatpush3.xpose.msk.msra.mxu0 %vm77_vm0, %v11832_v24  ;;  %v11862_v33 = vadd.f32 %v10136_v20, %v166_v25 }
  0xd2   :  { %v10680_v26 = vpop.f32.mrf.mxu1  ;;  %10720 = vmatprep.subr.mxu0 %v11668_v16 }
  0xd3   :  { %v11840_v27 = vadd.f32 %v10680_v26, %v10136_v20  ;;  %v11880_v34 = vpop.f32.mrf.mxu0 }
  0xd4   :  { %v247_v28 = vpop.f32.mrf.mxu1 }
  0xd5   :  { %v11842_v29 = vadd.f32 %v10136_v20, %v247_v28  ;;  %v11882_v35 = vpop.f32.mrf.mxu0 }
  0xd7   :  { %10698 = vmatmul.mubr.msk.f32.vlgmr.msra.gmra.mxu1 %vm77_vm0, %v11842_v29  ;;  %10713 = vmatmul.mubr.msk.f32.vlgmr.msra.gmra.mxu0 %vm77_vm0, %v11842_v29  ;;  %v11852_v31 = vmul.f32 %v11842_v29, %v11842_v29  ;;  %v11884_v36 = vpop.f32.mrf.mxu0 }
  0xd8   :  { %10701 = vmatpush3.xpose.msk.msra.mxu1 %vm77_vm0, %v11844_v30  ;;  %10721 = vmatpush3.msra.mxu0 %v11844_v30 }
  0xd9   :  { %v688_v32 = vsel %vm77_vm0, %v11852_v31, 0.0  ;;  %10702 = vmatprep.mubr.msk.f32.mxu1 %vm11669_vm1, %v11668_v16  ;;  %10705 = vmatprep.subr.mxu1 %v11668_v16  ;;  %v11886_v37 = vpop.f32.mrf.mxu0 }
  0xda   :  { %689 = vadd.xlane.f32.xlu0 %v688_v32  ;;  %10722 = vmatprep.mubr.msk.f32.mxu0 %vm11669_vm1, %v11668_v16 }
  0xdb   :  { %10703 = vmatmul.mubr.msk.f32.vlgmr.msra.gmra.mxu1 %vm77_vm0, %v11842_v29  ;;  %10730 = vmatprep.subr.mxu0 %v11668_v16 }
  0xdc   :  { %10706 = vmatpush3.xpose.msk.msra.mxu1 %vm77_vm0, %v11862_v33  ;;  %10707 = vmatprep.mubr.msk.f32.mxu1 %vm11669_vm1, %v11668_v16 }
  0xdd   :  { %10715 = vmatprep.subr.mxu1 %v11668_v16 }
  0xdf   :  { %10708 = vmatmul.mubr.msk.f32.vlgmr.msra.gmra.mxu1 %vm77_vm0, %v11842_v29 }
  0xe0   :  { %10716 = vmatpush3.msra.mxu1 %v11830_v22  ;;  %10717 = vmatprep.mubr.msk.f32.mxu1 %vm11669_vm1, %v11668_v16 }
  0xe1   :  { %10725 = vmatprep.subr.mxu1 %v11668_v16 }
 0x163   :  { %v690_v62 = vpop.xlane.xlu0 %689 }
 0x164   :  { %v691_v63 = vmul.f32 0.17677669, %v690_v62 }
 0x197   :  { %v431_v38 = vpop.f32.mrf.mxu1  ;;  %v650_v39 = vpop.f32.mrf.mxu0 }
 0x198   :  { %v655_v41 = vmul.f32 0.17677669, %v431_v38  ;;  %v658_v42 = vmul.f32 0.17677669, %v650_v39 }
 0x199   :  { %v10699_v43 = vpop.f32.mrf.mxu1  ;;  %v10714_v44 = vpop.f32.mrf.mxu0 }
 0x19a   :  { %v683_v46 = vadd.f32 %v10156_v40, %v655_v41  ;;  %v686_v51 = vadd.f32 %v10159_v45, %v658_v42 }
 0x19b   :  { %v504_v47 = vpop.f32.mrf.mxu1 }
 0x19c   :  { %v656_v49 = vmul.f32 0.17677669, %v504_v47  ;;  %v693_v50 = vsel %vm692_vm2, %v683_v46, -inf  ;;  %v702_v57 = vsel %vm692_vm2, %v686_v51, -inf }
 0x19d   :  { %694 = vmax.xlane.f32.xlu0 %v693_v50  ;;  %v10704_v52 = vpop.f32.mrf.mxu1 }
 0x19e   :  { %v684_v53 = vadd.f32 %v10157_v48, %v656_v49 }
 0x19f   :  { %v577_v54 = vpop.f32.mrf.mxu1 }
 0x1a0   :  { %v657_v56 = vmul.f32 0.17677669, %v577_v54  ;;  %v696_v58 = vsel %vm692_vm2, %v684_v53, -inf }
 0x1a1   :  { %703 = vmax.xlane.f32.xlu0 %v702_v57  ;;  %697 = vmax.xlane.f32.xlu1 %v696_v58  ;;  %v10709_v59 = vpop.f32.mrf.mxu1 }
 0x1a2   :  { %v685_v60 = vadd.f32 %v10158_v55, %v657_v56 }
 0x1a4   :  { %v699_v61 = vsel %vm692_vm2, %v685_v60, -inf }
 0x1a5   :  { %700 = vmax.xlane.f32.xlu1 %v699_v61 }
 0x226   :  { %v695_v0 = vpop.xlane.xlu0 %694 }
 0x227   :  { %v705_v1 = vmax.f32 %v695_v0, %v691_v63 }
 0x229   :  { %v709_v2 = vsub.f32 %v683_v46, %v705_v1  ;;  %v721_v3 = vsub.f32 %v691_v63, %v705_v1 }
 0x22a   :  { %v704_v6 = vpop.xlane.xlu0 %703  ;;  %v698_v7 = vpop.xlane.xlu1 %697 }
 0x22b   :  { %v713_v8 = vmul.f32 1.442695, %v709_v2  ;;  %v708_v9 = vmax.f32 %v704_v6, %v691_v63  ;;  %v706_v10 = vmax.f32 %v698_v7, %v691_v63  ;;  %v725_v44 = vmul.f32 1.442695, %v721_v3 }
 0x22d   :  { %11351 = vpow2.f32 %v713_v8  ;;  %v712_v11 = vsub.f32 %v686_v51, %v708_v9  ;;  %v724_v14 = vsub.f32 %v691_v63, %v708_v9  ;;  %v710_v15 = vsub.f32 %v684_v53, %v706_v10 }
 0x22e   :  { %v722_v17 = vsub.f32 %v691_v63, %v706_v10  ;;  %v701_v18 = vpop.xlane.xlu1 %700 }
 0x22f   :  { %v715_v19 = vmul.f32 1.442695, %v710_v15  ;;  %v707_v20 = vmax.f32 %v701_v18, %v691_v63  ;;  %v719_v21 = vmul.f32 1.442695, %v712_v11  ;;  %v731_v47 = vmul.f32 1.442695, %v724_v14 }
 0x230   :  { %v727_v45 = vmul.f32 1.442695, %v722_v17  ;;  %v11931_v11 = vld [vmem:[%s13162_s6 + $0x10] sm:$0xff]  ;;  %v11937_v14 = vld [vmem:[%s13162_s6 + $0x8] sm:$0xff]  ;;  %v61_v15 = vld [vmem:[%s13162_s6] sm:$0xff] }
 0x231   :  { %v711_v23 = vsub.f32 %v685_v60, %v707_v20  ;;  %v723_v25 = vsub.f32 %v691_v63, %v707_v20  ;;  %11353 = vpow2.f32 %v715_v19  ;;  %v11911_v63 = vld [vmem:[%s13162_s6 + $0x18] sm:$0xff] }
 0x232   :  { %11355 = vpow2.f32 %v719_v21 }
 0x233   :  { %v717_v26 = vmul.f32 1.442695, %v711_v23  ;;  %v729_v46 = vmul.f32 1.442695, %v723_v25 }
 0x235   :  { %11357 = vpow2.f32 %v717_v26 }
 0x236   :  { %11359 = vpow2.f32 %v725_v44 }
 0x237   :  { %11361 = vpow2.f32 %v727_v45 }
 0x238   :  { %11363 = vpow2.f32 %v729_v46 }
 0x239   :  { %11365 = vpow2.f32 %v731_v47 }
 0x23a   :  { %v11352_v28 = vpop.eup %11351 }
 0x23b   :  { %v733_v32 = vsel %vm692_vm2, %v11352_v28, 0.0 }
 0x23c   :  { %734 = vadd.xlane.f32.xlu1 %v733_v32 }
 0x23e   :  { %v11354_v38 = vpop.eup %11353 }
 0x23f   :  { %v11356_v39 = vpop.eup %11355  ;;  %v736_v40 = vsel %vm692_vm2, %v11354_v38, 0.0 }
 0x240   :  { %737 = vadd.xlane.f32.xlu0 %v736_v40  ;;  %v742_v43 = vsel %vm692_vm2, %v11356_v39, 0.0 }
 0x242   :  { %v11358_v41 = vpop.eup %11357 }
 0x243   :  { %v739_v42 = vsel %vm692_vm2, %v11358_v41, 0.0  ;;  %v11360_v48 = vpop.eup %11359 }
 0x244   :  { %740 = vadd.xlane.f32.xlu1 %v739_v42  ;;  %743 = vadd.xlane.f32.xlu0 %v742_v43  ;;  %v11362_v51 = vpop.eup %11361 }
 0x245   :  { %v11364_v54 = vpop.eup %11363 }
 0x246   :  { %v11366_v57 = vpop.eup %11365 }
 0x2c5   :  { %v735_v49 = vpop.xlane.xlu1 %734 }
 0x2c6   :  { %v745_v50 = vadd.f32 %v11360_v48, %v735_v49 }
 0x2c8   :  { %11367 = vrcp.f32 %v745_v50 }
 0x2c9   :  { %v738_v52 = vpop.xlane.xlu0 %737 }
 0x2ca   :  { %v746_v53 = vadd.f32 %v11362_v51, %v738_v52 }
 0x2cc   :  { %11369 = vrcp.f32 %v746_v53 }
 0x2cd   :  { %v741_v55 = vpop.xlane.xlu1 %740  ;;  %v744_v58 = vpop.xlane.xlu0 %743 }
 0x2ce   :  { %v747_v56 = vadd.f32 %v11364_v54, %v741_v55  ;;  %v748_v59 = vadd.f32 %v11366_v57, %v744_v58 }
 0x2d0   :  { %11371 = vrcp.f32 %v747_v56 }
 0x2d1   :  { %11373 = vrcp.f32 %v748_v59 }
 0x2d5   :  { %v11368_v60 = vpop.eup %11367 }
 0x2d6   :  { %v757_v61 = vmul.f32 %v11368_v60, %v11352_v28  ;;  %v761_v62 = vmul.f32 %v11368_v60, %v11360_v48 }
 0x2d8   :  { %10718 = vmatmul.mubr.msk.f32.vlgmr.msra.gmra.mxu1 %vm692_vm2, %v757_v61  ;;  %v765_v17 = vmul.f32 %v761_v62, %v11842_v29 }
 0x2d9   :  { %10726 = vmatpush3.msra.mxu1 %v11862_v33  ;;  %10727 = vmatprep.mubr.msk.f32.mxu1 %vm11669_vm1, %v11668_v16  ;;  %v11370_v0 = vpop.eup %11369 }
 0x2da   :  { %10735 = vmatprep.subr.mxu1 %v11911_v63  ;;  %v758_v1 = vmul.f32 %v11370_v0, %v11354_v38  ;;  %v762_v2 = vmul.f32 %v11370_v0, %v11362_v51  ;;  %v769_v18 = vsel %vm77_vm0, %v765_v17, 0.0  ;;  %v10164_v17 = vld [vmem:[%s13163_s7] ss:$0 sm:$0xff] }
 0x2db   :  { %v770_v20 = vrot.slane %v769_v18, 4 }
 0x2dc   :  { %10723 = vmatmul.mubr.msk.f32.vlgmr.msra.gmra.mxu0 %vm692_vm2, %v758_v1  ;;  %v766_v19 = vmul.f32 %v762_v2, %v11842_v29 }
 0x2dd   :  { %v11372_v3 = vpop.eup %11371  ;;  %10731 = vmatpush3.msra.mxu0 %v11832_v24  ;;  %10732 = vmatprep.mubr.msk.f32.mxu0 %vm11669_vm1, %v11668_v16  ;;  %v771_v26 = vadd.f32 %v770_v20, %v769_v18 }
 0x2de   :  { %v759_v6 = vmul.f32 %v11372_v3, %v11358_v41  ;;  %v763_v7 = vmul.f32 %v11372_v3, %v11364_v54  ;;  %v11374_v8 = vpop.eup %11373  ;;  %10749 = vmatprep.subr.mxu0 %v11668_v16  ;;  %v776_v23 = vsel %vm77_vm0, %v766_v19, 0.0 }
 0x2df   :  { %v760_v9 = vmul.f32 %v11374_v8, %v11356_v39  ;;  %v764_v10 = vmul.f32 %v11374_v8, %v11366_v57  ;;  %v777_v32 = vrot.slane %v776_v23, 4  ;;  %v772_v39 = vrot.slane %v771_v26, 2 }
 0x2e0   :  { %10728 = vmatmul.mubr.msk.f32.vlgmr.msra.gmra.mxu1 %vm692_vm2, %v759_v6  ;;  %v767_v21 = vmul.f32 %v763_v7, %v11842_v29 }
 0x2e1   :  { %10736 = vmatpush3.msra.mxu1 %v11911_v63  ;;  %10733 = vmatmul.mubr.msk.f32.vlgmr.msra.gmra.mxu0 %vm692_vm2, %v760_v9  ;;  %v768_v25 = vmul.f32 %v764_v10, %v11842_v29  ;;  %v778_v41 = vadd.f32 %v777_v32, %v776_v23  ;;  %v773_v43 = vadd.f32 %v772_v39, %v771_v26 }
 0x2e2   :  { %10751 = vmatprep.mubr.msk.f32.mxu0 %vm11669_vm1, %v11668_v16  ;;  %10737 = vmatprep.subr.mxu1 %v11931_v11  ;;  %v783_v28 = vsel %vm77_vm0, %v767_v21, 0.0 }
 0x2e3   :  { %10738 = vmatpush3.msra.mxu1 %v11931_v11  ;;  %v790_v38 = vsel %vm77_vm0, %v768_v25, 0.0  ;;  %v784_v40 = vrot.slane %v783_v28, 4  ;;  %v779_v45 = vrot.slane %v778_v41, 2  ;;  %v774_v47 = vrot.slane %v773_v43, 1 }
 0x2e4   :  { %10739 = vmatprep.subr.mxu1 %v11937_v14  ;;  %v791_v42 = vrot.slane %v790_v38, 4 }
 0x2e5   :  { %10740 = vmatpush3.msra.mxu1 %v11937_v14  ;;  %v785_v44 = vadd.f32 %v784_v40, %v783_v28  ;;  %v780_v49 = vadd.f32 %v779_v45, %v778_v41  ;;  %v775_v51 = vadd.f32 %v774_v47, %v773_v43 }
 0x2e6   :  { %10741 = vmatprep.subr.mxu1 %v61_v15  ;;  %v792_v46 = vadd.f32 %v791_v42, %v790_v38 }
 0x2e7   :  { %10742 = vmatpush3.msra.mxu1 %v61_v15  ;;  %v786_v48 = vrot.slane %v785_v44, 2  ;;  %v781_v55 = vrot.slane %v780_v49, 1 }
 0x2e8   :  { %10764 = vmatprep.subr.mxu1 %v11668_v16  ;;  %v793_v50 = vrot.slane %v792_v46, 2 }
 0x2e9   :  { %v787_v52 = vadd.f32 %v786_v48, %v785_v44  ;;  %v782_v59 = vadd.f32 %v781_v55, %v780_v49 }
 0x2ea   :  { %v794_v56 = vadd.f32 %v793_v50, %v792_v46 }
 0x2eb   :  { %v788_v58 = vrot.slane %v787_v52, 1 }
 0x2ec   :  { %v795_v60 = vrot.slane %v794_v56, 1 }
 0x2ed   :  { %v789_v0 = vadd.f32 %v788_v58, %v787_v52 }
 0x2ee   :  { %v796_v6 = vadd.f32 %v795_v60, %v794_v56 }
 0x398   :  { %v866_v53 = vpop.f32.mrf.mxu1 }
 0x399   :  { %v867_v54 = vadd.f32 %v866_v53, %v775_v51 }
 0x39a   :  { %v10719_v57 = vpop.f32.mrf.mxu1 }
 0x39b   :  { %10743 = vmatprep.mubr.msk.f32.mxu1 %vm77_vm0, %v867_v54 }
 0x39c   :  { %v939_v61 = vpop.f32.mrf.mxu0 }
 0x39d   :  { %v940_v62 = vadd.f32 %v939_v61, %v782_v59 }
 0x39e   :  { %v10724_v1 = vpop.f32.mrf.mxu0 }
 0x39f   :  { %10744 = vmatmul.mubr.msk.f32.vlgmr.msra.gmra.mxu1 %vm77_vm0, %v940_v62 }
 0x3a0   :  { %v1012_v2 = vpop.f32.mrf.mxu1 }
 0x3a1   :  { %v1013_v3 = vadd.f32 %v1012_v2, %v789_v0  ;;  %v1085_v7 = vpop.f32.mrf.mxu0 }
 0x3a2   :  { %v10729_v8 = vpop.f32.mrf.mxu1  ;;  %v1086_v9 = vadd.f32 %v1085_v7, %v796_v6 }
 0x3a3   :  { %10746 = vmatprep.mubr.msk.f32.mxu1 %vm77_vm0, %v1013_v3  ;;  %v10734_v10 = vpop.f32.mrf.mxu0  ;;  %v12001_v3 = vld [vmem:[%s13165_s9] ss:$0 sm:$0xff] }
 0x3a4   :  { %10747 = vmatmul.mubr.msk.f32.gmra.mxu1 %vm77_vm0, %v1086_v9  ;;  %v12005_v7 = vadd.f32 %v11880_v34, %v12001_v3  ;;  %v12010_v9 = vadd.f32 %v12001_v3, %v11882_v35  ;;  %v12023_v34 = vadd.f32 %v12001_v3, %v11886_v37 }
 0x3a5   :  { %10766 = vmatprep.mubr.msk.f32.mxu1 %vm11669_vm1, %v11668_v16 }
 0x45f   :  { %v10745_v15 = vpop.f32.mrf.mxu1 }
 0x460   :  { %v1179_v23 = vadd.f32 %v10745_v15, %v10164_v17 }
 0x461   :  { %v1173_v18 = vpop.f32.mrf.mxu1 }
 0x462   :  { %v1174_v19 = vadd.f32 %v10164_v17, %v1173_v18 }
 0x464   :  { %v10748_v20 = vpop.f32.mrf.mxu1  ;;  %10750 = vmatpush3.xpose.msk.msra.mxu0 %vm77_vm0, %v1174_v19 }
 0x465   :  { %v11963_v21 = vadd.f32 %v10748_v20, %v10164_v17  ;;  %10754 = vmatprep.subr.mxu0 %v11668_v16  ;;  %v12028_v20 = vmul.f32 %v12010_v9, %v12010_v9 }
 0x466   :  { %v1183_v25 = vpop.f32.mrf.mxu1 }
 0x467   :  { %10765 = vmatpush3.xpose.msk.msra.mxu1 %vm77_vm0, %v11963_v21  ;;  %10752 = vmatmul.mubr.msk.f32.vlgmr.msra.gmra.mxu0 %vm77_vm0, %v1174_v19  ;;  %v11977_v26 = vadd.f32 %v10164_v17, %v1183_v25  ;;  %v12014_v17 = vadd.f32 %v11884_v36, %v12001_v3  ;;  %v1925_v37 = vsel %vm77_vm0, %v12028_v20, 0.0  ;;  %v12040_v25 = vmul.f32 %v12023_v34, %v12023_v34 }
 0x468   :  { %10774 = vmatprep.subr.mxu1 %v11668_v16  ;;  %10755 = vmatpush3.xpose.msk.msra.mxu0 %vm77_vm0, %v1179_v23 }
 0x469   :  { %10756 = vmatprep.mubr.msk.f32.mxu0 %vm11669_vm1, %v11668_v16  ;;  %10759 = vmatprep.subr.mxu0 %v11668_v16 }
 0x46a   :  { %10767 = vmatmul.mubr.msk.f32.vlgmr.msra.gmra.mxu1 %vm77_vm0, %v11963_v21 }
 0x46b   :  { %10775 = vmatpush3.msra.mxu1 %v1179_v23  ;;  %10776 = vmatprep.mubr.msk.f32.mxu1 %vm11669_vm1, %v11668_v16 }
 0x46c   :  { %10757 = vmatmul.mubr.msk.f32.vlgmr.msra.gmra.mxu0 %vm77_vm0, %v1179_v23  ;;  %10784 = vmatprep.subr.mxu1 %v11668_v16  ;;  %v12034_v23 = vmul.f32 %v12014_v17, %v12014_v17 }
 0x46d   :  { %10760 = vmatpush3.xpose.msk.msra.mxu0 %vm77_vm0, %v11977_v26  ;;  %10761 = vmatprep.mubr.msk.f32.mxu0 %vm11669_vm1, %v11668_v16 }
 0x46e   :  { %10769 = vmatprep.subr.mxu0 %v11668_v16 }
 0x470   :  { %10762 = vmatmul.mubr.msk.f32.vlgmr.msra.gmra.mxu0 %vm77_vm0, %v11977_v26 }
 0x471   :  { %10770 = vmatpush3.msra.mxu0 %v1174_v19  ;;  %10771 = vmatprep.mubr.msk.f32.mxu0 %vm11669_vm1, %v11668_v16  ;;  %v12019_v19 = vmul.f32 %v12005_v7, %v12005_v7 }
 0x472   :  { %10779 = vmatprep.subr.mxu0 %v11668_v16 }
 0x473   :  { %v1928_v36 = vsel %vm77_vm0, %v12019_v19, 0.0 }
 0x527   :  { %v1261_v28 = vpop.f32.mrf.mxu0 }
 0x528   :  { %v1484_v32 = vmul.f32 0.17677669, %v1261_v28  ;;  %v1934_v28 = vsel %vm77_vm0, %v12034_v23, 0.0 }
 0x529   :  { %v10753_v38 = vpop.f32.mrf.mxu0 }
 0x52a   :  { %v1480_v39 = vpop.f32.mrf.mxu1  ;;  %v1488_v40 = vsel %vm692_vm2, %v1484_v32, -inf }
 0x52b   :  { %1489 = vmax.xlane.f32.xlu1 %v1488_v40  ;;  %v1487_v45 = vmul.f32 0.17677669, %v1480_v39 }
 0x52c   :  { %v1334_v41 = vpop.f32.mrf.mxu0  ;;  %v10768_v42 = vpop.f32.mrf.mxu1 }
 0x52d   :  { %v1485_v43 = vmul.f32 0.17677669, %v1334_v41  ;;  %v1497_v50 = vsel %vm692_vm2, %v1487_v45, -inf }
 0x52e   :  { %v10758_v44 = vpop.f32.mrf.mxu0 }
 0x52f   :  { %v1491_v46 = vsel %vm692_vm2, %v1485_v43, -inf }
 0x530   :  { %1492 = vmax.xlane.f32.xlu0 %v1491_v46  ;;  %v1407_v47 = vpop.f32.mrf.mxu0 }
 0x531   :  { %v1486_v48 = vmul.f32 0.17677669, %v1407_v47 }
 0x532   :  { %v10763_v49 = vpop.f32.mrf.mxu0 }
 0x533   :  { %v1494_v51 = vsel %vm692_vm2, %v1486_v48, -inf }
 0x534   :  { %1498 = vmax.xlane.f32.xlu0 %v1497_v50  ;;  %1495 = vmax.xlane.f32.xlu1 %v1494_v51 }
 0x5b4   :  { %v1490_v52 = vpop.xlane.xlu1 %1489 }
 0x5b5   :  { %v1500_v53 = vsub.f32 %v1484_v32, %v1490_v52  ;;  %v1931_v32 = vsel %vm77_vm0, %v12040_v25, 0.0 }
 0x5b7   :  { %v1504_v54 = vmul.f32 1.442695, %v1500_v53 }
 0x5b9   :  { %v1493_v55 = vpop.xlane.xlu0 %1492  ;;  %11375 = vpow2.f32 %v1504_v54 }
 0x5ba   :  { %v1501_v56 = vsub.f32 %v1485_v43, %v1493_v55 }
 0x5bc   :  { %v1506_v57 = vmul.f32 1.442695, %v1501_v56 }
 0x5bd   :  { %v1499_v58 = vpop.xlane.xlu0 %1498  ;;  %v1496_v59 = vpop.xlane.xlu1 %1495 }
 0x5be   :  { %11377 = vpow2.f32 %v1506_v57  ;;  %v1503_v60 = vsub.f32 %v1487_v45, %v1499_v58  ;;  %v1502_v61 = vsub.f32 %v1486_v48, %v1496_v59 }
 0x5c0   :  { %v1510_v62 = vmul.f32 1.442695, %v1503_v60  ;;  %v1508_v0 = vmul.f32 1.442695, %v1502_v61 }
 0x5c2   :  { %11379 = vpow2.f32 %v1510_v62 }
 0x5c3   :  { %11381 = vpow2.f32 %v1508_v0 }
 0x5c6   :  { %v11376_v1 = vpop.eup %11375 }
 0x5c7   :  { %v1512_v2 = vsel %vm692_vm2, %v11376_v1, 0.0 }
 0x5c8   :  { %1513 = vadd.xlane.f32.xlu1 %v1512_v2 }
 0x5cb   :  { %v11378_v6 = vpop.eup %11377 }
 0x5cc   :  { %v1515_v8 = vsel %vm692_vm2, %v11378_v6, 0.0 }
 0x5cd   :  { %1516 = vadd.xlane.f32.xlu0 %v1515_v8 }
 0x5cf   :  { %v11380_v10 = vpop.eup %11379 }
 0x5d0   :  { %v11382_v15 = vpop.eup %11381  ;;  %v1521_v18 = vsel %vm692_vm2, %v11380_v10, 0.0 }
 0x5d1   :  { %1522 = vadd.xlane.f32.xlu0 %v1521_v18  ;;  %v1518_v35 = vsel %vm692_vm2, %v11382_v15, 0.0 }
 0x5d2   :  { %1519 = vadd.xlane.f32.xlu1 %v1518_v35 }
 0x5d5   :  { %1929 = vadd.xlane.f32.xlu0 %v1928_v36 }
 0x5d6   :  { %1926 = vadd.xlane.f32.xlu1 %v1925_v37 }
 0x5d9   :  { %1935 = vadd.xlane.f32.xlu0 %v1934_v28 }
 0x5da   :  { %1932 = vadd.xlane.f32.xlu1 %v1931_v32 }
 0x651   :  { %v1514_v38 = vpop.xlane.xlu1 %1513 }
 0x652   :  { %11383 = vrcp.f32 %v1514_v38 }
 0x656   :  { %v1517_v39 = vpop.xlane.xlu0 %1516 }
 0x657   :  { %11385 = vrcp.f32 %v1517_v39 }
 0x65a   :  { %v1523_v40 = vpop.xlane.xlu0 %1522 }
 0x65b   :  { %11387 = vrcp.f32 %v1523_v40  ;;  %v1520_v41 = vpop.xlane.xlu1 %1519 }
 0x65c   :  { %11389 = vrcp.f32 %v1520_v41 }
 0x65e   :  { %v1930_v38 = vpop.xlane.xlu0 %1929 }
 0x65f   :  { %v11384_v42 = vpop.eup %11383  ;;  %v1927_v32 = vpop.xlane.xlu1 %1926 }
 0x660   :  { %v1525_v43 = vmul.f32 %v11384_v42, %v11376_v1  ;;  %v1937_v40 = vmul.f32 0.17677669, %v1927_v32 }
 0x662   :  { %10772 = vmatmul.mubr.msk.f32.vlgmr.msra.gmra.mxu0 %vm692_vm2, %v1525_v43  ;;  %v1936_v41 = vpop.xlane.xlu0 %1935 }
 0x663   :  { %10780 = vmatpush3.msra.mxu0 %v11977_v26  ;;  %10781 = vmatprep.mubr.msk.f32.mxu0 %vm11669_vm1, %v11668_v16  ;;  %v1933_v39 = vpop.xlane.xlu1 %1932 }
 0x664   :  { %v11386_v44 = vpop.eup %11385  ;;  %10789 = vmatprep.subr.mxu0 %v11757_v4 }
 0x665   :  { %v1527_v45 = vmul.f32 %v11386_v44, %v11378_v6  ;;  %v1938_v44 = vmul.f32 0.17677669, %v1930_v38 }
 0x667   :  { %10777 = vmatmul.mubr.msk.f32.vlgmr.msra.gmra.mxu1 %vm692_vm2, %v1527_v45 }
 0x668   :  { %v11388_v46 = vpop.eup %11387  ;;  %10785 = vmatpush3.msra.mxu1 %v11963_v21  ;;  %10786 = vmatprep.mubr.msk.f32.mxu1 %vm11669_vm1, %v11668_v16 }
 0x669   :  { %v11390_v47 = vpop.eup %11389  ;;  %v1531_v48 = vmul.f32 %v11388_v46, %v11380_v10  ;;  %10803 = vmatprep.subr.mxu1 %v11668_v16 }
 0x66a   :  { %v1529_v49 = vmul.f32 %v11390_v47, %v11382_v15 }
 0x66b   :  { %10787 = vmatmul.mubr.msk.f32.vlgmr.msra.gmra.mxu1 %vm692_vm2, %v1531_v48 }
 0x66c   :  { %10782 = vmatmul.mubr.msk.f32.vlgmr.msra.gmra.mxu0 %vm692_vm2, %v1529_v49  ;;  %10805 = vmatprep.mubr.msk.f32.mxu1 %vm11669_vm1, %v11668_v16 }
 0x66d   :  { %10790 = vmatpush3.msra.mxu0 %v11757_v4 }
 0x66e   :  { %10791 = vmatprep.subr.mxu0 %v11762_v5 }
 0x66f   :  { %10792 = vmatpush3.msra.mxu0 %v11762_v5 }
 0x670   :  { %10793 = vmatprep.subr.mxu0 %v11794_v12 }
 0x671   :  { %10794 = vmatpush3.msra.mxu0 %v11794_v12 }
 0x672   :  { %10795 = vmatprep.subr.mxu0 %v11801_v13 }
 0x673   :  { %10796 = vmatpush3.msra.mxu0 %v11801_v13 }
 0x674   :  { %10818 = vmatprep.subr.mxu0 %v11668_v16 }
 0x722   :  { %v1601_v21 = vpop.f32.mrf.mxu0 }
 0x723   :  { %10797 = vmatprep.mubr.msk.f32.mxu0 %vm77_vm0, %v1601_v21  ;;  %v1940_v21 = vmul.f32 0.17677669, %v1936_v41 }
 0x724   :  { %v10773_v26 = vpop.f32.mrf.mxu0 }
 0x725   :  { %v12114_v26 = vmul.f32 0.17677669, %v1933_v39 }
 0x727   :  { %v1674_v50 = vpop.f32.mrf.mxu1 }
 0x728   :  { %10798 = vmatmul.mubr.msk.f32.vlgmr.msra.gmra.mxu0 %vm77_vm0, %v1674_v50 }
 0x729   :  { %v10778_v4 = vpop.f32.mrf.mxu1 }
 0x72b   :  { %v1820_v51 = vpop.f32.mrf.mxu1 }
 0x72c   :  { %v1747_v5 = vpop.f32.mrf.mxu0 }
 0x72d   :  { %10800 = vmatprep.mubr.msk.f32.mxu0 %vm77_vm0, %v1747_v5  ;;  %v10788_v52 = vpop.f32.mrf.mxu1 }
 0x72e   :  { %v10783_v12 = vpop.f32.mrf.mxu0  ;;  %10801 = vmatmul.mubr.msk.f32.gmra.mxu0 %vm77_vm0, %v1820_v51 }
 0x72f   :  { %10820 = vmatprep.mubr.msk.f32.mxu0 %vm11669_vm1, %v11668_v16 }
 0x7e8   :  { %v10799_v13 = vpop.f32.mrf.mxu0 }
 0x7e9   :  { %v1908_v56 = vadd.f32 %v10799_v13, %v12001_v3 }
 0x7ea   :  { %v1902_v53 = vpop.f32.mrf.mxu0 }
 0x7eb   :  { %v1903_v54 = vadd.f32 %v12001_v3, %v1902_v53 }
 0x7ed   :  { %10804 = vmatpush3.xpose.msk.msra.mxu1 %vm77_vm0, %v1903_v54 }
 0x7ee   :  { %v10802_v55 = vpop.f32.mrf.mxu0  ;;  %10808 = vmatprep.subr.mxu1 %v11668_v16 }
 0x7ef   :  { %v12079_v57 = vadd.f32 %v10802_v55, %v12001_v3 }
 0x7f0   :  { %v1912_v58 = vpop.f32.mrf.mxu0  ;;  %10806 = vmatmul.mubr.msk.f32.vlgmr.msra.gmra.mxu1 %vm77_vm0, %v12010_v9 }
 0x7f1   :  { %10819 = vmatpush3.xpose.msk.msra.mxu0 %vm77_vm0, %v12079_v57  ;;  %10809 = vmatpush3.xpose.msk.msra.mxu1 %vm77_vm0, %v1908_v56  ;;  %v12090_v59 = vadd.f32 %v12001_v3, %v1912_v58 }
 0x7f2   :  { %10810 = vmatprep.mubr.msk.f32.mxu1 %vm11669_vm1, %v11668_v16  ;;  %10828 = vmatprep.subr.mxu0 %v11668_v16 }
 0x7f3   :  { %10813 = vmatprep.subr.mxu1 %v11668_v16 }
 0x7f4   :  { %10821 = vmatmul.mubr.msk.f32.vlgmr.msra.gmra.mxu0 %vm77_vm0, %v12014_v17  ;;  %10811 = vmatmul.mubr.msk.f32.vlgmr.msra.gmra.mxu1 %vm77_vm0, %v12005_v7 }
 0x7f5   :  { %10829 = vmatpush3.msra.mxu0 %v1908_v56  ;;  %10814 = vmatpush3.xpose.msk.msra.mxu1 %vm77_vm0, %v12090_v59 }
 0x7f6   :  { %10815 = vmatprep.mubr.msk.f32.mxu1 %vm11669_vm1, %v11668_v16  ;;  %10823 = vmatprep.subr.mxu1 %v11668_v16 }
 0x7f7   :  { %10830 = vmatprep.mubr.msk.f32.mxu0 %vm11669_vm1, %v11668_v16  ;;  %10838 = vmatprep.subr.mxu0 %v11668_v16 }
 0x7f8   :  { %10816 = vmatmul.mubr.msk.f32.vlgmr.msra.gmra.mxu1 %vm77_vm0, %v12023_v34 }
 0x7f9   :  { %10824 = vmatpush3.msra.mxu1 %v1903_v54  ;;  %10825 = vmatprep.mubr.msk.f32.mxu1 %vm11669_vm1, %v11668_v16 }
 0x7fa   :  { %10833 = vmatprep.subr.mxu1 %v11668_v16 }
 0x8b0   :  { %v2013_v60 = vpop.f32.mrf.mxu1 }
 0x8b1   :  { %v2245_v61 = vmul.f32 0.17677669, %v2013_v60 }
 0x8b2   :  { %v10807_v62 = vpop.f32.mrf.mxu1 }
 0x8b3   :  { %v2249_v0 = vsel %vm692_vm2, %v2245_v61, -inf }
 0x8b4   :  { %v2241_v1 = vpop.f32.mrf.mxu0  ;;  %2250 = vmax.xlane.f32.xlu1 %v2249_v0  ;;  %v2089_v2 = vpop.f32.mrf.mxu1 }
 0x8b5   :  { %v2246_v3 = vmul.f32 0.17677669, %v2089_v2  ;;  %v2248_v10 = vmul.f32 0.17677669, %v2241_v1 }
 0x8b6   :  { %v10822_v6 = vpop.f32.mrf.mxu0  ;;  %v10812_v8 = vpop.f32.mrf.mxu1 }
 0x8b7   :  { %v2252_v15 = vsel %vm692_vm2, %v2246_v3, -inf  ;;  %v2258_v37 = vsel %vm692_vm2, %v2248_v10, -inf }
 0x8b8   :  { %2253 = vmax.xlane.f32.xlu0 %v2252_v15  ;;  %v2165_v18 = vpop.f32.mrf.mxu1 }
 0x8b9   :  { %v2247_v35 = vmul.f32 0.17677669, %v2165_v18 }
 0x8ba   :  { %v10817_v36 = vpop.f32.mrf.mxu1 }
 0x8bb   :  { %v2255_v28 = vsel %vm692_vm2, %v2247_v35, -inf }
 0x8bc   :  { %2259 = vmax.xlane.f32.xlu0 %v2258_v37  ;;  %2256 = vmax.xlane.f32.xlu1 %v2255_v28 }
 0x93d   :  { %v2251_v42 = vpop.xlane.xlu1 %2250 }
 0x93e   :  { %v2261_v43 = vmax.f32 %v2251_v42, %v1937_v40 }
 0x940   :  { %v2265_v45 = vsub.f32 %v2245_v61, %v2261_v43  ;;  %v2277_v46 = vsub.f32 %v1937_v40, %v2261_v43 }
 0x941   :  { %v2254_v47 = vpop.xlane.xlu0 %2253 }
 0x942   :  { %v2269_v48 = vmul.f32 1.442695, %v2265_v45  ;;  %v2262_v49 = vmax.f32 %v2254_v47, %v1938_v44 }
 0x944   :  { %11391 = vpow2.f32 %v2269_v48  ;;  %v2266_v50 = vsub.f32 %v2246_v3, %v2262_v49  ;;  %v2278_v4 = vsub.f32 %v1938_v44, %v2262_v49 }
 0x945   :  { %v2260_v51 = vpop.xlane.xlu0 %2259  ;;  %v2257_v5 = vpop.xlane.xlu1 %2256 }
 0x946   :  { %v2271_v52 = vmul.f32 1.442695, %v2266_v50  ;;  %v2264_v12 = vmax.f32 %v2260_v51, %v1940_v21  ;;  %v12117_v13 = vmax.f32 %v2257_v5, %v12114_v26  ;;  %v2283_v15 = vmul.f32 1.442695, %v2278_v4 }
 0x948   :  { %11393 = vpow2.f32 %v2271_v52  ;;  %v2268_v53 = vsub.f32 %v2248_v10, %v2264_v12  ;;  %v2280_v54 = vsub.f32 %v1940_v21, %v2264_v12  ;;  %v2279_v55 = vsub.f32 %v12114_v26, %v12117_v13 }
 0x949   :  { %v2267_v2 = vsub.f32 %v2247_v35, %v12117_v13  ;;  %v2281_v10 = vmul.f32 1.442695, %v2277_v46 }
 0x94a   :  { %v2275_v56 = vmul.f32 1.442695, %v2268_v53 }
 0x94b   :  { %v2273_v3 = vmul.f32 1.442695, %v2267_v2 }
 0x94c   :  { %11395 = vpow2.f32 %v2275_v56 }
 0x94d   :  { %11397 = vpow2.f32 %v2273_v3 }
 0x94e   :  { %11399 = vpow2.f32 %v2281_v10 }
 0x94f   :  { %11401 = vpow2.f32 %v2283_v15 }
 0x951   :  { %v11392_v58 = vpop.eup %11391 }
 0x952   :  { %v2289_v60 = vsel %vm692_vm2, %v11392_v58, 0.0 }
 0x953   :  { %2290 = vadd.xlane.f32.xlu1 %v2289_v60 }
 0x955   :  { %v11394_v61 = vpop.eup %11393 }
 0x956   :  { %v2292_v62 = vsel %vm692_vm2, %v11394_v61, 0.0 }
 0x957   :  { %2293 = vadd.xlane.f32.xlu0 %v2292_v62 }
 0x959   :  { %v11396_v0 = vpop.eup %11395 }
 0x95a   :  { %v2298_v1 = vsel %vm692_vm2, %v11396_v0, 0.0  ;;  %v12131_v6 = vpop.eup %11397 }
 0x95b   :  { %2299 = vadd.xlane.f32.xlu0 %v2298_v1  ;;  %v2295_v8 = vsel %vm692_vm2, %v12131_v6, 0.0  ;;  %v11400_v18 = vpop.eup %11399 }
 0x95c   :  { %v11402_v37 = vpop.eup %11401 }
 0x964   :  { %2651 = vrot.lane.b32.xlu1 %v11830_v22, %s11670_s17 }
 0x971   :  { %2727 = vrot.lane.b32.xlu0 %v11844_v30, %s11670_s17 }
 0x975   :  { %2958 = vrot.lane.b32.xlu0 %v11852_v31, %s11670_s17  ;;  %v2287_v31 = vmul.f32 1.442695, %v2280_v54 }
 0x977   :  { %11403 = vpow2.f32 %v2287_v31 }
 0x984   :  { %v11404_v38 = vpop.eup %11403 }
 0x988   :  { %2296 = vadd.xlane.f32.xlu1 %v2295_v8 }
 0x999   :  { %2649 = vrot.lane.b32.xlu1 %v11842_v29, %s11670_s17 }
 0x99d   :  { %2801 = vrot.lane.b32.xlu1 %v11862_v33, %s11670_s17 }
 0x9a1   :  { %2875 = vrot.lane.b32.xlu1 %v11832_v24, %s11670_s17 }
 0x9dc   :  { %v2291_v35 = vpop.xlane.xlu1 %2290 }
 0x9dd   :  { %v2301_v36 = vadd.f32 %v11400_v18, %v2291_v35 }
 0x9df   :  { %11405 = vrcp.f32 %v2301_v36 }
 0x9e0   :  { %v2294_v28 = vpop.xlane.xlu0 %2293 }
 0x9e1   :  { %v2302_v32 = vadd.f32 %v11402_v37, %v2294_v28 }
 0x9e3   :  { %11407 = vrcp.f32 %v2302_v32 }
 0x9e4   :  { %v2300_v39 = vpop.xlane.xlu0 %2299 }
 0x9e5   :  { %v2304_v40 = vadd.f32 %v11404_v38, %v2300_v39 }
 0x9e7   :  { %11409 = vrcp.f32 %v2304_v40 }
 0x9e8   :  { %v2728_v41 = vpop.permute.xlu0 %2727 }
 0x9ec   :  { %v11406_v42 = vpop.eup %11405  ;;  %v2959_v43 = vpop.permute.xlu0 %2958 }
 0x9ed   :  { %v2961_v44 = vsel %vm77_vm0, %v2959_v43, 0.0  ;;  %v2313_v45 = vmul.f32 %v11406_v42, %v11392_v58  ;;  %v2317_v46 = vmul.f32 %v11406_v42, %v11400_v18 }
 0x9ee   :  { %2962 = vadd.xlane.f32.xlu1 %v2961_v44 }
 0x9ef   :  { %10826 = vmatmul.mubr.msk.f32.vlgmr.msra.gmra.mxu1 %vm692_vm2, %v2313_v45  ;;  %v2321_v56 = vmul.f32 %v2317_v46, %v12010_v9 }
 0x9f0   :  { %v11408_v47 = vpop.eup %11407  ;;  %10834 = vmatpush3.msra.mxu1 %v12090_v59  ;;  %10835 = vmatprep.mubr.msk.f32.mxu1 %vm11669_vm1, %v11668_v16  ;;  %v2652_v59 = vpop.permute.xlu1 %2651 }
 0x9f1   :  { %v2314_v48 = vmul.f32 %v11408_v47, %v11394_v61  ;;  %10843 = vmatprep.subr.mxu1 %v11668_v16  ;;  %v2318_v49 = vmul.f32 %v11408_v47, %v11402_v37  ;;  %v2325_v58 = vsel %vm77_vm0, %v2321_v56, 0.0 }
 0x9f2   :  { %v2326_v61 = vrot.slane %v2325_v58, 4 }
 0x9f3   :  { %10831 = vmatmul.mubr.msk.f32.vlgmr.msra.gmra.mxu0 %vm692_vm2, %v2314_v48  ;;  %v2322_v60 = vmul.f32 %v2318_v49, %v12005_v7 }
 0x9f4   :  { %v11410_v21 = vpop.eup %11409  ;;  %10839 = vmatpush3.msra.mxu0 %v12079_v57  ;;  %10840 = vmatprep.mubr.msk.f32.mxu0 %vm11669_vm1, %v11668_v16  ;;  %v2285_v57 = vmul.f32 1.442695, %v2279_v55  ;;  %v2327_v1 = vadd.f32 %v2326_v61, %v2325_v58 }
 0x9f5   :  { %10848 = vmatprep.subr.mxu0 %v11668_v16  ;;  %v2316_v50 = vmul.f32 %v11410_v21, %v11396_v0  ;;  %v2320_v4 = vmul.f32 %v11410_v21, %v11404_v38  ;;  %v2332_v62 = vsel %vm77_vm0, %v2322_v60, 0.0 }
 0x9f6   :  { %11411 = vpow2.f32 %v2285_v57  ;;  %v2333_v2 = vrot.slane %v2332_v62, 4 }
 0x9f7   :  { %10841 = vmatmul.mubr.msk.f32.vlgmr.msra.gmra.mxu0 %vm692_vm2, %v2316_v50  ;;  %v2324_v0 = vmul.f32 %v2320_v4, %v12014_v17 }
 0x9f8   :  { %10849 = vmatpush3.xpose.msk.msra.mxu0 %vm77_vm0, %v2728_v41  ;;  %10850 = vmatprep.mubr.msk.f32.mxu0 %vm11669_vm1, %v11668_v16  ;;  %v2334_v8 = vadd.f32 %v2333_v2, %v2332_v62  ;;  %v11607_v62 = vld [vmem:[%s13159_s3 + $0x3] ss:$0 sm:$0xff] }
 0x9f9   :  { %10858 = vmatprep.subr.mxu0 %v11668_v16  ;;  %v2346_v3 = vsel %vm77_vm0, %v2324_v0, 0.0 }
 0x9fa   :  { %v2347_v10 = vrot.slane %v2346_v3, 4  ;;  %v2335_v31 = vrot.slane %v2334_v8, 2 }
 0x9fc   :  { %v2348_v18 = vadd.f32 %v2347_v10, %v2346_v3  ;;  %v2336_v36 = vadd.f32 %v2335_v31, %v2334_v8 }
 0x9fe   :  { %v2349_v37 = vrot.slane %v2348_v18, 2  ;;  %v2337_v32 = vrot.slane %v2336_v36, 1 }
 0xa00   :  { %v2350_v38 = vadd.f32 %v2349_v37, %v2348_v18  ;;  %v2338_v42 = vadd.f32 %v2337_v32, %v2336_v36  ;;  %v11609_v37 = vld [vmem:[%s13159_s3 + $0x1] ss:$0 sm:$0xff] }
 0xa02   :  { %v2351_v43 = vrot.slane %v2350_v38, 1 }
 0xa03   :  { %v11412_v51 = vpop.eup %11411 }
 0xa04   :  { %v2352_v47 = vadd.f32 %v2351_v43, %v2350_v38 }
 0xa11   :  { %v2297_v5 = vpop.xlane.xlu1 %2296 }
 0xa12   :  { %v2303_v52 = vadd.f32 %v11412_v51, %v2297_v5 }
 0xa14   :  { %11413 = vrcp.f32 %v2303_v52 }
 0xa15   :  { %v2650_v12 = vpop.permute.xlu1 %2649 }
 0xa16   :  { %10851 = vmatmul.mubr.msk.f32.vlgmr.msra.gmra.mxu0 %vm77_vm0, %v2650_v12 }
 0xa17   :  { %10860 = vmatprep.mubr.msk.f32.mxu0 %vm11669_vm1, %v11668_v16 }
 0xa19   :  { %v12163_v53 = vpop.permute.xlu1 %2801 }
 0xa1d   :  { %v12165_v54 = vpop.permute.xlu1 %2875 }
 0xa1e   :  { %10859 = vmatpush3.xpose.msk.msra.mxu0 %vm77_vm0, %v12165_v54 }
 0xa1f   :  { %10868 = vmatprep.subr.mxu0 %v11668_v16 }
 0xa21   :  { %v11414_v26 = vpop.eup %11413  ;;  %10861 = vmatmul.mubr.msk.f32.vlgmr.msra.gmra.mxu0 %vm77_vm0, %v2650_v12 }
 0xa22   :  { %10869 = vmatpush3.msra.mxu0 %v2728_v41  ;;  %v2315_v13 = vmul.f32 %v11414_v26, %v12131_v6  ;;  %v2319_v55 = vmul.f32 %v11414_v26, %v11412_v51  ;;  %10870 = vmatprep.mubr.msk.f32.mxu0 %vm11669_vm1, %v11668_v16  ;;  %v2328_v6 = vrot.slane %v2327_v1, 2 }
 0xa23   :  { %10878 = vmatprep.subr.mxu0 %v11668_v16 }
 0xa24   :  { %10836 = vmatmul.mubr.msk.f32.vlgmr.msra.gmra.mxu1 %vm692_vm2, %v2315_v13  ;;  %v2329_v15 = vadd.f32 %v2328_v6, %v2327_v1  ;;  %v2323_v50 = vmul.f32 %v2319_v55, %v12023_v34 }
 0xa25   :  { %10844 = vmatpush3.xpose.msk.msra.mxu1 %vm77_vm0, %v2652_v59  ;;  %10845 = vmatprep.mubr.msk.f32.mxu1 %vm11669_vm1, %v11668_v16 }
 0xa26   :  { %10853 = vmatprep.subr.mxu1 %v11668_v16  ;;  %v2330_v35 = vrot.slane %v2329_v15, 1  ;;  %v2339_v4 = vsel %vm77_vm0, %v2323_v50, 0.0 }
 0xa27   :  { %v2340_v57 = vrot.slane %v2339_v4, 4 }
 0xa28   :  { %10846 = vmatmul.mubr.msk.f32.vlgmr.msra.gmra.mxu1 %vm77_vm0, %v2650_v12  ;;  %v2331_v28 = vadd.f32 %v2330_v35, %v2329_v15  ;;  %v11608_v15 = vld [vmem:[%s13159_s3] ss:$0 sm:$0xff] }
 0xa29   :  { %10854 = vmatpush3.xpose.msk.msra.mxu1 %vm77_vm0, %v12163_v53  ;;  %10855 = vmatprep.mubr.msk.f32.mxu1 %vm11669_vm1, %v11668_v16 }
 0xa2a   :  { %10863 = vmatprep.subr.mxu1 %v11668_v16 }
 0xa2c   :  { %10856 = vmatmul.mubr.msk.f32.vlgmr.msra.gmra.mxu1 %vm77_vm0, %v2650_v12 }
 0xa2d   :  { %10864 = vmatpush3.msra.mxu1 %v2652_v59  ;;  %10865 = vmatprep.mubr.msk.f32.mxu1 %vm11669_vm1, %v11668_v16  ;;  %v2341_v59 = vadd.f32 %v2340_v57, %v2339_v4 }
 0xa2e   :  { %10873 = vmatprep.subr.mxu1 %v11668_v16 }
 0xa2f   :  { %v2342_v5 = vrot.slane %v2341_v59, 2 }
 0xa31   :  { %v2343_v12 = vadd.f32 %v2342_v5, %v2341_v59 }
 0xa33   :  { %v2344_v26 = vrot.slane %v2343_v12, 1 }
 0xa35   :  { %v2345_v60 = vadd.f32 %v2344_v26, %v2343_v12 }
 0xa77   :  { %v2963_v43 = vpop.xlane.xlu1 %2962 }
 0xaaf   :  { %v2422_v39 = vpop.f32.mrf.mxu1 }
 0xab0   :  { %v12196_v40 = vadd.f32 %v2422_v39, %v2331_v28  ;;  %v11610_v39 = vld [vmem:[%s13159_s3 + $0x2] ss:$0 sm:$0xff] }
 0xab1   :  { %v10827_v41 = vpop.f32.mrf.mxu1 }
 0xab3   :  { %v2495_v44 = vpop.f32.mrf.mxu0 }
 0xab4   :  { %v12198_v45 = vadd.f32 %v2495_v44, %v2338_v42  ;;  %v2964_v44 = vmul.f32 0.17677669, %v2963_v43 }
 0xab5   :  { %v10832_v46 = vpop.f32.mrf.mxu0 }
 0xab7   :  { %v2641_v48 = vpop.f32.mrf.mxu0 }
 0xab8   :  { %v12200_v49 = vadd.f32 %v2641_v48, %v2352_v47 }
 0xab9   :  { %v10842_v21 = vpop.f32.mrf.mxu0 }
 0xad6   :  { %v2797_v51 = vpop.f32.mrf.mxu0 }
 0xad7   :  { %v2950_v6 = vmul.f32 0.17677669, %v2797_v51 }
 0xad8   :  { %v10852_v52 = vpop.f32.mrf.mxu0 }
 0xad9   :  { %v2954_v28 = vadd.f32 %v11609_v37, %v2950_v6 }
 0xadb   :  { %v2968_v38 = vsel %vm692_vm2, %v2954_v28, -inf }
 0xae1   :  { %v2945_v13 = vpop.f32.mrf.mxu0 }
 0xae2   :  { %v2952_v56 = vmul.f32 0.17677669, %v2945_v13 }
 0xae3   :  { %v10862_v58 = vpop.f32.mrf.mxu0 }
 0xae4   :  { %v2568_v61 = vpop.f32.mrf.mxu1  ;;  %v2956_v0 = vadd.f32 %v11607_v62, %v2952_v56 }
 0xae5   :  { %v12207_v55 = vadd.f32 %v2568_v61, %v2345_v60 }
 0xae6   :  { %v10837_v1 = vpop.f32.mrf.mxu1  ;;  %v2974_v2 = vsel %vm692_vm2, %v2956_v0, -inf }
 0xae7   :  { %2975 = vmax.xlane.f32.xlu1 %v2974_v2 }
 0xae8   :  { %v2723_v3 = vpop.f32.mrf.mxu1 }
 0xae9   :  { %v2949_v8 = vmul.f32 0.17677669, %v2723_v3 }
 0xaea   :  { %v10847_v10 = vpop.f32.mrf.mxu1 }
 0xaeb   :  { %v2953_v31 = vadd.f32 %v11608_v15, %v2949_v8 }
 0xaec   :  { %v2871_v18 = vpop.f32.mrf.mxu1 }
 0xaed   :  { %v2951_v35 = vmul.f32 0.17677669, %v2871_v18  ;;  %v2965_v36 = vsel %vm692_vm2, %v2953_v31, -inf }
 0xaee   :  { %2966 = vmax.xlane.f32.xlu0 %v2965_v36  ;;  %v10857_v32 = vpop.f32.mrf.mxu1 }
 0xaef   :  { %v2955_v41 = vadd.f32 %v11610_v39, %v2951_v35 }
 0xaf1   :  { %v2971_v42 = vsel %vm692_vm2, %v2955_v41, -inf }
 0xaf2   :  { %2969 = vmax.xlane.f32.xlu0 %v2968_v38 }
 0xaf6   :  { %2972 = vmax.xlane.f32.xlu0 %v2971_v42 }
 0xb70   :  { %v2976_v46 = vpop.xlane.xlu1 %2975 }
 0xb71   :  { %v2980_v47 = vmax.f32 %v2976_v46, %v2964_v44 }
 0xb73   :  { %v2996_v48 = vsub.f32 %v2964_v44, %v2980_v47  ;;  %v2984_v51 = vsub.f32 %v2956_v0, %v2980_v47 }
 0xb75   :  { %v2991_v56 = vmul.f32 1.442695, %v2984_v51  ;;  %v3003_v36 = vmul.f32 1.442695, %v2996_v48 }
 0xb77   :  { %v2967_v21 = vpop.xlane.xlu0 %2966 }
 0xb78   :  { %v2977_v50 = vmax.f32 %v2967_v21, %v2964_v44 }
 0xb7a   :  { %v2981_v4 = vsub.f32 %v2953_v31, %v2977_v50  ;;  %v2993_v57 = vsub.f32 %v2964_v44, %v2977_v50 }
 0xb7b   :  { %v2970_v59 = vpop.xlane.xlu0 %2969 }
 0xb7c   :  { %v2985_v5 = vmul.f32 1.442695, %v2981_v4  ;;  %v2978_v52 = vmax.f32 %v2970_v59, %v2964_v44  ;;  %v2997_v18 = vmul.f32 1.442695, %v2993_v57 }
 0xb7e   :  { %11415 = vpow2.f32 %v2985_v5  ;;  %v2982_v12 = vsub.f32 %v2954_v28, %v2978_v52  ;;  %v2994_v26 = vsub.f32 %v2964_v44, %v2978_v52 }
 0xb7f   :  { %v2973_v13 = vpop.xlane.xlu0 %2972 }
 0xb80   :  { %v2987_v58 = vmul.f32 1.442695, %v2982_v12  ;;  %v2979_v60 = vmax.f32 %v2973_v13, %v2964_v44  ;;  %v2999_v35 = vmul.f32 1.442695, %v2994_v26 }
 0xb82   :  { %11417 = vpow2.f32 %v2987_v58  ;;  %v2983_v61 = vsub.f32 %v2955_v41, %v2979_v60  ;;  %v2995_v62 = vsub.f32 %v2964_v44, %v2979_v60 }
 0xb83   :  { %11419 = vpow2.f32 %v2991_v56 }
 0xb84   :  { %v2989_v1 = vmul.f32 1.442695, %v2983_v61  ;;  %v3001_v37 = vmul.f32 1.442695, %v2995_v62 }
 0xb86   :  { %11421 = vpow2.f32 %v2989_v1 }
 0xb87   :  { %11423 = vpow2.f32 %v2997_v18 }
 0xb88   :  { %11425 = vpow2.f32 %v2999_v35 }
 0xb89   :  { %11427 = vpow2.f32 %v3003_v36 }
 0xb8a   :  { %11429 = vpow2.f32 %v3001_v37 }
 0xb8b   :  { %v11416_v2 = vpop.eup %11415 }
 0xb8c   :  { %v3005_v3 = vsel %vm692_vm2, %v11416_v2, 0.0 }
 0xb8d   :  { %3006 = vadd.xlane.f32.xlu0 %v3005_v3 }
 0xb8f   :  { %v11418_v0 = vpop.eup %11417 }
 0xb90   :  { %v3008_v6 = vsel %vm692_vm2, %v11418_v0, 0.0  ;;  %v11420_v8 = vpop.eup %11419 }
 0xb91   :  { %3009 = vadd.xlane.f32.xlu1 %v3008_v6  ;;  %v3014_v15 = vsel %vm692_vm2, %v11420_v8, 0.0 }
 0xb93   :  { %v11422_v10 = vpop.eup %11421 }
 0xb94   :  { %v3011_v31 = vsel %vm692_vm2, %v11422_v10, 0.0  ;;  %v11424_v28 = vpop.eup %11423 }
 0xb95   :  { %3015 = vadd.xlane.f32.xlu1 %v3014_v15  ;;  %3012 = vadd.xlane.f32.xlu0 %v3011_v31  ;;  %v11426_v39 = vpop.eup %11425 }
 0xb96   :  { %v11428_v42 = vpop.eup %11427 }
 0xba6   :  { %3390 = vrot.lane.b32.xlu1 %v11931_v11, %s11670_s17 }
 0xbaa   :  { %3388 = vrot.lane.b32.xlu1 %v11937_v14, %s11670_s17  ;;  %v11430_v14 = vpop.eup %11429 }
 0xbab   :  { %3392 = vrot.lane.b32.xlu0 %v11911_v63, %s11670_s17 }
 0xc16   :  { %v3007_v32 = vpop.xlane.xlu0 %3006 }
 0xc17   :  { %v3017_v38 = vadd.f32 %v11424_v28, %v3007_v32 }
 0xc19   :  { %11431 = vrcp.f32 %v3017_v38 }
 0xc1a   :  { %v3010_v11 = vpop.xlane.xlu1 %3009 }
 0xc1b   :  { %v3018_v41 = vadd.f32 %v11426_v39, %v3010_v11 }
 0xc1d   :  { %11433 = vrcp.f32 %v3018_v41 }
 0xc1e   :  { %v3016_v43 = vpop.xlane.xlu1 %3015  ;;  %v3013_v63 = vpop.xlane.xlu0 %3012 }
 0xc1f   :  { %v3020_v44 = vadd.f32 %v11428_v42, %v3016_v43  ;;  %v3019_v46 = vadd.f32 %v11430_v14, %v3013_v63  ;;  %v11611_v63 = vld [vmem:[%s13162_s6] sm:$0xff] }
 0xc21   :  { %11435 = vrcp.f32 %v3020_v44 }
 0xc22   :  { %11437 = vrcp.f32 %v3019_v46  ;;  %v3393_v57 = vpop.permute.xlu0 %3392  ;;  %v3391_v61 = vpop.permute.xlu1 %3390 }
 0xc26   :  { %v11432_v47 = vpop.eup %11431  ;;  %v3389_v37 = vpop.permute.xlu1 %3388 }
 0xc27   :  { %v3029_v48 = vmul.f32 %v11432_v47, %v11416_v2  ;;  %v3033_v21 = vmul.f32 %v11432_v47, %v11424_v28 }
 0xc29   :  { %10866 = vmatmul.mubr.msk.f32.vlgmr.msra.gmra.mxu1 %vm692_vm2, %v3029_v48  ;;  %v3037_v50 = vmul.f32 %v3033_v21, %v11842_v29  ;;  %v11612_v21 = vld [vmem:[%s13163_s7] ss:$0 sm:$0xff] }
 0xc2a   :  { %v11434_v4 = vpop.eup %11433  ;;  %10874 = vmatpush3.msra.mxu1 %v12163_v53  ;;  %10875 = vmatprep.mubr.msk.f32.mxu1 %vm11669_vm1, %v11668_v16 }
 0xc2b   :  { %v3030_v59 = vmul.f32 %v11434_v4, %v11418_v0  ;;  %v3042_v51 = vsel %vm3041_vm3, %v3037_v50, 0.0  ;;  %v3034_v5 = vmul.f32 %v11434_v4, %v11426_v39  ;;  %10883 = vmatprep.subr.mxu1 %v3393_v57 }
 0xc2c   :  { %v3043_v52 = vrot.slane %v3042_v51, 4 }
 0xc2d   :  { %10871 = vmatmul.mubr.msk.f32.vlgmr.msra.gmra.mxu0 %vm692_vm2, %v3030_v59  ;;  %v3038_v12 = vmul.f32 %v3034_v5, %v11842_v29 }
 0xc2e   :  { %v11436_v26 = vpop.eup %11435  ;;  %10879 = vmatpush3.msra.mxu0 %v12165_v54  ;;  %10880 = vmatprep.mubr.msk.f32.mxu0 %vm11669_vm1, %v11668_v16  ;;  %v3044_v53 = vadd.f32 %v3043_v52, %v3042_v51 }
 0xc2f   :  { %v11438_v13 = vpop.eup %11437  ;;  %v3032_v56 = vmul.f32 %v11436_v26, %v11420_v8  ;;  %v3049_v58 = vsel %vm3041_vm3, %v3038_v12, 0.0  ;;  %v3036_v60 = vmul.f32 %v11436_v26, %v11428_v42  ;;  %10897 = vmatprep.subr.mxu0 %v11668_v16 }
 0xc30   :  { %v3031_v62 = vmul.f32 %v11438_v13, %v11422_v10  ;;  %v3045_v1 = vrot.slane %v3044_v53, 2  ;;  %v3050_v2 = vrot.slane %v3049_v58, 4  ;;  %v3035_v3 = vmul.f32 %v11438_v13, %v11430_v14 }
 0xc31   :  { %10881 = vmatmul.mubr.msk.f32.vlgmr.msra.gmra.mxu0 %vm692_vm2, %v3032_v56  ;;  %v3040_v54 = vmul.f32 %v3036_v60, %v11842_v29 }
 0xc32   :  { %10876 = vmatmul.mubr.msk.f32.vlgmr.msra.gmra.mxu1 %vm692_vm2, %v3031_v62  ;;  %v3046_v0 = vadd.f32 %v3045_v1, %v3044_v53  ;;  %v3051_v6 = vadd.f32 %v3050_v2, %v3049_v58  ;;  %v3039_v8 = vmul.f32 %v3035_v3, %v11842_v29  ;;  %10899 = vmatprep.mubr.msk.f32.mxu0 %vm11669_vm1, %v11668_v16 }
 0xc33   :  { %v3063_v15 = vsel %vm3041_vm3, %v3040_v54, 0.0  ;;  %10884 = vmatpush3.msra.mxu1 %v3393_v57 }
 0xc34   :  { %v3047_v10 = vrot.slane %v3046_v0, 1  ;;  %v3052_v31 = vrot.slane %v3051_v6, 2  ;;  %v3064_v18 = vrot.slane %v3063_v15, 4  ;;  %v3056_v35 = vsel %vm3041_vm3, %v3039_v8, 0.0  ;;  %10885 = vmatprep.subr.mxu1 %v3391_v61 }
 0xc35   :  { %v3057_v36 = vrot.slane %v3056_v35, 4  ;;  %10886 = vmatpush3.msra.mxu1 %v3391_v61 }
 0xc36   :  { %v3048_v28 = vadd.f32 %v3047_v10, %v3046_v0  ;;  %v3053_v32 = vadd.f32 %v3052_v31, %v3051_v6  ;;  %v3065_v38 = vadd.f32 %v3064_v18, %v3063_v15  ;;  %10887 = vmatprep.subr.mxu1 %v3389_v37 }
 0xc37   :  { %v3058_v29 = vadd.f32 %v3057_v36, %v3056_v35  ;;  %10888 = vmatpush3.msra.mxu1 %v3389_v37 }
 0xc38   :  { %3072 = vrot.lane.b32.xlu1 %v3048_v28, %s11670_s17  ;;  %v3054_v39 = vrot.slane %v3053_v32, 1  ;;  %v3066_v11 = vrot.slane %v3065_v38, 2 }
 0xc39   :  { %v3059_v41 = vrot.slane %v3058_v29, 2 }
 0xc3a   :  { %v3055_v42 = vadd.f32 %v3054_v39, %v3053_v32  ;;  %v3067_v14 = vadd.f32 %v3066_v11, %v3065_v38 }
 0xc3b   :  { %v3060_v43 = vadd.f32 %v3059_v41, %v3058_v29 }
 0xc3c   :  { %3150 = vrot.lane.b32.xlu0 %v3055_v42, %s11670_s17  ;;  %3386 = vrot.lane.b32.xlu1 %v11611_v63, %s11670_s17  ;;  %v3068_v44 = vrot.slane %v3067_v14, 1 }
 0xc3d   :  { %v3061_v46 = vrot.slane %v3060_v43, 1 }
 0xc3e   :  { %v3069_v47 = vadd.f32 %v3068_v44, %v3067_v14 }
 0xc3f   :  { %v3062_v48 = vadd.f32 %v3061_v46, %v3060_v43 }
 0xc40   :  { %3306 = vrot.lane.b32.xlu1 %v3069_v47, %s11670_s17 }
 0xc41   :  { %3228 = vrot.lane.b32.xlu0 %v3062_v48, %s11670_s17 }
 0xc45   :  { %3398 = vrot.lane.b32.xlu0 %v11612_v21, %s11670_s17 }
 0xcaa   :  { %v3073_v50 = vpop.permute.xlu1 %3072 }
 0xcae   :  { %v3387_v4 = vpop.permute.xlu1 %3386  ;;  %v3151_v5 = vpop.permute.xlu0 %3150 }
 0xcaf   :  { %10889 = vmatprep.subr.mxu1 %v3387_v4 }
 0xcb0   :  { %10890 = vmatpush3.msra.mxu1 %v3387_v4 }
 0xcb1   :  { %10912 = vmatprep.subr.mxu1 %v11668_v16 }
 0xcb2   :  { %v3307_v53 = vpop.permute.xlu1 %3306 }
 0xcb3   :  { %v3229_v56 = vpop.permute.xlu0 %3228 }
 0xcb7   :  { %v3399_v3 = vpop.permute.xlu0 %3398 }
 0xce9   :  { %v3144_v57 = vpop.f32.mrf.mxu1 }
 0xcea   :  { %v3145_v59 = vadd.f32 %v3144_v57, %v3073_v50 }
 0xceb   :  { %v10867_v51 = vpop.f32.mrf.mxu1 }
 0xcec   :  { %10891 = vmatprep.mubr.msk.f32.mxu1 %vm77_vm0, %v3145_v59 }
 0xced   :  { %v3222_v52 = vpop.f32.mrf.mxu0 }
 0xcee   :  { %v3223_v12 = vadd.f32 %v3222_v52, %v3151_v5 }
 0xcef   :  { %v10872_v26 = vpop.f32.mrf.mxu0 }
 0xcf0   :  { %10892 = vmatmul.mubr.msk.f32.vlgmr.msra.gmra.mxu1 %vm77_vm0, %v3223_v12 }
 0xcf1   :  { %v3378_v13 = vpop.f32.mrf.mxu0 }
 0xcf2   :  { %v3300_v58 = vpop.f32.mrf.mxu1  ;;  %v3379_v60 = vadd.f32 %v3378_v13, %v3307_v53 }
 0xcf3   :  { %v3301_v61 = vadd.f32 %v3300_v58, %v3229_v56  ;;  %v10882_v62 = vpop.f32.mrf.mxu0 }
 0xcf4   :  { %v10877_v1 = vpop.f32.mrf.mxu1 }
 0xcf5   :  { %10894 = vmatprep.mubr.msk.f32.mxu1 %vm77_vm0, %v3301_v61  ;;  %v11613_v1 = vld [vmem:[%s13164_s8 + $0x18] sm:$0xff] }
 0xcf6   :  { %10895 = vmatmul.mubr.msk.f32.gmra.mxu1 %vm77_vm0, %v3379_v60 }
 0xcf7   :  { %10914 = vmatprep.mubr.msk.f32.mxu1 %vm11669_vm1, %v11668_v16 }
 0xdb0   :  { %v10893_v2 = vpop.f32.mrf.mxu1 }
 0xdb1   :  { %v3485_v8 = vadd.f32 %v10893_v2, %v3399_v3  ;;  %v11614_v2 = vld [vmem:[%s13164_s8 + $0x8] sm:$0xff] }
 0xdb2   :  { %v3479_v54 = vpop.f32.mrf.mxu1 }
 0xdb3   :  { %v3480_v0 = vadd.f32 %v3479_v54, %v3399_v3  ;;  %v11616_v54 = vld [vmem:[%s13164_s8 + $0x10] sm:$0xff] }
 0xdb5   :  { %10898 = vmatpush3.xpose.msk.msra.mxu0 %vm77_vm0, %v3480_v0 }
 0xdb6   :  { %v10896_v6 = vpop.f32.mrf.mxu1  ;;  %10902 = vmatprep.subr.mxu0 %v11668_v16 }
 0xdb7   :  { %v12274_v15 = vadd.f32 %v10896_v6, %v3399_v3 }
 0xdb8   :  { %v3489_v10 = vpop.f32.mrf.mxu1  ;;  %10900 = vmatmul.mubr.msk.f32.vlgmr.msra.gmra.mxu0 %vm77_vm0, %v3480_v0 }
 0xdb9   :  { %10913 = vmatpush3.xpose.msk.msra.mxu1 %vm77_vm0, %v12274_v15  ;;  %10903 = vmatpush3.xpose.msk.msra.mxu0 %vm77_vm0, %v3485_v8  ;;  %v12283_v31 = vadd.f32 %v3489_v10, %v3399_v3  ;;  %v11615_v3 = vld [vmem:[%s13164_s8] sm:$0xff] }
 0xdba   :  { %10904 = vmatprep.mubr.msk.f32.mxu0 %vm11669_vm1, %v11668_v16  ;;  %10922 = vmatprep.subr.mxu1 %v11668_v16 }
 0xdbb   :  { %10907 = vmatprep.subr.mxu0 %v11668_v16 }
 0xdbc   :  { %10915 = vmatmul.mubr.msk.f32.vlgmr.msra.gmra.mxu1 %vm77_vm0, %v12274_v15  ;;  %10905 = vmatmul.mubr.msk.f32.vlgmr.msra.gmra.mxu0 %vm77_vm0, %v3485_v8 }
 0xdbd   :  { %10923 = vmatpush3.msra.mxu1 %v3485_v8  ;;  %10908 = vmatpush3.xpose.msk.msra.mxu0 %vm77_vm0, %v12283_v31 }
 0xdbe   :  { %10909 = vmatprep.mubr.msk.f32.mxu0 %vm11669_vm1, %v11668_v16  ;;  %10917 = vmatprep.subr.mxu0 %v11668_v16 }
 0xdbf   :  { %10924 = vmatprep.mubr.msk.f32.mxu1 %vm11669_vm1, %v11668_v16  ;;  %10932 = vmatprep.subr.mxu1 %v11668_v16 }
 0xdc0   :  { %10910 = vmatmul.mubr.msk.f32.vlgmr.msra.gmra.mxu0 %vm77_vm0, %v12283_v31 }
 0xdc1   :  { %10918 = vmatpush3.msra.mxu0 %v3480_v0  ;;  %10919 = vmatprep.mubr.msk.f32.mxu0 %vm11669_vm1, %v11668_v16  ;;  %v11617_v0 = vld [vmem:[%s13165_s9] ss:$0 sm:$0xff] }
 0xdc2   :  { %10927 = vmatprep.subr.mxu0 %v11668_v16 }
 0xe78   :  { %v3567_v18 = vpop.f32.mrf.mxu0 }
 0xe79   :  { %v3790_v35 = vmul.f32 0.17677669, %v3567_v18 }
 0xe7a   :  { %v10901_v36 = vpop.f32.mrf.mxu0 }
 0xe7b   :  { %v3794_v37 = vsel %vm692_vm2, %v3790_v35, -inf }
 0xe7c   :  { %v3786_v28 = vpop.f32.mrf.mxu1  ;;  %3795 = vmax.xlane.f32.xlu1 %v3794_v37  ;;  %v3640_v32 = vpop.f32.mrf.mxu0 }
 0xe7d   :  { %v3791_v38 = vmul.f32 0.17677669, %v3640_v32  ;;  %v3793_v43 = vmul.f32 0.17677669, %v3786_v28 }
 0xe7e   :  { %v10916_v29 = vpop.f32.mrf.mxu1  ;;  %v10906_v39 = vpop.f32.mrf.mxu0 }
 0xe7f   :  { %v3797_v11 = vsel %vm692_vm2, %v3791_v38, -inf  ;;  %v3803_v44 = vsel %vm692_vm2, %v3793_v43, -inf }
 0xe80   :  { %3798 = vmax.xlane.f32.xlu0 %v3797_v11  ;;  %v3713_v41 = vpop.f32.mrf.mxu0 }
 0xe81   :  { %v3792_v42 = vmul.f32 0.17677669, %v3713_v41 }
 0xe82   :  { %v10911_v14 = vpop.f32.mrf.mxu0 }
 0xe83   :  { %v3800_v63 = vsel %vm692_vm2, %v3792_v42, -inf }
 0xe84   :  { %3801 = vmax.xlane.f32.xlu0 %v3800_v63 }
 0xe88   :  { %3804 = vmax.xlane.f32.xlu0 %v3803_v44 }
 0xf05   :  { %v3796_v46 = vpop.xlane.xlu1 %3795 }
 0xf06   :  { %v3806_v47 = vsub.f32 %v3790_v35, %v3796_v46 }
 0xf08   :  { %v3810_v48 = vmul.f32 1.442695, %v3806_v47 }
 0xf09   :  { %v3799_v21 = vpop.xlane.xlu0 %3798 }
 0xf0a   :  { %11439 = vpow2.f32 %v3810_v48  ;;  %v3807_v50 = vsub.f32 %v3791_v38, %v3799_v21 }
 0xf0c   :  { %v3812_v4 = vmul.f32 1.442695, %v3807_v50 }
 0xf0d   :  { %v3802_v57 = vpop.xlane.xlu0 %3801 }
 0xf0e   :  { %11441 = vpow2.f32 %v3812_v4  ;;  %v3808_v59 = vsub.f32 %v3792_v42, %v3802_v57 }
 0xf10   :  { %v3814_v51 = vmul.f32 1.442695, %v3808_v59 }
 0xf11   :  { %v3805_v5 = vpop.xlane.xlu0 %3804 }
 0xf12   :  { %11443 = vpow2.f32 %v3814_v51  ;;  %v3809_v52 = vsub.f32 %v3793_v43, %v3805_v5 }
 0xf14   :  { %v3816_v12 = vmul.f32 1.442695, %v3809_v52 }
 0xf16   :  { %11445 = vpow2.f32 %v3816_v12 }
 0xf17   :  { %v11440_v26 = vpop.eup %11439 }
 0xf18   :  { %v3818_v53 = vsel %vm692_vm2, %v11440_v26, 0.0 }
 0xf19   :  { %3819 = vadd.xlane.f32.xlu1 %v3818_v53 }
 0xf1b   :  { %v11442_v13 = vpop.eup %11441 }
 0xf1c   :  { %v3821_v56 = vsel %vm692_vm2, %v11442_v13, 0.0 }
 0xf1d   :  { %3822 = vadd.xlane.f32.xlu0 %v3821_v56 }
 0xf1f   :  { %v11444_v58 = vpop.eup %11443 }
 0xf20   :  { %v3824_v60 = vsel %vm692_vm2, %v11444_v58, 0.0 }
 0xf21   :  { %3825 = vadd.xlane.f32.xlu1 %v3824_v60 }
 0xf23   :  { %v11446_v61 = vpop.eup %11445 }
 0xf24   :  { %v3827_v62 = vsel %vm692_vm2, %v11446_v61, 0.0 }
 0xf25   :  { %3828 = vadd.xlane.f32.xlu0 %v3827_v62 }
 0xf32   :  { %4140 = vrot.lane.b32.xlu1 %v11613_v1, %s11670_s17 }
 0xf36   :  { %4136 = vrot.lane.b32.xlu1 %v11614_v2, %s11670_s17 }
 0xf3a   :  { %4134 = vrot.lane.b32.xlu1 %v11615_v3, %s11670_s17 }
 0xf3b   :  { %4138 = vrot.lane.b32.xlu0 %v11616_v54, %s11670_s17 }
 0xf3e   :  { %4146 = vrot.lane.b32.xlu1 %v11617_v0, %s11670_s17 }
 0xf3f   :  { %4278 = vrot.lane.b32.xlu0 %v12010_v9, %s11670_s17 }
 0xf42   :  { %4355 = vrot.lane.b32.xlu1 %v12005_v7, %s11670_s17 }
 0xf43   :  { %4432 = vrot.lane.b32.xlu0 %v12023_v34, %s11670_s17 }
 0xf46   :  { %4509 = vrot.lane.b32.xlu1 %v12014_v17, %s11670_s17 }
 0xf47   :  { %4250 = vrot.lane.b32.xlu0 %v12028_v20, %s11670_s17 }
 0xf4a   :  { %4252 = vrot.lane.b32.xlu1 %v12019_v19, %s11670_s17 }
 0xf4b   :  { %4254 = vrot.lane.b32.xlu0 %v12040_v25, %s11670_s17 }
 0xf4e   :  { %4256 = vrot.lane.b32.xlu1 %v12034_v23, %s11670_s17 }
 0xfa2   :  { %v3820_v6 = vpop.xlane.xlu1 %3819 }
 0xfa3   :  { %11447 = vrcp.f32 %v3820_v6 }
 0xfa6   :  { %v3823_v8 = vpop.xlane.xlu0 %3822 }
 0xfa7   :  { %11449 = vrcp.f32 %v3823_v8 }
 0xfaa   :  { %v3826_v10 = vpop.xlane.xlu1 %3825 }
 0xfab   :  { %11451 = vrcp.f32 %v3826_v10 }
 0xfae   :  { %v4141_v18 = vpop.permute.xlu1 %4140  ;;  %v3829_v35 = vpop.xlane.xlu0 %3828 }
 0xfaf   :  { %11453 = vrcp.f32 %v3829_v35 }
 0xfb0   :  { %v11448_v36 = vpop.eup %11447 }
 0xfb1   :  { %v3831_v37 = vmul.f32 %v11448_v36, %v11440_v26 }
 0xfb2   :  { %v4137_v28 = vpop.permute.xlu1 %4136  ;;  %v4139_v32 = vpop.permute.xlu0 %4138 }
 0xfb3   :  { %10920 = vmatmul.mubr.msk.f32.vlgmr.msra.gmra.mxu0 %vm692_vm2, %v3831_v37 }
 0xfb4   :  { %v11450_v38 = vpop.eup %11449  ;;  %10928 = vmatpush3.msra.mxu0 %v12283_v31  ;;  %10929 = vmatprep.mubr.msk.f32.mxu0 %vm11669_vm1, %v11668_v16 }
 0xfb5   :  { %v3833_v29 = vmul.f32 %v11450_v38, %v11442_v13  ;;  %10937 = vmatprep.subr.mxu0 %v4141_v18 }
 0xfb6   :  { %v4135_v39 = vpop.permute.xlu1 %4134  ;;  %v4279_v11 = vpop.permute.xlu0 %4278 }
 0xfb7   :  { %10925 = vmatmul.mubr.msk.f32.vlgmr.msra.gmra.mxu1 %vm692_vm2, %v3833_v29 }
 0xfb8   :  { %v11452_v41 = vpop.eup %11451  ;;  %10933 = vmatpush3.msra.mxu1 %v12274_v15  ;;  %10934 = vmatprep.mubr.msk.f32.mxu1 %vm11669_vm1, %v11668_v16 }
 0xfb9   :  { %v3835_v42 = vmul.f32 %v11452_v41, %v11444_v58  ;;  %10951 = vmatprep.subr.mxu1 %v11668_v16 }
 0xfba   :  { %v4147_v14 = vpop.permute.xlu1 %4146  ;;  %v12355_v31 = vpop.permute.xlu0 %4432 }
 0xfbb   :  { %10930 = vmatmul.mubr.msk.f32.vlgmr.msra.gmra.mxu0 %vm692_vm2, %v3835_v42 }
 0xfbc   :  { %v11454_v43 = vpop.eup %11453  ;;  %10938 = vmatpush3.msra.mxu0 %v4141_v18 }
 0xfbd   :  { %v3837_v63 = vmul.f32 %v11454_v43, %v11446_v61  ;;  %10939 = vmatprep.subr.mxu0 %v4139_v32 }
 0xfbe   :  { %v4356_v44 = vpop.permute.xlu1 %4355  ;;  %v4251_v46 = vpop.permute.xlu0 %4250  ;;  %10940 = vmatpush3.msra.mxu0 %v4139_v32 }
 0xfbf   :  { %10935 = vmatmul.mubr.msk.f32.vlgmr.msra.gmra.mxu1 %vm692_vm2, %v3837_v63  ;;  %v4262_v15 = vsel %vm77_vm0, %v4251_v46, 0.0  ;;  %10941 = vmatprep.subr.mxu0 %v4137_v28 }
 0xfc0   :  { %4263 = vadd.xlane.f32.xlu0 %v4262_v15  ;;  %10942 = vmatpush3.msra.mxu0 %v4137_v28 }
 0xfc1   :  { %10943 = vmatprep.subr.mxu0 %v4135_v39  ;;  %10953 = vmatprep.mubr.msk.f32.mxu1 %vm11669_vm1, %v11668_v16 }
 0xfc2   :  { %v4510_v47 = vpop.permute.xlu1 %4509  ;;  %v4255_v48 = vpop.permute.xlu0 %4254  ;;  %10944 = vmatpush3.msra.mxu0 %v4135_v39 }
 0xfc3   :  { %v4268_v21 = vsel %vm77_vm0, %v4255_v48, 0.0  ;;  %10966 = vmatprep.subr.mxu0 %v11668_v16 }
 0xfc4   :  { %4269 = vadd.xlane.f32.xlu0 %v4268_v21 }
 0xfc6   :  { %v4253_v50 = vpop.permute.xlu1 %4252 }
 0xfc7   :  { %v4265_v4 = vsel %vm77_vm0, %v4253_v50, 0.0 }
 0xfc8   :  { %4266 = vadd.xlane.f32.xlu1 %v4265_v4 }
 0xfca   :  { %v4257_v57 = vpop.permute.xlu1 %4256 }
 0xfcb   :  { %v4271_v59 = vsel %vm77_vm0, %v4257_v57, 0.0 }
 0xfcc   :  { %4272 = vadd.xlane.f32.xlu1 %v4271_v59 }
0x1051   :  { %v4267_v43 = vpop.xlane.xlu1 %4266 }
0x1055   :  { %v4273_v15 = vpop.xlane.xlu1 %4272 }
0x1056   :  { %v4277_v4 = vmul.f32 0.17677669, %v4273_v15 }
0x1073   :  { %v3907_v51 = vpop.f32.mrf.mxu0 }
0x1074   :  { %10945 = vmatprep.mubr.msk.f32.mxu0 %vm77_vm0, %v3907_v51 }
0x1075   :  { %v10921_v5 = vpop.f32.mrf.mxu0 }
0x1077   :  { %v3980_v52 = vpop.f32.mrf.mxu1 }
0x1078   :  { %10946 = vmatmul.mubr.msk.f32.vlgmr.msra.gmra.mxu0 %vm77_vm0, %v3980_v52 }
0x1079   :  { %v10926_v12 = vpop.f32.mrf.mxu1 }
0x107b   :  { %v4053_v26 = vpop.f32.mrf.mxu0 }
0x107c   :  { %10948 = vmatprep.mubr.msk.f32.mxu0 %vm77_vm0, %v4053_v26 }
0x107d   :  { %v10931_v53 = vpop.f32.mrf.mxu0 }
0x107f   :  { %v4126_v13 = vpop.f32.mrf.mxu1 }
0x1080   :  { %10949 = vmatmul.mubr.msk.f32.gmra.mxu0 %vm77_vm0, %v4126_v13 }
0x1081   :  { %v10936_v56 = vpop.f32.mrf.mxu1  ;;  %10968 = vmatprep.mubr.msk.f32.mxu0 %vm11669_vm1, %v11668_v16 }
0x1138   :  { %v10947_v58 = vpop.f32.mrf.mxu0 }
0x1139   :  { %v4233_v62 = vadd.f32 %v10947_v58, %v4147_v14 }
0x113a   :  { %v4227_v60 = vpop.f32.mrf.mxu0 }
0x113b   :  { %v4228_v61 = vadd.f32 %v4227_v60, %v4147_v14 }
0x113d   :  { %10952 = vmatpush3.xpose.msk.msra.mxu1 %vm77_vm0, %v4228_v61 }
0x113e   :  { %10956 = vmatprep.subr.mxu1 %v11668_v16 }
0x1140   :  { %v10950_v1 = vpop.f32.mrf.mxu0  ;;  %10954 = vmatmul.mubr.msk.f32.vlgmr.msra.gmra.mxu1 %vm77_vm0, %v4279_v11 }
0x1141   :  { %v12375_v2 = vadd.f32 %v10950_v1, %v4147_v14  ;;  %10957 = vmatpush3.xpose.msk.msra.mxu1 %vm77_vm0, %v4233_v62  ;;  %10958 = vmatprep.mubr.msk.f32.mxu1 %vm11669_vm1, %v11668_v16 }
0x1142   :  { %v4237_v3 = vpop.f32.mrf.mxu0  ;;  %10961 = vmatprep.subr.mxu1 %v11668_v16 }
0x1143   :  { %v12381_v54 = vadd.f32 %v4237_v3, %v4147_v14  ;;  %10967 = vmatpush3.xpose.msk.msra.mxu0 %vm77_vm0, %v12375_v2  ;;  %v4264_v14 = vpop.xlane.xlu0 %4263 }
0x1144   :  { %10959 = vmatmul.mubr.msk.f32.vlgmr.msra.gmra.mxu1 %vm77_vm0, %v4356_v44  ;;  %10976 = vmatprep.subr.mxu0 %v11668_v16  ;;  %v4274_v63 = vmul.f32 0.17677669, %v4264_v14 }
0x1145   :  { %10962 = vmatpush3.xpose.msk.msra.mxu1 %vm77_vm0, %v12381_v54  ;;  %10963 = vmatprep.mubr.msk.f32.mxu1 %vm11669_vm1, %v11668_v16 }
0x1146   :  { %10969 = vmatmul.mubr.msk.f32.vlgmr.msra.gmra.mxu0 %vm77_vm0, %v4510_v47  ;;  %10971 = vmatprep.subr.mxu1 %v11668_v16  ;;  %v4275_v47 = vmul.f32 0.17677669, %v4267_v43 }
0x1147   :  { %10977 = vmatpush3.msra.mxu0 %v4233_v62  ;;  %10978 = vmatprep.mubr.msk.f32.mxu0 %vm11669_vm1, %v11668_v16 }
0x1148   :  { %10964 = vmatmul.mubr.msk.f32.vlgmr.msra.gmra.mxu1 %vm77_vm0, %v12355_v31  ;;  %10986 = vmatprep.subr.mxu0 %v11668_v16  ;;  %v4270_v31 = vpop.xlane.xlu0 %4269 }
0x1149   :  { %10972 = vmatpush3.msra.mxu1 %v4228_v61  ;;  %10973 = vmatprep.mubr.msk.f32.mxu1 %vm11669_vm1, %v11668_v16  ;;  %v4276_v26 = vmul.f32 0.17677669, %v4270_v31 }
0x114a   :  { %10981 = vmatprep.subr.mxu1 %v11668_v16 }
0x1200   :  { %v4351_v0 = vpop.f32.mrf.mxu1 }
0x1201   :  { %v4586_v6 = vmul.f32 0.17677669, %v4351_v0 }
0x1202   :  { %v10955_v8 = vpop.f32.mrf.mxu1 }
0x1203   :  { %v4590_v10 = vsel %vm692_vm2, %v4586_v6, -inf }
0x1204   :  { %4591 = vmax.xlane.f32.xlu0 %v4590_v10  ;;  %v4428_v18 = vpop.f32.mrf.mxu1 }
0x1205   :  { %v4587_v35 = vmul.f32 0.17677669, %v4428_v18 }
0x1206   :  { %v10960_v36 = vpop.f32.mrf.mxu1  ;;  %v4582_v37 = vpop.f32.mrf.mxu0 }
0x1207   :  { %v4589_v28 = vmul.f32 0.17677669, %v4582_v37  ;;  %v4593_v32 = vsel %vm692_vm2, %v4587_v35, -inf }
0x1208   :  { %v10970_v38 = vpop.f32.mrf.mxu0  ;;  %4594 = vmax.xlane.f32.xlu0 %v4593_v32  ;;  %v4505_v29 = vpop.f32.mrf.mxu1 }
0x1209   :  { %v4588_v39 = vmul.f32 0.17677669, %v4505_v29  ;;  %v4599_v11 = vsel %vm692_vm2, %v4589_v28, -inf }
0x120a   :  { %4600 = vmax.xlane.f32.xlu1 %v4599_v11  ;;  %v10965_v41 = vpop.f32.mrf.mxu1 }
0x120b   :  { %v4596_v42 = vsel %vm692_vm2, %v4588_v39, -inf }
0x120c   :  { %4597 = vmax.xlane.f32.xlu0 %v4596_v42 }
0x128d   :  { %v4592_v44 = vpop.xlane.xlu0 %4591 }
0x128e   :  { %v4602_v46 = vmax.f32 %v4592_v44, %v4274_v63 }
0x1290   :  { %v4606_v48 = vsub.f32 %v4586_v6, %v4602_v46  ;;  %v4618_v21 = vsub.f32 %v4274_v63, %v4602_v46 }
0x1291   :  { %v4595_v50 = vpop.xlane.xlu0 %4594 }
0x1292   :  { %v4610_v57 = vmul.f32 1.442695, %v4606_v48  ;;  %v4603_v59 = vmax.f32 %v4595_v50, %v4275_v47 }
0x1293   :  { %v4601_v51 = vpop.xlane.xlu1 %4600 }
0x1294   :  { %11455 = vpow2.f32 %v4610_v57  ;;  %v4607_v5 = vsub.f32 %v4587_v35, %v4603_v59  ;;  %v4619_v52 = vsub.f32 %v4275_v47, %v4603_v59  ;;  %v4605_v12 = vmax.f32 %v4601_v51, %v4277_v4 }
0x1295   :  { %v4598_v53 = vpop.xlane.xlu0 %4597 }
0x1296   :  { %v4612_v13 = vmul.f32 1.442695, %v4607_v5  ;;  %v4609_v56 = vsub.f32 %v4589_v28, %v4605_v12  ;;  %v4621_v58 = vsub.f32 %v4277_v4, %v4605_v12  ;;  %v4604_v60 = vmax.f32 %v4598_v53, %v4276_v26 }
0x1297   :  { %v4622_v28 = vmul.f32 1.442695, %v4618_v21  ;;  %v4624_v32 = vmul.f32 1.442695, %v4619_v52  ;;  %v2648_v52 = vld [vmem:[%s13166_s10 + $0x18] sm:$0xff] }
0x1298   :  { %11457 = vpow2.f32 %v4612_v13  ;;  %v4616_v61 = vmul.f32 1.442695, %v4609_v56  ;;  %v4608_v62 = vsub.f32 %v4588_v39, %v4604_v60  ;;  %v4620_v1 = vsub.f32 %v4276_v26, %v4604_v60 }
0x1299   :  { %v4628_v38 = vmul.f32 1.442695, %v4621_v58 }
0x129a   :  { %11459 = vpow2.f32 %v4616_v61  ;;  %v4614_v3 = vmul.f32 1.442695, %v4608_v62  ;;  %v4626_v29 = vmul.f32 1.442695, %v4620_v1  ;;  %v2647_v62 = vld [vmem:[%s13166_s10 + $0x10] sm:$0xff] }
0x129c   :  { %11461 = vpow2.f32 %v4614_v3 }
0x129d   :  { %11463 = vpow2.f32 %v4622_v28 }
0x129e   :  { %11465 = vpow2.f32 %v4624_v32 }
0x129f   :  { %11467 = vpow2.f32 %v4628_v38 }
0x12a0   :  { %11469 = vpow2.f32 %v4626_v29 }
0x12a1   :  { %v11456_v0 = vpop.eup %11455 }
0x12a2   :  { %v4630_v6 = vsel %vm692_vm2, %v11456_v0, 0.0 }
0x12a3   :  { %4631 = vadd.xlane.f32.xlu0 %v4630_v6  ;;  %v2646_v6 = vld [vmem:[%s13166_s10 + $0x8] sm:$0xff] }
0x12a5   :  { %v11458_v8 = vpop.eup %11457 }
0x12a6   :  { %v4633_v10 = vsel %vm692_vm2, %v11458_v8, 0.0 }
0x12a7   :  { %v11460_v18 = vpop.eup %11459  ;;  %4634 = vadd.xlane.f32.xlu1 %v4633_v10 }
0x12a8   :  { %v4639_v36 = vsel %vm692_vm2, %v11460_v18, 0.0 }
0x12a9   :  { %v11462_v35 = vpop.eup %11461 }
0x12aa   :  { %v4636_v37 = vsel %vm692_vm2, %v11462_v35, 0.0  ;;  %v11464_v39 = vpop.eup %11463 }
0x12ab   :  { %4640 = vadd.xlane.f32.xlu1 %v4639_v36  ;;  %4637 = vadd.xlane.f32.xlu0 %v4636_v37  ;;  %v11466_v42 = vpop.eup %11465  ;;  %v2645_v36 = vld [vmem:[%s13166_s10] sm:$0xff] }
0x12ac   :  { %v11468_v43 = vpop.eup %11467 }
0x12ad   :  { %v11470_v44 = vpop.eup %11469 }
0x132c   :  { %v4632_v11 = vpop.xlane.xlu0 %4631 }
0x132d   :  { %v4642_v41 = vadd.f32 %v11464_v39, %v4632_v11 }
0x132f   :  { %11471 = vrcp.f32 %v4642_v41 }
0x1330   :  { %v4635_v14 = vpop.xlane.xlu1 %4634 }
0x1331   :  { %v4643_v31 = vadd.f32 %v11466_v42, %v4635_v14 }
0x1333   :  { %11473 = vrcp.f32 %v4643_v31 }
0x1334   :  { %v4641_v63 = vpop.xlane.xlu1 %4640  ;;  %v4638_v15 = vpop.xlane.xlu0 %4637 }
0x1335   :  { %v4645_v46 = vadd.f32 %v11468_v43, %v4641_v63  ;;  %v4644_v47 = vadd.f32 %v11470_v44, %v4638_v15 }
0x1337   :  { %11475 = vrcp.f32 %v4645_v46 }
0x1338   :  { %11477 = vrcp.f32 %v4644_v47  ;;  %v12469_v47 = vmul.f32 %v11840_v27, %v11840_v27 }
0x133c   :  { %v11472_v48 = vpop.eup %11471 }
0x133d   :  { %v4654_v21 = vmul.f32 %v11472_v48, %v11456_v0  ;;  %v4658_v50 = vmul.f32 %v11472_v48, %v11464_v39  ;;  %v5004_v48 = vld [vmem:[%s13166_s10 + $0x30] sm:$0xff] }
0x133f   :  { %10974 = vmatmul.mubr.msk.f32.vlgmr.msra.gmra.mxu1 %vm692_vm2, %v4654_v21  ;;  %v4662_v4 = vmul.f32 %v4658_v50, %v12010_v9  ;;  %v5003_v21 = vld [vmem:[%s13166_s10 + $0x28] sm:$0xff]  ;;  %v5002_v50 = vld [vmem:[%s13166_s10 + $0x20] sm:$0xff] }
0x1340   :  { %v11474_v57 = vpop.eup %11473  ;;  %10982 = vmatpush3.msra.mxu1 %v12381_v54  ;;  %10983 = vmatprep.mubr.msk.f32.mxu1 %vm11669_vm1, %v11668_v16 }
0x1341   :  { %v4655_v59 = vmul.f32 %v11474_v57, %v11458_v8  ;;  %v4666_v51 = vsel %vm3041_vm3, %v4662_v4, 0.0  ;;  %v4659_v5 = vmul.f32 %v11474_v57, %v11466_v42 }
0x1342   :  { %v4667_v12 = vrot.slane %v4666_v51, 4 }
0x1343   :  { %10979 = vmatmul.mubr.msk.f32.vlgmr.msra.gmra.mxu0 %vm692_vm2, %v4655_v59  ;;  %v4663_v26 = vmul.f32 %v4659_v5, %v12005_v7 }
0x1344   :  { %v11476_v53 = vpop.eup %11475  ;;  %10987 = vmatpush3.msra.mxu0 %v12375_v2  ;;  %10988 = vmatprep.mubr.msk.f32.mxu0 %vm11669_vm1, %v11668_v16  ;;  %v4668_v54 = vadd.f32 %v4667_v12, %v4666_v51 }
0x1345   :  { %v11478_v13 = vpop.eup %11477  ;;  %11005 = vmatprep.subr.mxu0 %v2648_v52  ;;  %v4657_v56 = vmul.f32 %v11476_v53, %v11460_v18  ;;  %v4673_v58 = vsel %vm3041_vm3, %v4663_v26, 0.0  ;;  %v4661_v60 = vmul.f32 %v11476_v53, %v11468_v43 }
0x1346   :  { %v4656_v61 = vmul.f32 %v11478_v13, %v11462_v35  ;;  %v4669_v1 = vrot.slane %v4668_v54, 2  ;;  %v4674_v3 = vrot.slane %v4673_v58, 4  ;;  %v4660_v0 = vmul.f32 %v11478_v13, %v11470_v44 }
0x1347   :  { %10989 = vmatmul.mubr.msk.f32.vlgmr.msra.gmra.mxu0 %vm692_vm2, %v4657_v56  ;;  %v4665_v2 = vmul.f32 %v4661_v60, %v12014_v17 }
0x1348   :  { %10984 = vmatmul.mubr.msk.f32.vlgmr.msra.gmra.mxu1 %vm692_vm2, %v4656_v61  ;;  %11006 = vmatpush3.msra.mxu0 %v2648_v52  ;;  %v4670_v8 = vadd.f32 %v4669_v1, %v4668_v54  ;;  %v4675_v10 = vadd.f32 %v4674_v3, %v4673_v58  ;;  %v4664_v18 = vmul.f32 %v4660_v0, %v12023_v34 }
0x1349   :  { %11007 = vmatprep.subr.mxu0 %v2647_v62  ;;  %11013 = vmatprep.mubr.msk.f32.mxu0 %vm77_vm0, %v12196_v40  ;;  %v4687_v35 = vsel %vm3041_vm3, %v4665_v2, 0.0 }
0x134a   :  { %11008 = vmatpush3.msra.mxu0 %v2647_v62  ;;  %v4671_v37 = vrot.slane %v4670_v8, 1  ;;  %v4676_v28 = vrot.slane %v4675_v10, 2  ;;  %v4680_v32 = vsel %vm3041_vm3, %v4664_v18, 0.0  ;;  %v4688_v38 = vrot.slane %v4687_v35, 4 }
0x134b   :  { %11009 = vmatprep.subr.mxu0 %v2646_v6  ;;  %v4681_v29 = vrot.slane %v4680_v32, 4 }
0x134c   :  { %11010 = vmatpush3.msra.mxu0 %v2646_v6  ;;  %v4672_v39 = vadd.f32 %v4671_v37, %v4670_v8  ;;  %v4677_v11 = vadd.f32 %v4676_v28, %v4675_v10  ;;  %v4689_v41 = vadd.f32 %v4688_v38, %v4687_v35 }
0x134d   :  { %11011 = vmatprep.subr.mxu0 %v2645_v36  ;;  %v4682_v40 = vadd.f32 %v4681_v29, %v4680_v32  ;;  %v11618_v29 = vld [vmem:[%s13159_s3 + $0x1] ss:$0 sm:$0xff] }
0x134e   :  { %11012 = vmatpush3.msra.mxu0 %v2645_v36  ;;  %4695 = vrot.lane.b32.xlu0 %v4672_v39, %s11670_s17  ;;  %v4678_v42 = vrot.slane %v4677_v11, 1  ;;  %v4690_v14 = vrot.slane %v4689_v41, 2 }
0x134f   :  { %11014 = vmatmul.mubr.msk.f32.vlgmr.msra.gmra.mxu0 %vm77_vm0, %v12198_v45  ;;  %v4683_v31 = vrot.slane %v4682_v40, 2  ;;  %11024 = vmatprep.subr.mxu0 %v11668_v16 }
0x1350   :  { %11016 = vmatprep.mubr.msk.f32.mxu0 %vm77_vm0, %v12207_v55  ;;  %v4679_v43 = vadd.f32 %v4678_v42, %v4677_v11  ;;  %v4691_v44 = vadd.f32 %v4690_v14, %v4689_v41 }
0x1351   :  { %v4684_v63 = vadd.f32 %v4683_v31, %v4682_v40 }
0x1352   :  { %4772 = vrot.lane.b32.xlu1 %v4679_v43, %s11670_s17  ;;  %5203 = vrot.lane.b32.xlu0 %v11830_v22, %s11671_s23  ;;  %v4692_v15 = vrot.slane %v4691_v44, 1 }
0x1353   :  { %11017 = vmatmul.mubr.msk.f32.gmra.mxu0 %vm77_vm0, %v12200_v49  ;;  %v4685_v46 = vrot.slane %v4684_v63, 1  ;;  %v5005_v49 = vld [vmem:[%s13166_s10 + $0x38] sm:$0xff] }
0x1354   :  { %11026 = vmatprep.mubr.msk.f32.mxu0 %vm11669_vm1, %v11668_v16  ;;  %v4693_v55 = vadd.f32 %v4692_v15, %v4691_v44  ;;  %10991 = vmatprep.subr.mxu1 %v5005_v49  ;;  %v11619_v15 = vld [vmem:[%s13159_s3] ss:$0 sm:$0xff] }
0x1355   :  { %v4686_v45 = vadd.f32 %v4685_v46, %v4684_v63  ;;  %10992 = vmatpush3.msra.mxu1 %v5005_v49 }
0x1356   :  { %5201 = vrot.lane.b32.xlu0 %v11840_v27, %s11671_s23  ;;  %10993 = vmatprep.subr.mxu1 %v5004_v48 }
0x1357   :  { %4849 = vrot.lane.b32.xlu1 %v4686_v45, %s11670_s17  ;;  %10994 = vmatpush3.msra.mxu1 %v5004_v48 }
0x1358   :  { %10995 = vmatprep.subr.mxu1 %v5003_v21 }
0x1359   :  { %10996 = vmatpush3.msra.mxu1 %v5003_v21 }
0x135a   :  { %5427 = vrot.lane.b32.xlu0 %v11832_v24, %s11671_s23  ;;  %10997 = vmatprep.subr.mxu1 %v5002_v50 }
0x135b   :  { %4926 = vrot.lane.b32.xlu1 %v4693_v55, %s11670_s17  ;;  %10998 = vmatpush3.msra.mxu1 %v5002_v50 }
0x135c   :  { %11019 = vmatprep.subr.mxu1 %v11668_v16 }
0x135f   :  { %5279 = vrot.lane.b32.xlu1 %v11844_v30, %s11671_s23 }
0x1363   :  { %5353 = vrot.lane.b32.xlu1 %v11862_v33, %s11671_s23 }
0x1367   :  { %5511 = vrot.lane.b32.xlu1 %v12469_v47, %s11671_s23 }
0x13c0   :  { %v4696_v4 = vpop.permute.xlu0 %4695 }
0x13c4   :  { %v4773_v57 = vpop.permute.xlu1 %4772  ;;  %v5204_v59 = vpop.permute.xlu0 %5203 }
0x13c8   :  { %v5202_v52 = vpop.permute.xlu0 %5201 }
0x13c9   :  { %v4850_v51 = vpop.permute.xlu1 %4849 }
0x13cc   :  { %v12485_v26 = vpop.permute.xlu0 %5427 }
0x13cd   :  { %v4927_v5 = vpop.permute.xlu1 %4926 }
0x13d1   :  { %v5280_v12 = vpop.permute.xlu1 %5279 }
0x13d2   :  { %11025 = vmatpush3.xpose.msk.msra.mxu0 %vm77_vm0, %v5280_v12 }
0x13d3   :  { %11034 = vmatprep.subr.mxu0 %v11668_v16 }
0x13d5   :  { %v12487_v53 = vpop.permute.xlu1 %5353  ;;  %11027 = vmatmul.mubr.msk.f32.vlgmr.msra.gmra.mxu0 %vm77_vm0, %v5202_v52 }
0x13d6   :  { %11035 = vmatpush3.xpose.msk.msra.mxu0 %vm77_vm0, %v12485_v26  ;;  %11036 = vmatprep.mubr.msk.f32.mxu0 %vm11669_vm1, %v11668_v16 }
0x13d7   :  { %11044 = vmatprep.subr.mxu0 %v11668_v16 }
0x13d9   :  { %v5512_v54 = vpop.permute.xlu1 %5511  ;;  %11037 = vmatmul.mubr.msk.f32.vlgmr.msra.gmra.mxu0 %vm77_vm0, %v5202_v52 }
0x13da   :  { %11045 = vmatpush3.msra.mxu0 %v5280_v12  ;;  %v5514_v13 = vsel %vm77_vm0, %v5512_v54, 0.0  ;;  %11046 = vmatprep.mubr.msk.f32.mxu0 %vm11669_vm1, %v11668_v16 }
0x13db   :  { %5515 = vadd.xlane.f32.xlu0 %v5514_v13  ;;  %11054 = vmatprep.subr.mxu0 %v11668_v16 }
0x13ff   :  { %v4767_v56 = vpop.f32.mrf.mxu1 }
0x1400   :  { %v4768_v58 = vadd.f32 %v4767_v56, %v4696_v4 }
0x1401   :  { %v10975_v60 = vpop.f32.mrf.mxu1 }
0x1402   :  { %10999 = vmatprep.mubr.msk.f32.mxu1 %vm77_vm0, %v4768_v58 }
0x1403   :  { %v4844_v61 = vpop.f32.mrf.mxu0 }
0x1404   :  { %v4845_v62 = vadd.f32 %v4844_v61, %v4773_v57  ;;  %v11620_v57 = vld [vmem:[%s13159_s3 + $0x2] ss:$0 sm:$0xff] }
0x1405   :  { %v10980_v1 = vpop.f32.mrf.mxu0 }
0x1406   :  { %11000 = vmatmul.mubr.msk.f32.vlgmr.msra.gmra.mxu1 %vm77_vm0, %v4845_v62 }
0x1407   :  { %11020 = vmatpush3.xpose.msk.msra.mxu1 %vm77_vm0, %v5204_v59  ;;  %v4998_v3 = vpop.f32.mrf.mxu0 }
0x1408   :  { %v4921_v0 = vpop.f32.mrf.mxu1  ;;  %v4999_v2 = vadd.f32 %v4998_v3, %v4927_v5  ;;  %11029 = vmatprep.subr.mxu1 %v11668_v16 }
0x1409   :  { %v4922_v6 = vadd.f32 %v4921_v0, %v4850_v51  ;;  %v10990_v8 = vpop.f32.mrf.mxu0  ;;  %v11621_v51 = vld [vmem:[%s13159_s3 + $0x3] ss:$0 sm:$0xff] }
0x140a   :  { %v10985_v10 = vpop.f32.mrf.mxu1 }
0x140b   :  { %11002 = vmatprep.mubr.msk.f32.mxu1 %vm77_vm0, %v4922_v6 }
0x140c   :  { %11003 = vmatmul.mubr.msk.f32.gmra.mxu1 %vm77_vm0, %v4999_v2 }
0x140d   :  { %11021 = vmatprep.mubr.msk.f32.mxu1 %vm11669_vm1, %v11668_v16 }
0x140f   :  { %v12518_v18 = vpop.f32.mrf.mxu0 }
0x1410   :  { %11022 = vmatmul.mubr.msk.f32.vlgmr.msra.gmra.mxu1 %vm77_vm0, %v5202_v52 }
0x1411   :  { %11030 = vmatpush3.xpose.msk.msra.mxu1 %vm77_vm0, %v12487_v53  ;;  %11031 = vmatprep.mubr.msk.f32.mxu1 %vm11669_vm1, %v11668_v16  ;;  %v12520_v35 = vpop.f32.mrf.mxu0 }
0x1412   :  { %11039 = vmatprep.subr.mxu1 %v11668_v16 }
0x1413   :  { %v12522_v36 = vpop.f32.mrf.mxu0 }
0x1414   :  { %11032 = vmatmul.mubr.msk.f32.vlgmr.msra.gmra.mxu1 %vm77_vm0, %v5202_v52 }
0x1415   :  { %11040 = vmatpush3.msra.mxu1 %v5204_v59  ;;  %11041 = vmatprep.mubr.msk.f32.mxu1 %vm11669_vm1, %v11668_v16  ;;  %v5191_v37 = vpop.f32.mrf.mxu0 }
0x1416   :  { %11049 = vmatprep.subr.mxu1 %v11668_v16 }
0x1464   :  { %v5516_v54 = vpop.xlane.xlu0 %5515 }
0x1465   :  { %v5517_v13 = vmul.f32 0.17677669, %v5516_v54 }
0x1495   :  { %v5349_v28 = vpop.f32.mrf.mxu0 }
0x1496   :  { %v5502_v32 = vmul.f32 0.17677669, %v5349_v28 }
0x1497   :  { %v11028_v38 = vpop.f32.mrf.mxu0 }
0x1498   :  { %v5506_v39 = vadd.f32 %v11618_v29, %v5502_v32 }
0x1499   :  { %v5497_v11 = vpop.f32.mrf.mxu0 }
0x149a   :  { %v5521_v41 = vsel %vm692_vm2, %v5506_v39, -inf  ;;  %v5504_v48 = vmul.f32 0.17677669, %v5497_v11 }
0x149b   :  { %5522 = vmax.xlane.f32.xlu0 %v5521_v41  ;;  %v11038_v40 = vpop.f32.mrf.mxu0 }
0x149c   :  { %v5508_v5 = vadd.f32 %v11621_v51, %v5504_v48 }
0x149e   :  { %v5527_v12 = vsel %vm692_vm2, %v5508_v5, -inf }
0x14c6   :  { %v12528_v42 = vpop.f32.mrf.mxu1 }
0x14c8   :  { %v12530_v14 = vpop.f32.mrf.mxu1 }
0x14cc   :  { %v12532_v31 = vpop.f32.mrf.mxu1 }
0x14ce   :  { %v5094_v43 = vpop.f32.mrf.mxu1 }
0x14cf   :  { %v12534_v63 = vadd.f32 %v5191_v37, %v5094_v43 }
0x14d0   :  { %v5275_v44 = vpop.f32.mrf.mxu1 }
0x14d1   :  { %v5501_v46 = vmul.f32 0.17677669, %v5275_v44 }
0x14d2   :  { %v11023_v45 = vpop.f32.mrf.mxu1 }
0x14d3   :  { %v5505_v55 = vadd.f32 %v11619_v15, %v5501_v46  ;;  %v11622_v45 = vld [vmem:[%s13162_s6 + $0x18] sm:$0xff]  ;;  %v11623_v15 = vld [vmem:[%s13162_s6 + $0x8] sm:$0xff] }
0x14d4   :  { %v5423_v49 = vpop.f32.mrf.mxu1 }
0x14d5   :  { %v5503_v21 = vmul.f32 0.17677669, %v5423_v49  ;;  %v5518_v50 = vsel %vm692_vm2, %v5505_v55, -inf  ;;  %v11625_v49 = vld [vmem:[%s13162_s6] sm:$0xff] }
0x14d6   :  { %5519 = vmax.xlane.f32.xlu1 %v5518_v50  ;;  %v11033_v4 = vpop.f32.mrf.mxu1 }
0x14d7   :  { %v5507_v59 = vadd.f32 %v11620_v57, %v5503_v21 }
0x14d9   :  { %v5524_v52 = vsel %vm692_vm2, %v5507_v59, -inf }
0x14da   :  { %5525 = vmax.xlane.f32.xlu0 %v5524_v52 }
0x14de   :  { %5528 = vmax.xlane.f32.xlu0 %v5527_v12 }
0x1524   :  { %v5523_v56 = vpop.xlane.xlu0 %5522 }
0x1525   :  { %v5531_v58 = vmax.f32 %v5523_v56, %v5517_v13 }
0x1527   :  { %v5535_v60 = vsub.f32 %v5506_v39, %v5531_v58  ;;  %v5547_v48 = vsub.f32 %v5517_v13, %v5531_v58 }
0x1529   :  { %v5540_v61 = vmul.f32 1.442695, %v5535_v60  ;;  %v5552_v21 = vmul.f32 1.442695, %v5547_v48 }
0x152b   :  { %11479 = vpow2.f32 %v5540_v61 }
0x1538   :  { %v11480_v62 = vpop.eup %11479 }
0x1539   :  { %v5561_v1 = vsel %vm692_vm2, %v11480_v62, 0.0 }
0x153a   :  { %5562 = vadd.xlane.f32.xlu0 %v5561_v1 }
0x155f   :  { %v5520_v3 = vpop.xlane.xlu1 %5519 }
0x1560   :  { %v5530_v0 = vmax.f32 %v5520_v3, %v5517_v13 }
0x1562   :  { %v5534_v2 = vsub.f32 %v5505_v55, %v5530_v0  ;;  %v11624_v55 = vld [vmem:[%s13162_s6 + $0x10] sm:$0xff]  ;;  %v5546_v52 = vsub.f32 %v5517_v13, %v5530_v0 }
0x1563   :  { %v5526_v6 = vpop.xlane.xlu0 %5525 }
0x1564   :  { %v5538_v8 = vmul.f32 1.442695, %v5534_v2  ;;  %v5532_v10 = vmax.f32 %v5526_v6, %v5517_v13  ;;  %v5550_v12 = vmul.f32 1.442695, %v5546_v52 }
0x1566   :  { %11481 = vpow2.f32 %v5538_v8  ;;  %v5536_v37 = vsub.f32 %v5507_v59, %v5532_v10  ;;  %v5548_v54 = vsub.f32 %v5517_v13, %v5532_v10 }
0x1567   :  { %v5529_v28 = vpop.xlane.xlu0 %5528 }
0x1568   :  { %v5542_v32 = vmul.f32 1.442695, %v5536_v37  ;;  %v5533_v38 = vmax.f32 %v5529_v28, %v5517_v13  ;;  %v5554_v56 = vmul.f32 1.442695, %v5548_v54 }
0x156a   :  { %11483 = vpow2.f32 %v5542_v32  ;;  %v5537_v29 = vsub.f32 %v5508_v5, %v5533_v38  ;;  %v5549_v58 = vsub.f32 %v5517_v13, %v5533_v38 }
0x156c   :  { %v5544_v39 = vmul.f32 1.442695, %v5537_v29  ;;  %v5556_v60 = vmul.f32 1.442695, %v5549_v58 }
0x156e   :  { %11485 = vpow2.f32 %v5544_v39 }
0x156f   :  { %11487 = vpow2.f32 %v5552_v21 }
0x1573   :  { %v11482_v11 = vpop.eup %11481 }
0x1574   :  { %v5558_v41 = vsel %vm692_vm2, %v11482_v11, 0.0 }
0x1575   :  { %5559 = vadd.xlane.f32.xlu1 %v5558_v41 }
0x1577   :  { %v12550_v40 = vpop.eup %11483 }
0x1578   :  { %v5564_v43 = vsel %vm692_vm2, %v12550_v40, 0.0 }
0x1579   :  { %5565 = vadd.xlane.f32.xlu1 %v5564_v43 }
0x157b   :  { %v12554_v44 = vpop.eup %11485 }
0x157c   :  { %v5567_v46 = vsel %vm692_vm2, %v12554_v44, 0.0  ;;  %v11488_v50 = vpop.eup %11487 }
0x157d   :  { %5568 = vadd.xlane.f32.xlu0 %v5567_v46 }
0x158a   :  { %5941 = vrot.lane.b32.xlu1 %v11622_v45, %s11671_s23 }
0x158e   :  { %5937 = vrot.lane.b32.xlu1 %v11623_v15, %s11671_s23 }
0x1593   :  { %5939 = vrot.lane.b32.xlu0 %v11624_v55, %s11671_s23 }
0x1597   :  { %5935 = vrot.lane.b32.xlu0 %v11625_v49, %s11671_s23 }
0x15c3   :  { %v5563_v4 = vpop.xlane.xlu0 %5562 }
0x15c4   :  { %v5571_v57 = vadd.f32 %v11488_v50, %v5563_v4 }
0x15c6   :  { %11489 = vrcp.f32 %v5571_v57 }
0x15c7   :  { %11491 = vpow2.f32 %v5550_v12 }
0x15c8   :  { %11493 = vpow2.f32 %v5554_v56 }
0x15c9   :  { %11495 = vpow2.f32 %v5556_v60 }
0x15d3   :  { %v11490_v59 = vpop.eup %11489 }
0x15d4   :  { %v5587_v51 = vmul.f32 %v11490_v59, %v11488_v50  ;;  %v5583_v5 = vmul.f32 %v11490_v59, %v11480_v62  ;;  %v11492_v61 = vpop.eup %11491 }
0x15d5   :  { %v11494_v3 = vpop.eup %11493 }
0x15d6   :  { %11047 = vmatmul.mubr.msk.f32.vlgmr.msra.gmra.mxu0 %vm692_vm2, %v5583_v5  ;;  %v11496_v6 = vpop.eup %11495  ;;  %v5591_v0 = vmul.f32 %v5587_v51, %v11840_v27 }
0x15d7   :  { %11055 = vmatpush3.msra.mxu0 %v12485_v26  ;;  %11056 = vmatprep.mubr.msk.f32.mxu0 %vm11669_vm1, %v11668_v16 }
0x15d8   :  { %11073 = vmatprep.subr.mxu0 %v11668_v16  ;;  %v5602_v13 = vsel %vm5594_vm4, %v5591_v0, 0.0 }
0x15d9   :  { %v5603_v28 = vrot.slane %v5602_v13, 4 }
0x15db   :  { %v5604_v41 = vadd.f32 %v5603_v28, %v5602_v13  ;;  %v11626_v28 = vld [vmem:[%s13163_s7] ss:$0 sm:$0xff] }
0x15fe   :  { %v5560_v62 = vpop.xlane.xlu1 %5559 }
0x15ff   :  { %v5570_v1 = vadd.f32 %v11492_v61, %v5560_v62 }
0x1601   :  { %11497 = vrcp.f32 %v5570_v1 }
0x1602   :  { %v5566_v26 = vpop.xlane.xlu1 %5565 }
0x1603   :  { %v5572_v2 = vadd.f32 %v11494_v3, %v5566_v26 }
0x1605   :  { %11499 = vrcp.f32 %v5572_v2 }
0x1606   :  { %v5569_v8 = vpop.xlane.xlu0 %5568  ;;  %v5942_v43 = vpop.permute.xlu1 %5941 }
0x1607   :  { %v5573_v37 = vadd.f32 %v11496_v6, %v5569_v8 }
0x1609   :  { %11501 = vrcp.f32 %v5573_v37 }
0x160a   :  { %v5938_v51 = vpop.permute.xlu1 %5937 }
0x160e   :  { %v11498_v10 = vpop.eup %11497 }
0x160f   :  { %v5586_v32 = vmul.f32 %v11498_v10, %v11492_v61  ;;  %v5582_v38 = vmul.f32 %v11498_v10, %v11482_v11  ;;  %v5940_v11 = vpop.permute.xlu0 %5939 }
0x1611   :  { %11042 = vmatmul.mubr.msk.f32.vlgmr.msra.gmra.mxu1 %vm692_vm2, %v5582_v38  ;;  %v5590_v29 = vmul.f32 %v5586_v32, %v11840_v27 }
0x1612   :  { %v11500_v39 = vpop.eup %11499  ;;  %11050 = vmatpush3.msra.mxu1 %v12487_v53  ;;  %11051 = vmatprep.mubr.msk.f32.mxu1 %vm11669_vm1, %v11668_v16  ;;  %v5605_v53 = vrot.slane %v5604_v41, 2 }
0x1613   :  { %v5588_v46 = vmul.f32 %v11500_v39, %v11494_v3  ;;  %v5584_v45 = vmul.f32 %v11500_v39, %v12550_v40  ;;  %v5595_v15 = vsel %vm5594_vm4, %v5590_v29, 0.0  ;;  %11059 = vmatprep.subr.mxu1 %v5942_v43  ;;  %v5936_v56 = vpop.permute.xlu0 %5935 }
0x1614   :  { %v5596_v55 = vrot.slane %v5595_v15, 4  ;;  %v5606_v12 = vadd.f32 %v5605_v53, %v5604_v41 }
0x1615   :  { %11052 = vmatmul.mubr.msk.f32.vlgmr.msra.gmra.mxu1 %vm692_vm2, %v5584_v45  ;;  %v5592_v49 = vmul.f32 %v5588_v46, %v11840_v27 }
0x1616   :  { %v11502_v48 = vpop.eup %11501  ;;  %v5597_v21 = vadd.f32 %v5596_v55, %v5595_v15  ;;  %11060 = vmatpush3.msra.mxu1 %v5942_v43  ;;  %v5607_v1 = vrot.slane %v5606_v12, 1 }
0x1617   :  { %v5589_v50 = vmul.f32 %v11502_v48, %v11496_v6  ;;  %v5585_v4 = vmul.f32 %v11502_v48, %v12554_v44  ;;  %v5609_v57 = vsel %vm5594_vm4, %v5592_v49, 0.0  ;;  %11061 = vmatprep.subr.mxu1 %v5940_v11 }
0x1618   :  { %v5598_v40 = vrot.slane %v5597_v21, 2  ;;  %v5610_v59 = vrot.slane %v5609_v57, 4  ;;  %11062 = vmatpush3.msra.mxu1 %v5940_v11  ;;  %v5608_v6 = vadd.f32 %v5607_v1, %v5606_v12 }
0x1619   :  { %11057 = vmatmul.mubr.msk.f32.vlgmr.msra.gmra.mxu0 %vm692_vm2, %v5585_v4  ;;  %v5593_v5 = vmul.f32 %v5589_v50, %v11840_v27  ;;  %11063 = vmatprep.subr.mxu1 %v5938_v51 }
0x161a   :  { %v5599_v52 = vadd.f32 %v5598_v40, %v5597_v21  ;;  %v5611_v54 = vadd.f32 %v5610_v59, %v5609_v57  ;;  %11064 = vmatpush3.msra.mxu1 %v5938_v51  ;;  %11075 = vmatprep.mubr.msk.f32.mxu0 %vm11669_vm1, %v11668_v16 }
0x161b   :  { %v5616_v44 = vsel %vm5594_vm4, %v5593_v5, 0.0  ;;  %11065 = vmatprep.subr.mxu1 %v5936_v56 }
0x161c   :  { %v5600_v58 = vrot.slane %v5599_v52, 1  ;;  %v5612_v60 = vrot.slane %v5611_v54, 2  ;;  %v5617_v61 = vrot.slane %v5616_v44, 4  ;;  %11066 = vmatpush3.msra.mxu1 %v5936_v56 }
0x161d   :  { %11088 = vmatprep.subr.mxu1 %v11668_v16 }
0x161e   :  { %v5601_v62 = vadd.f32 %v5600_v58, %v5599_v52  ;;  %v5613_v3 = vadd.f32 %v5612_v60, %v5611_v54  ;;  %v5618_v26 = vadd.f32 %v5617_v61, %v5616_v44 }
0x1620   :  { %5625 = vrot.lane.b32.xlu1 %v5601_v62, %s11671_s23  ;;  %v5619_v2 = vrot.slane %v5618_v26, 2  ;;  %v5614_v8 = vrot.slane %v5613_v3, 1 }
0x1622   :  { %v5620_v37 = vadd.f32 %v5619_v2, %v5618_v26  ;;  %v5615_v13 = vadd.f32 %v5614_v8, %v5613_v3 }
0x1624   :  { %5703 = vrot.lane.b32.xlu1 %v5608_v6, %s11671_s23  ;;  %v5621_v0 = vrot.slane %v5620_v37, 1 }
0x1626   :  { %v5622_v10 = vadd.f32 %v5621_v0, %v5620_v37 }
0x1628   :  { %5781 = vrot.lane.b32.xlu1 %v5615_v13, %s11671_s23  ;;  %5859 = vrot.lane.b32.xlu0 %v5622_v10, %s11671_s23 }
0x162c   :  { %5947 = vrot.lane.b32.xlu1 %v11626_v28, %s11671_s23 }
0x1692   :  { %v5626_v29 = vpop.permute.xlu1 %5625 }
0x1696   :  { %v5775_v32 = vpop.f32.mrf.mxu0  ;;  %v5704_v39 = vpop.permute.xlu1 %5703 }
0x1697   :  { %v5776_v46 = vadd.f32 %v5775_v32, %v5704_v39 }
0x1698   :  { %v11048_v38 = vpop.f32.mrf.mxu0 }
0x169a   :  { %v5782_v15 = vpop.permute.xlu1 %5781  ;;  %v5860_v48 = vpop.permute.xlu0 %5859 }
0x169e   :  { %v5948_v57 = vpop.permute.xlu1 %5947 }
0x16d1   :  { %v5697_v41 = vpop.f32.mrf.mxu1 }
0x16d2   :  { %v5698_v43 = vadd.f32 %v5697_v41, %v5626_v29 }
0x16d3   :  { %v11043_v45 = vpop.f32.mrf.mxu1 }
0x16d4   :  { %11067 = vmatprep.mubr.msk.f32.mxu1 %vm77_vm0, %v5698_v43 }
0x16d5   :  { %v5853_v55 = vpop.f32.mrf.mxu1  ;;  %11068 = vmatmul.mubr.msk.f32.vlgmr.msra.gmra.mxu1 %vm77_vm0, %v5776_v46 }
0x16d6   :  { %v5854_v11 = vadd.f32 %v5853_v55, %v5782_v15 }
0x16d7   :  { %v11053_v49 = vpop.f32.mrf.mxu1 }
0x16d8   :  { %11070 = vmatprep.mubr.msk.f32.mxu1 %vm77_vm0, %v5854_v11 }
0x16d9   :  { %v5931_v21 = vpop.f32.mrf.mxu0 }
0x16da   :  { %v5932_v53 = vadd.f32 %v5931_v21, %v5860_v48 }
0x16db   :  { %v11058_v50 = vpop.f32.mrf.mxu0 }
0x16dc   :  { %11071 = vmatmul.mubr.msk.f32.gmra.mxu1 %vm77_vm0, %v5932_v53 }
0x16dd   :  { %11090 = vmatprep.mubr.msk.f32.mxu1 %vm11669_vm1, %v11668_v16 }
0x1795   :  { %v11069_v4 = vpop.f32.mrf.mxu1 }
0x1796   :  { %v6034_v51 = vadd.f32 %v11069_v4, %v5948_v57 }
0x1797   :  { %v6028_v40 = vpop.f32.mrf.mxu1 }
0x1798   :  { %v6029_v59 = vadd.f32 %v6028_v40, %v5948_v57 }
0x179a   :  { %11074 = vmatpush3.xpose.msk.msra.mxu0 %vm77_vm0, %v6029_v59 }
0x179b   :  { %11078 = vmatprep.subr.mxu0 %v11668_v16 }
0x179c   :  { %v11072_v5 = vpop.f32.mrf.mxu1 }
0x179d   :  { %v12614_v52 = vadd.f32 %v11072_v5, %v5948_v57  ;;  %11076 = vmatmul.mubr.msk.f32.vlgmr.msra.gmra.mxu0 %vm77_vm0, %v6029_v59  ;;  %v11629_v5 = vld [vmem:[%s13164_s8 + $0x8] sm:$0xff] }
0x179e   :  { %v6038_v12 = vpop.f32.mrf.mxu1  ;;  %11079 = vmatpush3.xpose.msk.msra.mxu0 %vm77_vm0, %v6034_v51  ;;  %11080 = vmatprep.mubr.msk.f32.mxu0 %vm11669_vm1, %v11668_v16 }
0x179f   :  { %v12620_v54 = vadd.f32 %v6038_v12, %v5948_v57  ;;  %11089 = vmatpush3.xpose.msk.msra.mxu1 %vm77_vm0, %v12614_v52  ;;  %11083 = vmatprep.subr.mxu0 %v11668_v16  ;;  %v11630_v12 = vld [vmem:[%s13165_s9] ss:$0 sm:$0xff] }
0x17a0   :  { %11098 = vmatprep.subr.mxu1 %v11668_v16 }
0x17a1   :  { %11081 = vmatmul.mubr.msk.f32.vlgmr.msra.gmra.mxu0 %vm77_vm0, %v6034_v51 }
0x17a2   :  { %11084 = vmatpush3.xpose.msk.msra.mxu0 %vm77_vm0, %v12620_v54  ;;  %11091 = vmatmul.mubr.msk.f32.vlgmr.msra.gmra.mxu1 %vm77_vm0, %v12614_v52 }
0x17a3   :  { %11099 = vmatpush3.msra.mxu1 %v6034_v51  ;;  %11085 = vmatprep.mubr.msk.f32.mxu0 %vm11669_vm1, %v11668_v16  ;;  %v11628_v51 = vld [vmem:[%s13164_s8 + $0x18] sm:$0xff] }
0x17a4   :  { %11093 = vmatprep.subr.mxu0 %v11668_v16  ;;  %11100 = vmatprep.mubr.msk.f32.mxu1 %vm11669_vm1, %v11668_v16 }
0x17a5   :  { %11086 = vmatmul.mubr.msk.f32.vlgmr.msra.gmra.mxu0 %vm77_vm0, %v12620_v54  ;;  %11108 = vmatprep.subr.mxu1 %v11668_v16 }
0x17a6   :  { %11094 = vmatpush3.msra.mxu0 %v6029_v59  ;;  %11095 = vmatprep.mubr.msk.f32.mxu0 %vm11669_vm1, %v11668_v16  ;;  %v11627_v59 = vld [vmem:[%s13164_s8 + $0x10] sm:$0xff] }
0x17a7   :  { %11103 = vmatprep.subr.mxu0 %v11668_v16 }
0x185d   :  { %v6116_v56 = vpop.f32.mrf.mxu0 }
0x185e   :  { %v6339_v44 = vmul.f32 0.17677669, %v6116_v56  ;;  %v11631_v56 = vld [vmem:[%s13164_s8] sm:$0xff] }
0x185f   :  { %v11077_v58 = vpop.f32.mrf.mxu0 }
0x1860   :  { %v6343_v60 = vsel %vm692_vm2, %v6339_v44, -inf }
0x1861   :  { %6344 = vmax.xlane.f32.xlu0 %v6343_v60  ;;  %v6189_v61 = vpop.f32.mrf.mxu0 }
0x1862   :  { %v6340_v62 = vmul.f32 0.17677669, %v6189_v61  ;;  %v6335_v1 = vpop.f32.mrf.mxu1 }
0x1863   :  { %v11082_v3 = vpop.f32.mrf.mxu0  ;;  %v6342_v0 = vmul.f32 0.17677669, %v6335_v1 }
0x1864   :  { %v11092_v26 = vpop.f32.mrf.mxu1  ;;  %v6346_v2 = vsel %vm692_vm2, %v6340_v62, -inf }
0x1865   :  { %6347 = vmax.xlane.f32.xlu1 %v6346_v2  ;;  %v6262_v6 = vpop.f32.mrf.mxu0  ;;  %v6352_v10 = vsel %vm692_vm2, %v6342_v0, -inf }
0x1866   :  { %v6341_v8 = vmul.f32 0.17677669, %v6262_v6 }
0x1867   :  { %v11087_v37 = vpop.f32.mrf.mxu0 }
0x1868   :  { %v6349_v13 = vsel %vm692_vm2, %v6341_v8, -inf }
0x1869   :  { %6350 = vmax.xlane.f32.xlu0 %v6349_v13 }
0x186d   :  { %6353 = vmax.xlane.f32.xlu0 %v6352_v10 }
0x18ea   :  { %v6345_v28 = vpop.xlane.xlu0 %6344 }
0x18eb   :  { %v6355_v32 = vsub.f32 %v6339_v44, %v6345_v28 }
0x18ed   :  { %v6359_v38 = vmul.f32 1.442695, %v6355_v32 }
0x18ee   :  { %v6348_v29 = vpop.xlane.xlu1 %6347 }
0x18ef   :  { %11503 = vpow2.f32 %v6359_v38  ;;  %v6356_v39 = vsub.f32 %v6340_v62, %v6348_v29 }
0x18f1   :  { %v6361_v41 = vmul.f32 1.442695, %v6356_v39 }
0x18f2   :  { %v6351_v43 = vpop.xlane.xlu0 %6350 }
0x18f3   :  { %11505 = vpow2.f32 %v6361_v41  ;;  %v6357_v46 = vsub.f32 %v6341_v8, %v6351_v43 }
0x18f5   :  { %v6363_v45 = vmul.f32 1.442695, %v6357_v46 }
0x18f6   :  { %v6354_v15 = vpop.xlane.xlu0 %6353 }
0x18f7   :  { %11507 = vpow2.f32 %v6363_v45  ;;  %v6358_v55 = vsub.f32 %v6342_v0, %v6354_v15 }
0x18f9   :  { %v6365_v11 = vmul.f32 1.442695, %v6358_v55 }
0x18fb   :  { %11509 = vpow2.f32 %v6365_v11 }
0x18fc   :  { %v11504_v49 = vpop.eup %11503 }
0x18fd   :  { %v6367_v48 = vsel %vm692_vm2, %v11504_v49, 0.0 }
0x18fe   :  { %6368 = vadd.xlane.f32.xlu0 %v6367_v48 }
0x1900   :  { %v11506_v21 = vpop.eup %11505 }
0x1901   :  { %v6370_v53 = vsel %vm692_vm2, %v11506_v21, 0.0 }
0x1902   :  { %6371 = vadd.xlane.f32.xlu1 %v6370_v53 }
0x1904   :  { %v11508_v50 = vpop.eup %11507 }
0x1905   :  { %v6373_v4 = vsel %vm692_vm2, %v11508_v50, 0.0 }
0x1906   :  { %6374 = vadd.xlane.f32.xlu0 %v6373_v4 }
0x1908   :  { %v11510_v57 = vpop.eup %11509 }
0x1909   :  { %v6376_v40 = vsel %vm692_vm2, %v11510_v57, 0.0 }
0x190a   :  { %6377 = vadd.xlane.f32.xlu1 %v6376_v40 }
0x191b   :  { %6683 = vrot.lane.b32.xlu1 %v11627_v59, %s11671_s23 }
0x191c   :  { %6685 = vrot.lane.b32.xlu0 %v11628_v51, %s11671_s23 }
0x191f   :  { %6681 = vrot.lane.b32.xlu1 %v11629_v5, %s11671_s23 }
0x1920   :  { %6691 = vrot.lane.b32.xlu0 %v11630_v12, %s11671_s23 }
0x1923   :  { %6679 = vrot.lane.b32.xlu1 %v11631_v56, %s11671_s23 }
0x1924   :  { %6896 = vrot.lane.b32.xlu0 %v12005_v7, %s11671_s23 }
0x1927   :  { %6819 = vrot.lane.b32.xlu1 %v12010_v9, %s11671_s23 }
0x1928   :  { %7050 = vrot.lane.b32.xlu0 %v12014_v17, %s11671_s23 }
0x192b   :  { %6973 = vrot.lane.b32.xlu1 %v12023_v34, %s11671_s23 }
0x192c   :  { %6793 = vrot.lane.b32.xlu0 %v12019_v19, %s11671_s23 }
0x192f   :  { %6791 = vrot.lane.b32.xlu1 %v12028_v20, %s11671_s23 }
0x1930   :  { %6797 = vrot.lane.b32.xlu0 %v12034_v23, %s11671_s23 }
0x1933   :  { %6795 = vrot.lane.b32.xlu1 %v12040_v25, %s11671_s23 }
0x1987   :  { %v6369_v44 = vpop.xlane.xlu0 %6368 }
0x1988   :  { %11511 = vrcp.f32 %v6369_v44 }
0x198b   :  { %v6372_v58 = vpop.xlane.xlu1 %6371 }
0x198c   :  { %11513 = vrcp.f32 %v6372_v58 }
0x198f   :  { %v6375_v60 = vpop.xlane.xlu0 %6374 }
0x1990   :  { %11515 = vrcp.f32 %v6375_v60 }
0x1993   :  { %v6378_v61 = vpop.xlane.xlu1 %6377  ;;  %v6686_v62 = vpop.permute.xlu0 %6685 }
0x1994   :  { %11517 = vrcp.f32 %v6378_v61 }
0x1995   :  { %v11512_v1 = vpop.eup %11511 }
0x1996   :  { %v6380_v3 = vmul.f32 %v11512_v1, %v11504_v49 }
0x1997   :  { %v6684_v26 = vpop.permute.xlu1 %6683  ;;  %v12686_v2 = vpop.permute.xlu0 %6691 }
0x1998   :  { %11096 = vmatmul.mubr.msk.f32.vlgmr.msra.gmra.mxu0 %vm692_vm2, %v6380_v3 }
0x1999   :  { %v11514_v6 = vpop.eup %11513  ;;  %11104 = vmatpush3.msra.mxu0 %v12620_v54  ;;  %11105 = vmatprep.mubr.msk.f32.mxu0 %vm11669_vm1, %v11668_v16 }
0x199a   :  { %v6382_v8 = vmul.f32 %v11514_v6, %v11506_v21  ;;  %11113 = vmatprep.subr.mxu0 %v6686_v62 }
0x199b   :  { %v6682_v37 = vpop.permute.xlu1 %6681  ;;  %v12692_v0 = vpop.permute.xlu0 %6896 }
0x199c   :  { %11101 = vmatmul.mubr.msk.f32.vlgmr.msra.gmra.mxu1 %vm692_vm2, %v6382_v8 }
0x199d   :  { %v11516_v13 = vpop.eup %11515  ;;  %11109 = vmatpush3.msra.mxu1 %v12614_v52  ;;  %11110 = vmatprep.mubr.msk.f32.mxu1 %vm11669_vm1, %v11668_v16 }
0x199e   :  { %v6384_v10 = vmul.f32 %v11516_v13, %v11508_v50  ;;  %11127 = vmatprep.subr.mxu1 %v11668_v16 }
0x199f   :  { %v6680_v54 = vpop.permute.xlu1 %6679  ;;  %v7051_v28 = vpop.permute.xlu0 %7050 }
0x19a0   :  { %11106 = vmatmul.mubr.msk.f32.vlgmr.msra.gmra.mxu0 %vm692_vm2, %v6384_v10 }
0x19a1   :  { %v11518_v32 = vpop.eup %11517  ;;  %11114 = vmatpush3.msra.mxu0 %v6686_v62 }
0x19a2   :  { %v6386_v38 = vmul.f32 %v11518_v32, %v11510_v57  ;;  %11115 = vmatprep.subr.mxu0 %v6684_v26 }
0x19a3   :  { %v6820_v29 = vpop.permute.xlu1 %6819  ;;  %v6794_v39 = vpop.permute.xlu0 %6793  ;;  %11116 = vmatpush3.msra.mxu0 %v6684_v26 }
0x19a4   :  { %v6806_v41 = vsel %vm77_vm0, %v6794_v39, 0.0  ;;  %11111 = vmatmul.mubr.msk.f32.vlgmr.msra.gmra.mxu1 %vm692_vm2, %v6386_v38  ;;  %11117 = vmatprep.subr.mxu0 %v6682_v37 }
0x19a5   :  { %6807 = vadd.xlane.f32.xlu0 %v6806_v41  ;;  %11118 = vmatpush3.msra.mxu0 %v6682_v37 }
0x19a6   :  { %11119 = vmatprep.subr.mxu0 %v6680_v54  ;;  %11129 = vmatprep.mubr.msk.f32.mxu1 %vm11669_vm1, %v11668_v16 }
0x19a7   :  { %v6974_v52 = vpop.permute.xlu1 %6973  ;;  %v6798_v43 = vpop.permute.xlu0 %6797  ;;  %11120 = vmatpush3.msra.mxu0 %v6680_v54 }
0x19a8   :  { %v6812_v46 = vsel %vm77_vm0, %v6798_v43, 0.0  ;;  %11142 = vmatprep.subr.mxu0 %v11668_v16 }
0x19a9   :  { %6813 = vadd.xlane.f32.xlu0 %v6812_v46 }
0x19ab   :  { %v6792_v45 = vpop.permute.xlu1 %6791 }
0x19ac   :  { %v6803_v15 = vsel %vm77_vm0, %v6792_v45, 0.0 }
0x19ad   :  { %6804 = vadd.xlane.f32.xlu1 %v6803_v15 }
0x19af   :  { %v6796_v55 = vpop.permute.xlu1 %6795 }
0x19b0   :  { %v6809_v11 = vsel %vm77_vm0, %v6796_v55, 0.0 }
0x19b1   :  { %6810 = vadd.xlane.f32.xlu1 %v6809_v11 }
0x1a36   :  { %v6805_v41 = vpop.xlane.xlu1 %6804 }
0x1a3a   :  { %v6811_v11 = vpop.xlane.xlu1 %6810 }
0x1a58   :  { %v6456_v49 = vpop.f32.mrf.mxu0 }
0x1a59   :  { %11121 = vmatprep.mubr.msk.f32.mxu0 %vm77_vm0, %v6456_v49 }
0x1a5a   :  { %v11097_v48 = vpop.f32.mrf.mxu0 }
0x1a5c   :  { %v6529_v21 = vpop.f32.mrf.mxu1 }
0x1a5d   :  { %11122 = vmatmul.mubr.msk.f32.vlgmr.msra.gmra.mxu0 %vm77_vm0, %v6529_v21 }
0x1a5e   :  { %v11102_v53 = vpop.f32.mrf.mxu1 }
0x1a60   :  { %v6602_v50 = vpop.f32.mrf.mxu0 }
0x1a61   :  { %11124 = vmatprep.mubr.msk.f32.mxu0 %vm77_vm0, %v6602_v50  ;;  %v6817_v50 = vmul.f32 0.17677669, %v6811_v11 }
0x1a62   :  { %v11107_v4 = vpop.f32.mrf.mxu0 }
0x1a64   :  { %v6675_v57 = vpop.f32.mrf.mxu1 }
0x1a65   :  { %11125 = vmatmul.mubr.msk.f32.gmra.mxu0 %vm77_vm0, %v6675_v57 }
0x1a66   :  { %v11112_v40 = vpop.f32.mrf.mxu1  ;;  %11144 = vmatprep.mubr.msk.f32.mxu0 %vm11669_vm1, %v11668_v16 }
0x1b1d   :  { %v11123_v59 = vpop.f32.mrf.mxu0 }
0x1b1e   :  { %v6778_v12 = vadd.f32 %v11123_v59, %v12686_v2 }
0x1b1f   :  { %v6772_v51 = vpop.f32.mrf.mxu0 }
0x1b20   :  { %v6773_v5 = vadd.f32 %v6772_v51, %v12686_v2 }
0x1b22   :  { %11128 = vmatpush3.xpose.msk.msra.mxu1 %vm77_vm0, %v6773_v5 }
0x1b23   :  { %11132 = vmatprep.subr.mxu1 %v11668_v16 }
0x1b25   :  { %v11126_v56 = vpop.f32.mrf.mxu0  ;;  %11130 = vmatmul.mubr.msk.f32.vlgmr.msra.gmra.mxu1 %vm77_vm0, %v6820_v29  ;;  %v6808_v29 = vpop.xlane.xlu0 %6807 }
0x1b26   :  { %v12720_v44 = vadd.f32 %v11126_v56, %v12686_v2  ;;  %11133 = vmatpush3.xpose.msk.msra.mxu1 %vm77_vm0, %v6778_v12  ;;  %11134 = vmatprep.mubr.msk.f32.mxu1 %vm11669_vm1, %v11668_v16  ;;  %v6816_v45 = vmul.f32 0.17677669, %v6808_v29 }
0x1b27   :  { %v6782_v58 = vpop.f32.mrf.mxu0  ;;  %11137 = vmatprep.subr.mxu1 %v11668_v16 }
0x1b28   :  { %v12727_v60 = vadd.f32 %v6782_v58, %v12686_v2  ;;  %11143 = vmatpush3.xpose.msk.msra.mxu0 %vm77_vm0, %v12720_v44 }
0x1b29   :  { %11135 = vmatmul.mubr.msk.f32.vlgmr.msra.gmra.mxu1 %vm77_vm0, %v12692_v0  ;;  %11152 = vmatprep.subr.mxu0 %v11668_v16  ;;  %v6814_v39 = vpop.xlane.xlu0 %6813 }
0x1b2a   :  { %11138 = vmatpush3.xpose.msk.msra.mxu1 %vm77_vm0, %v12727_v60  ;;  %11139 = vmatprep.mubr.msk.f32.mxu1 %vm11669_vm1, %v11668_v16  ;;  %v6818_v53 = vmul.f32 0.17677669, %v6814_v39 }
0x1b2b   :  { %11145 = vmatmul.mubr.msk.f32.vlgmr.msra.gmra.mxu0 %vm77_vm0, %v7051_v28  ;;  %11147 = vmatprep.subr.mxu1 %v11668_v16 }
0x1b2c   :  { %11153 = vmatpush3.msra.mxu0 %v6778_v12  ;;  %11154 = vmatprep.mubr.msk.f32.mxu0 %vm11669_vm1, %v11668_v16 }
0x1b2d   :  { %11140 = vmatmul.mubr.msk.f32.vlgmr.msra.gmra.mxu1 %vm77_vm0, %v6974_v52  ;;  %11162 = vmatprep.subr.mxu0 %v11668_v16  ;;  %v6815_v52 = vmul.f32 0.17677669, %v6805_v41 }
0x1b2e   :  { %11148 = vmatpush3.msra.mxu1 %v6773_v5  ;;  %11149 = vmatprep.mubr.msk.f32.mxu1 %vm11669_vm1, %v11668_v16 }
0x1b2f   :  { %11157 = vmatprep.subr.mxu1 %v11668_v16 }
0x1be5   :  { %v6892_v61 = vpop.f32.mrf.mxu1 }
0x1be6   :  { %v7127_v62 = vmul.f32 0.17677669, %v6892_v61 }
0x1be7   :  { %v11131_v1 = vpop.f32.mrf.mxu1 }
0x1be8   :  { %v7131_v3 = vsel %vm692_vm2, %v7127_v62, -inf }
0x1be9   :  { %7132 = vmax.xlane.f32.xlu0 %v7131_v3  ;;  %v6969_v26 = vpop.f32.mrf.mxu1 }
0x1bea   :  { %v7128_v2 = vmul.f32 0.17677669, %v6969_v26 }
0x1beb   :  { %v11136_v6 = vpop.f32.mrf.mxu1  ;;  %v7123_v8 = vpop.f32.mrf.mxu0 }
0x1bec   :  { %v7130_v37 = vmul.f32 0.17677669, %v7123_v8  ;;  %v7134_v0 = vsel %vm692_vm2, %v7128_v2, -inf }
0x1bed   :  { %v11146_v13 = vpop.f32.mrf.mxu0  ;;  %7135 = vmax.xlane.f32.xlu0 %v7134_v0  ;;  %v7046_v10 = vpop.f32.mrf.mxu1 }
0x1bee   :  { %v7129_v54 = vmul.f32 0.17677669, %v7046_v10  ;;  %v7140_v32 = vsel %vm692_vm2, %v7130_v37, -inf }
0x1bef   :  { %v11141_v28 = vpop.f32.mrf.mxu1 }
0x1bf0   :  { %v7137_v38 = vsel %vm692_vm2, %v7129_v54, -inf }
0x1bf1   :  { %7141 = vmax.xlane.f32.xlu0 %v7140_v32  ;;  %7138 = vmax.xlane.f32.xlu1 %v7137_v38 }
0x1c72   :  { %v7133_v43 = vpop.xlane.xlu0 %7132 }
0x1c73   :  { %v7143_v46 = vmax.f32 %v7133_v43, %v6815_v52 }
0x1c75   :  { %v7147_v15 = vsub.f32 %v7127_v62, %v7143_v46  ;;  %v7159_v55 = vsub.f32 %v6815_v52, %v7143_v46 }
0x1c76   :  { %v7136_v49 = vpop.xlane.xlu0 %7135 }
0x1c77   :  { %v7151_v48 = vmul.f32 1.442695, %v7147_v15  ;;  %v7144_v21 = vmax.f32 %v7136_v49, %v6816_v45 }
0x1c79   :  { %11519 = vpow2.f32 %v7151_v48  ;;  %v7148_v4 = vsub.f32 %v7128_v2, %v7144_v21  ;;  %v7160_v57 = vsub.f32 %v6816_v45, %v7144_v21 }
0x1c7a   :  { %v7142_v40 = vpop.xlane.xlu0 %7141  ;;  %v7139_v59 = vpop.xlane.xlu1 %7138 }
0x1c7b   :  { %v7153_v51 = vmul.f32 1.442695, %v7148_v4  ;;  %v7146_v5 = vmax.f32 %v7142_v40, %v6818_v53  ;;  %v7145_v12 = vmax.f32 %v7139_v59, %v6817_v50  ;;  %v7165_v28 = vmul.f32 1.442695, %v7160_v57 }
0x1c7d   :  { %11521 = vpow2.f32 %v7153_v51  ;;  %v7150_v56 = vsub.f32 %v7130_v37, %v7146_v5  ;;  %v7162_v58 = vsub.f32 %v6818_v53, %v7146_v5  ;;  %v7149_v61 = vsub.f32 %v7129_v54, %v7145_v12 }
0x1c7e   :  { %v7161_v62 = vsub.f32 %v6817_v50, %v7145_v12  ;;  %v7163_v54 = vmul.f32 1.442695, %v7159_v55 }
0x1c7f   :  { %v7157_v1 = vmul.f32 1.442695, %v7150_v56  ;;  %v7155_v3 = vmul.f32 1.442695, %v7149_v61  ;;  %v7169_v32 = vmul.f32 1.442695, %v7162_v58 }
0x1c80   :  { %v7167_v38 = vmul.f32 1.442695, %v7161_v62 }
0x1c81   :  { %11523 = vpow2.f32 %v7157_v1 }
0x1c82   :  { %11525 = vpow2.f32 %v7155_v3 }
0x1c83   :  { %11527 = vpow2.f32 %v7163_v54 }
0x1c84   :  { %11529 = vpow2.f32 %v7165_v28 }
0x1c85   :  { %11531 = vpow2.f32 %v7169_v32 }
0x1c86   :  { %v11520_v26 = vpop.eup %11519  ;;  %11533 = vpow2.f32 %v7167_v38 }
0x1c87   :  { %v7171_v6 = vsel %vm692_vm2, %v11520_v26, 0.0 }
0x1c88   :  { %7172 = vadd.xlane.f32.xlu1 %v7171_v6 }
0x1c8a   :  { %v11522_v2 = vpop.eup %11521 }
0x1c8b   :  { %v7174_v8 = vsel %vm692_vm2, %v11522_v2, 0.0 }
0x1c8c   :  { %7175 = vadd.xlane.f32.xlu0 %v7174_v8 }
0x1c8e   :  { %v11524_v0 = vpop.eup %11523 }
0x1c8f   :  { %v7180_v13 = vsel %vm692_vm2, %v11524_v0, 0.0  ;;  %v11526_v10 = vpop.eup %11525 }
0x1c90   :  { %7181 = vadd.xlane.f32.xlu0 %v7180_v13  ;;  %v7177_v37 = vsel %vm692_vm2, %v11526_v10, 0.0  ;;  %v11528_v29 = vpop.eup %11527 }
0x1c91   :  { %7178 = vadd.xlane.f32.xlu1 %v7177_v37  ;;  %v11530_v52 = vpop.eup %11529 }
0x1c92   :  { %v11532_v46 = vpop.eup %11531 }
0x1ca2   :  { %7650 = vrot.lane.b32.xlu1 %v11830_v22, %s11672_s18 }
0x1ca6   :  { %7648 = vrot.lane.b32.xlu0 %v11840_v27, %s11672_s18  ;;  %7726 = vrot.lane.b32.xlu1 %v11844_v30, %s11672_s18  ;;  %v11534_v30 = vpop.eup %11533 }
0x1d11   :  { %v7173_v39 = vpop.xlane.xlu1 %7172 }
0x1d12   :  { %v7183_v41 = vadd.f32 %v11528_v29, %v7173_v39 }
0x1d14   :  { %11535 = vrcp.f32 %v7183_v41 }
0x1d15   :  { %v7176_v22 = vpop.xlane.xlu0 %7175 }
0x1d16   :  { %v7184_v43 = vadd.f32 %v11530_v52, %v7176_v22 }
0x1d18   :  { %11537 = vrcp.f32 %v7184_v43 }
0x1d19   :  { %v7182_v45 = vpop.xlane.xlu0 %7181 }
0x1d1a   :  { %v7186_v15 = vadd.f32 %v11532_v46, %v7182_v45  ;;  %v7179_v55 = vpop.xlane.xlu1 %7178 }
0x1d1b   :  { %v7185_v11 = vadd.f32 %v11534_v30, %v7179_v55 }
0x1d1c   :  { %11539 = vrcp.f32 %v7186_v15 }
0x1d1d   :  { %11541 = vrcp.f32 %v7185_v11 }
0x1d1e   :  { %v12772_v56 = vpop.permute.xlu1 %7650 }
0x1d21   :  { %v11536_v49 = vpop.eup %11535 }
0x1d22   :  { %v7199_v48 = vmul.f32 %v11536_v49, %v11528_v29  ;;  %v7195_v21 = vmul.f32 %v11536_v49, %v11520_v26  ;;  %v12788_v32 = vpop.permute.xlu1 %7726 }
0x1d24   :  { %11150 = vmatmul.mubr.msk.f32.vlgmr.msra.gmra.mxu1 %vm692_vm2, %v7195_v21  ;;  %v7203_v53 = vmul.f32 %v7199_v48, %v12010_v9  ;;  %v7546_v21 = vld [vmem:[%s13166_s10 + $0x58] sm:$0xff] }
0x1d25   :  { %v11538_v50 = vpop.eup %11537  ;;  %11158 = vmatpush3.msra.mxu1 %v12727_v60  ;;  %11159 = vmatprep.mubr.msk.f32.mxu1 %vm11669_vm1, %v11668_v16 }
0x1d26   :  { %v7200_v4 = vmul.f32 %v11538_v50, %v11530_v52  ;;  %v7196_v57 = vmul.f32 %v11538_v50, %v11522_v2  ;;  %v7207_v40 = vsel %vm5594_vm4, %v7203_v53, 0.0  ;;  %11167 = vmatprep.subr.mxu1 %v7546_v21  ;;  %v7545_v50 = vld [vmem:[%s13166_s10 + $0x50] sm:$0xff] }
0x1d27   :  { %v7208_v59 = vrot.slane %v7207_v40, 4 }
0x1d28   :  { %11155 = vmatmul.mubr.msk.f32.vlgmr.msra.gmra.mxu0 %vm692_vm2, %v7196_v57  ;;  %v7204_v51 = vmul.f32 %v7200_v4, %v12005_v7  ;;  %v7544_v4 = vld [vmem:[%s13166_s10 + $0x48] sm:$0xff] }
0x1d29   :  { %v11540_v5 = vpop.eup %11539  ;;  %11163 = vmatpush3.msra.mxu0 %v12720_v44  ;;  %11164 = vmatprep.mubr.msk.f32.mxu0 %vm11669_vm1, %v11668_v16  ;;  %v7209_v12 = vadd.f32 %v7208_v59, %v7207_v40 }
0x1d2a   :  { %v7202_v60 = vmul.f32 %v11540_v5, %v11532_v46  ;;  %11181 = vmatprep.subr.mxu0 %v11668_v16  ;;  %v7198_v58 = vmul.f32 %v11540_v5, %v11524_v0  ;;  %v7214_v61 = vsel %vm5594_vm4, %v7204_v51, 0.0  ;;  %v11542_v62 = vpop.eup %11541 }
0x1d2b   :  { %v7210_v1 = vrot.slane %v7209_v12, 2  ;;  %v7215_v3 = vrot.slane %v7214_v61, 4  ;;  %v7201_v26 = vmul.f32 %v11542_v62, %v11534_v30  ;;  %v7197_v6 = vmul.f32 %v11542_v62, %v11526_v10  ;;  %v12786_v10 = vpop.permute.xlu0 %7648 }
0x1d2c   :  { %11165 = vmatmul.mubr.msk.f32.vlgmr.msra.gmra.mxu0 %vm692_vm2, %v7198_v58  ;;  %v7206_v44 = vmul.f32 %v7202_v60, %v12014_v17 }
0x1d2d   :  { %11182 = vmatpush3.xpose.msk.msra.mxu0 %vm77_vm0, %v12772_v56  ;;  %11183 = vmatprep.mubr.msk.f32.mxu0 %vm11669_vm1, %v11668_v16  ;;  %v7211_v2 = vadd.f32 %v7210_v1, %v7209_v12  ;;  %v7216_v8 = vadd.f32 %v7215_v3, %v7214_v61  ;;  %v7205_v13 = vmul.f32 %v7201_v26, %v12023_v34 }
0x1d2e   :  { %11160 = vmatmul.mubr.msk.f32.vlgmr.msra.gmra.mxu1 %vm692_vm2, %v7197_v6  ;;  %11186 = vmatprep.subr.mxu0 %v11668_v16  ;;  %v7228_v0 = vsel %vm5594_vm4, %v7206_v44, 0.0 }
0x1d2f   :  { %v7212_v37 = vrot.slane %v7211_v2, 1  ;;  %v7217_v54 = vrot.slane %v7216_v8, 2  ;;  %v7229_v28 = vrot.slane %v7228_v0, 4  ;;  %v7221_v38 = vsel %vm5594_vm4, %v7205_v13, 0.0  ;;  %11168 = vmatpush3.msra.mxu1 %v7546_v21 }
0x1d30   :  { %11184 = vmatmul.mubr.msk.f32.vlgmr.msra.gmra.mxu0 %vm77_vm0, %v12786_v10  ;;  %v7222_v52 = vrot.slane %v7221_v38, 4  ;;  %11169 = vmatprep.subr.mxu1 %v7545_v50 }
0x1d31   :  { %11187 = vmatpush3.xpose.msk.msra.mxu0 %vm77_vm0, %v12788_v32  ;;  %v7213_v29 = vadd.f32 %v7212_v37, %v7211_v2  ;;  %11188 = vmatprep.mubr.msk.f32.mxu0 %vm11669_vm1, %v11668_v16  ;;  %v7218_v39 = vadd.f32 %v7217_v54, %v7216_v8  ;;  %v7230_v41 = vadd.f32 %v7229_v28, %v7228_v0  ;;  %v11632_v54 = vld [vmem:[%s13159_s3] ss:$0 sm:$0xff] }
0x1d32   :  { %11191 = vmatprep.subr.mxu0 %v11668_v16  ;;  %v7223_v46 = vadd.f32 %v7222_v52, %v7221_v38  ;;  %11170 = vmatpush3.msra.mxu1 %v7545_v50  ;;  %v11633_v52 = vld [vmem:[%s13159_s3 + $0x1] ss:$0 sm:$0xff] }
0x1d33   :  { %7236 = vrot.lane.b32.xlu1 %v7213_v29, %s11671_s23  ;;  %v7219_v22 = vrot.slane %v7218_v39, 1  ;;  %v7231_v43 = vrot.slane %v7230_v41, 2  ;;  %11171 = vmatprep.subr.mxu1 %v7544_v4 }
0x1d34   :  { %11189 = vmatmul.mubr.msk.f32.vlgmr.msra.gmra.mxu0 %vm77_vm0, %v12786_v10  ;;  %v7224_v30 = vrot.slane %v7223_v46, 2  ;;  %11172 = vmatpush3.msra.mxu1 %v7544_v4 }
0x1d35   :  { %v7220_v45 = vadd.f32 %v7219_v22, %v7218_v39  ;;  %v7232_v15 = vadd.f32 %v7231_v43, %v7230_v41  ;;  %11193 = vmatprep.mubr.msk.f32.mxu0 %vm11669_vm1, %v11668_v16 }
0x1d36   :  { %v7225_v11 = vadd.f32 %v7224_v30, %v7223_v46 }
0x1d37   :  { %7313 = vrot.lane.b32.xlu1 %v7220_v45, %s11671_s23  ;;  %v7233_v55 = vrot.slane %v7232_v15, 1 }
0x1d38   :  { %v7226_v48 = vrot.slane %v7225_v11, 1 }
0x1d39   :  { %v7234_v49 = vadd.f32 %v7233_v55, %v7232_v15  ;;  %v11634_v15 = vld [vmem:[%s13159_s3 + $0x2] ss:$0 sm:$0xff] }
0x1d3a   :  { %v7227_v53 = vadd.f32 %v7226_v48, %v7225_v11 }
0x1d3b   :  { %7467 = vrot.lane.b32.xlu1 %v7234_v49, %s11671_s23 }
0x1d3c   :  { %7390 = vrot.lane.b32.xlu0 %v7227_v53, %s11671_s23 }
0x1d3f   :  { %7874 = vrot.lane.b32.xlu1 %v11832_v24, %s11672_s18  ;;  %v7543_v24 = vld [vmem:[%s13166_s10 + $0x40] sm:$0xff] }
0x1d40   :  { %7800 = vrot.lane.b32.xlu0 %v11862_v33, %s11672_s18  ;;  %11173 = vmatprep.subr.mxu1 %v7543_v24 }
0x1d41   :  { %11174 = vmatpush3.msra.mxu1 %v7543_v24 }
0x1d42   :  { %11196 = vmatprep.subr.mxu1 %v11668_v16 }
0x1d44   :  { %7956 = vrot.lane.b32.xlu0 %v12469_v47, %s11672_s18 }
0x1da5   :  { %v7237_v59 = vpop.permute.xlu1 %7236 }
0x1da9   :  { %v7314_v51 = vpop.permute.xlu1 %7313 }
0x1dad   :  { %v7468_v12 = vpop.permute.xlu1 %7467 }
0x1dae   :  { %v7391_v33 = vpop.permute.xlu0 %7390 }
0x1db1   :  { %v12838_v3 = vpop.permute.xlu1 %7874 }
0x1db2   :  { %v12825_v47 = vpop.permute.xlu0 %7800 }
0x1db3   :  { %11192 = vmatpush3.xpose.msk.msra.mxu0 %vm77_vm0, %v12825_v47 }
0x1db4   :  { %11201 = vmatprep.subr.mxu0 %v11668_v16 }
0x1db6   :  { %v7957_v57 = vpop.permute.xlu0 %7956  ;;  %11194 = vmatmul.mubr.msk.f32.vlgmr.msra.gmra.mxu0 %vm77_vm0, %v12786_v10 }
0x1db7   :  { %v7959_v40 = vsel %vm77_vm0, %v7957_v57, 0.0  ;;  %11202 = vmatpush3.msra.mxu0 %v12772_v56  ;;  %11203 = vmatprep.mubr.msk.f32.mxu0 %vm11669_vm1, %v11668_v16 }
0x1db8   :  { %7960 = vadd.xlane.f32.xlu1 %v7959_v40  ;;  %11211 = vmatprep.subr.mxu0 %v11668_v16  ;;  %v5187_v40 = vadd.f32 %v12518_v18, %v12528_v42 }
0x1de4   :  { %v7308_v5 = vpop.f32.mrf.mxu1 }
0x1de5   :  { %v7309_v60 = vadd.f32 %v7308_v5, %v7237_v59  ;;  %v5182_v5 = vadd.f32 %v12520_v35, %v12530_v14  ;;  %v11635_v35 = vld [vmem:[%s13159_s3 + $0x3] ss:$0 sm:$0xff] }
0x1de6   :  { %v11151_v58 = vpop.f32.mrf.mxu1 }
0x1de7   :  { %11175 = vmatprep.mubr.msk.f32.mxu1 %vm77_vm0, %v7309_v60 }
0x1de8   :  { %v7385_v61 = vpop.f32.mrf.mxu0 }
0x1de9   :  { %v7386_v62 = vadd.f32 %v7385_v61, %v7314_v51  ;;  %v5197_v61 = vadd.f32 %v12522_v36, %v12532_v31 }
0x1dea   :  { %v11156_v1 = vpop.f32.mrf.mxu0 }
0x1deb   :  { %11176 = vmatmul.mubr.msk.f32.vlgmr.msra.gmra.mxu1 %vm77_vm0, %v7386_v62 }
0x1dec   :  { %11197 = vmatpush3.xpose.msk.msra.mxu1 %vm77_vm0, %v12838_v3  ;;  %v7539_v56 = vpop.f32.mrf.mxu0 }
0x1ded   :  { %11206 = vmatprep.subr.mxu1 %v11668_v16  ;;  %v7540_v6 = vadd.f32 %v7539_v56, %v7468_v12 }
0x1dee   :  { %v7462_v26 = vpop.f32.mrf.mxu1  ;;  %v11166_v44 = vpop.f32.mrf.mxu0 }
0x1def   :  { %v7463_v2 = vadd.f32 %v7462_v26, %v7391_v33 }
0x1df0   :  { %v11161_v8 = vpop.f32.mrf.mxu1  ;;  %v7722_v0 = vpop.f32.mrf.mxu0 }
0x1df1   :  { %11178 = vmatprep.mubr.msk.f32.mxu1 %vm77_vm0, %v7463_v2  ;;  %v7948_v13 = vmul.f32 0.17677669, %v7722_v0 }
0x1df2   :  { %11179 = vmatmul.mubr.msk.f32.gmra.mxu1 %vm77_vm0, %v7540_v6  ;;  %v11185_v37 = vpop.f32.mrf.mxu0 }
0x1df3   :  { %v7952_v28 = vadd.f32 %v11632_v54, %v7948_v13  ;;  %11198 = vmatprep.mubr.msk.f32.mxu1 %vm11669_vm1, %v11668_v16 }
0x1df4   :  { %v7796_v38 = vpop.f32.mrf.mxu0 }
0x1df5   :  { %v7949_v29 = vmul.f32 0.17677669, %v7796_v38  ;;  %v7963_v39 = vsel %vm692_vm2, %v7952_v28, -inf }
0x1df6   :  { %11199 = vmatmul.mubr.msk.f32.vlgmr.msra.gmra.mxu1 %vm77_vm0, %v12786_v10  ;;  %7964 = vmax.xlane.f32.xlu0 %v7963_v39  ;;  %v11190_v41 = vpop.f32.mrf.mxu0 }
0x1df7   :  { %v7953_v22 = vadd.f32 %v11633_v52, %v7949_v29  ;;  %11207 = vmatpush3.msra.mxu1 %v12788_v32  ;;  %11208 = vmatprep.mubr.msk.f32.mxu1 %vm11669_vm1, %v11668_v16 }
0x1df8   :  { %11216 = vmatprep.subr.mxu1 %v11668_v16 }
0x1df9   :  { %v7966_v43 = vsel %vm692_vm2, %v7953_v22, -inf }
0x1dfa   :  { %7967 = vmax.xlane.f32.xlu0 %v7966_v43  ;;  %v11636_v43 = vld [vmem:[%s13162_s6 + $0x18] sm:$0xff] }
0x1e41   :  { %v7961_v55 = vpop.xlane.xlu1 %7960 }
0x1e42   :  { %v12866_v32 = vmul.f32 0.17677669, %v7961_v55 }
0x1e76   :  { %v7870_v46 = vpop.f32.mrf.mxu0 }
0x1e77   :  { %v7950_v45 = vmul.f32 0.17677669, %v7870_v46 }
0x1e78   :  { %v11195_v10 = vpop.f32.mrf.mxu0 }
0x1e79   :  { %v7954_v30 = vadd.f32 %v11634_v15, %v7950_v45 }
0x1e7b   :  { %v7969_v11 = vsel %vm692_vm2, %v7954_v30, -inf }
0x1e7c   :  { %7970 = vmax.xlane.f32.xlu0 %v7969_v11 }
0x1e7f   :  { %v7965_v49 = vpop.xlane.xlu0 %7964 }
0x1e80   :  { %v7975_v48 = vmax.f32 %v7965_v49, %v12866_v32 }
0x1e82   :  { %v7979_v21 = vsub.f32 %v7952_v28, %v7975_v48 }
0x1e83   :  { %v7968_v24 = vpop.xlane.xlu0 %7967 }
0x1e84   :  { %v7983_v53 = vmul.f32 1.442695, %v7979_v21  ;;  %v7976_v33 = vmax.f32 %v7968_v24, %v12866_v32 }
0x1e86   :  { %11543 = vpow2.f32 %v7983_v53  ;;  %v7980_v57 = vsub.f32 %v7953_v22, %v7976_v33  ;;  %v7992_v46 = vsub.f32 %v12866_v32, %v7976_v33 }
0x1e88   :  { %v7985_v59 = vmul.f32 1.442695, %v7980_v57  ;;  %v7997_v45 = vmul.f32 1.442695, %v7992_v46 }
0x1e8a   :  { %11545 = vpow2.f32 %v7985_v59 }
0x1e93   :  { %v11544_v50 = vpop.eup %11543 }
0x1e94   :  { %v8003_v4 = vsel %vm692_vm2, %v11544_v50, 0.0 }
0x1e95   :  { %8004 = vadd.xlane.f32.xlu0 %v8003_v4 }
0x1e97   :  { %v11546_v2 = vpop.eup %11545 }
0x1e98   :  { %v8006_v36 = vsel %vm692_vm2, %v11546_v2, 0.0 }
0x1eab   :  { %v11177_v51 = vpop.f32.mrf.mxu1 }
0x1eac   :  { %v12875_v12 = vadd.f32 %v11177_v51, %v5187_v40 }
0x1ead   :  { %v7625_v60 = vpop.f32.mrf.mxu1 }
0x1eae   :  { %v12877_v58 = vadd.f32 %v7625_v60, %v5182_v5 }
0x1eb2   :  { %v11180_v62 = vpop.f32.mrf.mxu1 }
0x1eb3   :  { %v12881_v1 = vadd.f32 %v11180_v62, %v5197_v61 }
0x1eb4   :  { %v7635_v56 = vpop.f32.mrf.mxu1 }
0x1eb5   :  { %v12884_v18 = vadd.f32 %v7635_v56, %v12534_v63  ;;  %v7991_v63 = vsub.f32 %v12866_v32, %v7975_v48 }
0x1eb6   :  { %v7944_v42 = vpop.f32.mrf.mxu1 }
0x1eb7   :  { %v7951_v26 = vmul.f32 0.17677669, %v7944_v42  ;;  %v7995_v37 = vmul.f32 1.442695, %v7991_v63 }
0x1eb8   :  { %v11200_v6 = vpop.f32.mrf.mxu1 }
0x1eb9   :  { %v7955_v14 = vadd.f32 %v11635_v35, %v7951_v26 }
0x1ebb   :  { %v7972_v44 = vsel %vm692_vm2, %v7955_v14, -inf }
0x1ebc   :  { %7973 = vmax.xlane.f32.xlu1 %v7972_v44 }
0x1ec0   :  { %8007 = vadd.xlane.f32.xlu1 %v8006_v36 }
0x1f05   :  { %v7971_v31 = vpop.xlane.xlu0 %7970 }
0x1f06   :  { %v12892_v8 = vmax.f32 %v7971_v31, %v12866_v32 }
0x1f08   :  { %v7981_v0 = vsub.f32 %v7954_v30, %v12892_v8  ;;  %v7993_v36 = vsub.f32 %v12866_v32, %v12892_v8 }
0x1f0a   :  { %v7987_v13 = vmul.f32 1.442695, %v7981_v0  ;;  %v7999_v31 = vmul.f32 1.442695, %v7993_v36 }
0x1f0c   :  { %11547 = vpow2.f32 %v7987_v13 }
0x1f0d   :  { %11549 = vpow2.f32 %v7995_v37 }
0x1f19   :  { %v12896_v54 = vpop.eup %11547 }
0x1f1a   :  { %v8009_v28 = vsel %vm692_vm2, %v12896_v54, 0.0  ;;  %v11550_v38 = vpop.eup %11549 }
0x1f1b   :  { %8010 = vadd.xlane.f32.xlu0 %v8009_v28 }
0x1f1e   :  { %v8005_v29 = vpop.xlane.xlu0 %8004 }
0x1f1f   :  { %v8015_v39 = vadd.f32 %v11550_v38, %v8005_v29 }
0x1f21   :  { %11551 = vrcp.f32 %v8015_v39 }
0x1f22   :  { %11553 = vpow2.f32 %v7997_v45 }
0x1f2e   :  { %v11552_v41 = vpop.eup %11551 }
0x1f2f   :  { %v8031_v52 = vmul.f32 %v11552_v41, %v11550_v38  ;;  %v8027_v22 = vmul.f32 %v11552_v41, %v11544_v50 }
0x1f31   :  { %11204 = vmatmul.mubr.msk.f32.vlgmr.msra.gmra.mxu0 %vm692_vm2, %v8027_v22  ;;  %8386 = vrot.lane.b32.xlu0 %v11636_v43, %s11672_s18  ;;  %v8035_v48 = vmul.f32 %v8031_v52, %v11840_v27 }
0x1f32   :  { %11212 = vmatpush3.msra.mxu0 %v12825_v47  ;;  %11213 = vmatprep.mubr.msk.f32.mxu0 %vm11669_vm1, %v11668_v16  ;;  %v11554_v47 = vpop.eup %11553 }
0x1f33   :  { %v8040_v4 = vsel %vm8039_vm5, %v8035_v48, 0.0 }
0x1f34   :  { %v8041_v40 = vrot.slane %v8040_v4, 4 }
0x1f36   :  { %v8042_v5 = vadd.f32 %v8041_v40, %v8040_v4 }
0x1f38   :  { %v8043_v62 = vrot.slane %v8042_v5, 2 }
0x1f3a   :  { %v8044_v26 = vadd.f32 %v8043_v62, %v8042_v5 }
0x1f3c   :  { %v8045_v35 = vrot.slane %v8044_v26, 1 }
0x1f3e   :  { %v8046_v44 = vadd.f32 %v8045_v35, %v8044_v26 }
0x1f45   :  { %v7974_v10 = vpop.xlane.xlu1 %7973 }
0x1f46   :  { %v12910_v15 = vmax.f32 %v7974_v10, %v12866_v32  ;;  %v11640_v10 = vld [vmem:[%s13163_s7] ss:$0 sm:$0xff] }
0x1f48   :  { %v7982_v30 = vsub.f32 %v7955_v14, %v12910_v15  ;;  %v11638_v14 = vld [vmem:[%s13162_s6 + $0x8] sm:$0xff] }
0x1f49   :  { %v8008_v55 = vpop.xlane.xlu1 %8007 }
0x1f4a   :  { %v7989_v11 = vmul.f32 1.442695, %v7982_v30  ;;  %v8016_v49 = vadd.f32 %v11554_v47, %v8008_v55 }
0x1f4c   :  { %11555 = vpow2.f32 %v7989_v11 }
0x1f4d   :  { %11557 = vrcp.f32 %v8016_v49 }
0x1f4e   :  { %11559 = vpow2.f32 %v7999_v31 }
0x1f59   :  { %v12914_v21 = vpop.eup %11555 }
0x1f5a   :  { %v8012_v53 = vsel %vm692_vm2, %v12914_v21, 0.0  ;;  %v11558_v50 = vpop.eup %11557 }
0x1f5b   :  { %8013 = vadd.xlane.f32.xlu1 %v8012_v53  ;;  %v8032_v24 = vmul.f32 %v11558_v50, %v11554_v47  ;;  %v8028_v33 = vmul.f32 %v11558_v50, %v11546_v2  ;;  %v11639_v2 = vld [vmem:[%s13162_s6] sm:$0xff]  ;;  %v11560_v63 = vpop.eup %11559 }
0x1f5d   :  { %11209 = vmatmul.mubr.msk.f32.vlgmr.msra.gmra.mxu1 %vm692_vm2, %v8028_v33  ;;  %v8036_v57 = vmul.f32 %v8032_v24, %v11840_v27 }
0x1f5e   :  { %11217 = vmatpush3.msra.mxu1 %v12838_v3  ;;  %11218 = vmatprep.mubr.msk.f32.mxu1 %vm11669_vm1, %v11668_v16  ;;  %v11637_v3 = vld [vmem:[%s13162_s6 + $0x10] sm:$0xff] }
0x1f5f   :  { %v8047_v59 = vsel %vm8039_vm5, %v8036_v57, 0.0  ;;  %11235 = vmatprep.subr.mxu1 %v11668_v16 }
0x1f60   :  { %v8048_v51 = vrot.slane %v8047_v59, 4 }
0x1f62   :  { %v8049_v60 = vadd.f32 %v8048_v51, %v8047_v59 }
0x1f64   :  { %v8050_v61 = vrot.slane %v8049_v60, 2 }
0x1f66   :  { %v8051_v56 = vadd.f32 %v8050_v61, %v8049_v60 }
0x1f68   :  { %v8052_v42 = vrot.slane %v8051_v56, 1 }
0x1f6a   :  { %v8053_v6 = vadd.f32 %v8052_v42, %v8051_v56 }
0x1f6c   :  { %8384 = vrot.lane.b32.xlu1 %v11637_v3, %s11672_s18  ;;  %8148 = vrot.lane.b32.xlu0 %v8053_v6, %s11672_s18 }
0x1f70   :  { %8382 = vrot.lane.b32.xlu1 %v11638_v14, %s11672_s18 }
0x1f74   :  { %8070 = vrot.lane.b32.xlu1 %v8046_v44, %s11672_s18 }
0x1f78   :  { %8380 = vrot.lane.b32.xlu1 %v11639_v2, %s11672_s18 }
0x1fa4   :  { %v8011_v0 = vpop.xlane.xlu0 %8010 }
0x1fa5   :  { %v8017_v13 = vadd.f32 %v11560_v63, %v8011_v0 }
0x1fa7   :  { %11561 = vrcp.f32 %v8017_v13 }
0x1fa8   :  { %v8387_v37 = vpop.permute.xlu0 %8386 }
0x1fa9   :  { %11221 = vmatprep.subr.mxu0 %v8387_v37 }
0x1fb4   :  { %v11562_v28 = vpop.eup %11561 }
0x1fb5   :  { %v8033_v38 = vmul.f32 %v11562_v28, %v11560_v63  ;;  %v8029_v29 = vmul.f32 %v11562_v28, %v12896_v54  ;;  %v7994_v54 = vsub.f32 %v12866_v32, %v12910_v15 }
0x1fb7   :  { %11214 = vmatmul.mubr.msk.f32.vlgmr.msra.gmra.mxu0 %vm692_vm2, %v8029_v29  ;;  %v8037_v39 = vmul.f32 %v8033_v38, %v11840_v27  ;;  %v8001_v30 = vmul.f32 1.442695, %v7994_v54 }
0x1fb8   :  { %11222 = vmatpush3.msra.mxu0 %v8387_v37 }
0x1fb9   :  { %v8054_v41 = vsel %vm8039_vm5, %v8037_v39, 0.0  ;;  %11563 = vpow2.f32 %v8001_v30 }
0x1fba   :  { %v8055_v8 = vrot.slane %v8054_v41, 4 }
0x1fbc   :  { %v8056_v52 = vadd.f32 %v8055_v8, %v8054_v41 }
0x1fbe   :  { %v8057_v22 = vrot.slane %v8056_v52, 2 }
0x1fc0   :  { %v8058_v43 = vadd.f32 %v8057_v22, %v8056_v52 }
0x1fc2   :  { %v8059_v46 = vrot.slane %v8058_v43, 1 }
0x1fc4   :  { %v8060_v45 = vadd.f32 %v8059_v46, %v8058_v43 }
0x1fc6   :  { %8226 = vrot.lane.b32.xlu0 %v8060_v45, %s11672_s18  ;;  %v11564_v47 = vpop.eup %11563 }
0x1fca   :  { %8392 = vrot.lane.b32.xlu0 %v11640_v10, %s11672_s18 }
0x1fe4   :  { %v8014_v55 = vpop.xlane.xlu1 %8013 }
0x1fe5   :  { %v8018_v11 = vadd.f32 %v11564_v47, %v8014_v55 }
0x1fe7   :  { %11565 = vrcp.f32 %v8018_v11 }
0x1fe8   :  { %v8385_v49 = vpop.permute.xlu1 %8384 }
0x1fe9   :  { %11223 = vmatprep.subr.mxu0 %v8385_v49 }
0x1fea   :  { %11224 = vmatpush3.msra.mxu0 %v8385_v49 }
0x1fec   :  { %v8383_v48 = vpop.permute.xlu1 %8382 }
0x1fed   :  { %11225 = vmatprep.subr.mxu0 %v8383_v48 }
0x1fee   :  { %11226 = vmatpush3.msra.mxu0 %v8383_v48 }
0x1ff0   :  { %v8071_v53 = vpop.permute.xlu1 %8070 }
0x1ff1   :  { %v8142_v50 = vpop.f32.mrf.mxu0 }
0x1ff2   :  { %v8143_v4 = vadd.f32 %v8142_v50, %v8071_v53 }
0x1ff3   :  { %v11205_v24 = vpop.f32.mrf.mxu0 }
0x1ff4   :  { %v11566_v33 = vpop.eup %11565  ;;  %11229 = vmatprep.mubr.msk.f32.mxu0 %vm77_vm0, %v8143_v4  ;;  %v8381_v32 = vpop.permute.xlu1 %8380 }
0x1ff5   :  { %v8034_v15 = vmul.f32 %v11566_v33, %v11564_v47  ;;  %v8030_v57 = vmul.f32 %v11566_v33, %v12914_v21  ;;  %11227 = vmatprep.subr.mxu0 %v8381_v32  ;;  %v8149_v21 = vpop.permute.xlu0 %8148 }
0x1ff6   :  { %11228 = vmatpush3.msra.mxu0 %v8381_v32 }
0x1ff7   :  { %11219 = vmatmul.mubr.msk.f32.vlgmr.msra.gmra.mxu1 %vm692_vm2, %v8030_v57  ;;  %v8038_v40 = vmul.f32 %v8034_v15, %v11840_v27  ;;  %11250 = vmatprep.subr.mxu0 %v11668_v16 }
0x1ff8   :  { %11237 = vmatprep.mubr.msk.f32.mxu1 %vm11669_vm1, %v11668_v16 }
0x1ff9   :  { %v8061_v59 = vsel %vm8039_vm5, %v8038_v40, 0.0 }
0x1ffa   :  { %v8062_v51 = vrot.slane %v8061_v59, 4 }
0x1ffc   :  { %v8063_v5 = vadd.f32 %v8062_v51, %v8061_v59 }
0x1ffe   :  { %v8064_v60 = vrot.slane %v8063_v5, 2 }
0x2000   :  { %v8065_v61 = vadd.f32 %v8064_v60, %v8063_v5 }
0x2002   :  { %v8066_v62 = vrot.slane %v8065_v61, 1 }
0x2004   :  { %v8067_v56 = vadd.f32 %v8066_v62, %v8065_v61 }
0x2006   :  { %8304 = vrot.lane.b32.xlu1 %v8067_v56, %s11672_s18 }
0x201d   :  { %v8220_v42 = vpop.f32.mrf.mxu1 }
0x201e   :  { %v8221_v26 = vadd.f32 %v8220_v42, %v8149_v21 }
0x201f   :  { %v11210_v6 = vpop.f32.mrf.mxu1 }
0x2020   :  { %11230 = vmatmul.mubr.msk.f32.vlgmr.msra.gmra.mxu0 %vm77_vm0, %v8221_v26 }
0x2038   :  { %v8227_v27 = vpop.permute.xlu0 %8226 }
0x203c   :  { %v8393_v0 = vpop.permute.xlu0 %8392 }
0x2077   :  { %v8298_v3 = vpop.f32.mrf.mxu0 }
0x2078   :  { %v8299_v35 = vadd.f32 %v8298_v3, %v8227_v27  ;;  %v8305_v44 = vpop.permute.xlu1 %8304 }
0x2079   :  { %v11215_v14 = vpop.f32.mrf.mxu0 }
0x207a   :  { %11232 = vmatprep.mubr.msk.f32.mxu0 %vm77_vm0, %v8299_v35 }
0x20b7   :  { %v8376_v2 = vpop.f32.mrf.mxu1 }
0x20b8   :  { %v8377_v36 = vadd.f32 %v8376_v2, %v8305_v44 }
0x20b9   :  { %v11220_v31 = vpop.f32.mrf.mxu1 }
0x20ba   :  { %11233 = vmatmul.mubr.msk.f32.gmra.mxu0 %vm77_vm0, %v8377_v36 }
0x20bb   :  { %11252 = vmatprep.mubr.msk.f32.mxu0 %vm11669_vm1, %v11668_v16 }
0x20e0   :  { %v11231_v63 = vpop.f32.mrf.mxu0 }
0x20e1   :  { %v8479_v28 = vadd.f32 %v11231_v63, %v8393_v0  ;;  %v11641_v63 = vld [vmem:[%s13164_s8 + $0x18] sm:$0xff] }
0x20e2   :  { %v8473_v13 = vpop.f32.mrf.mxu0 }
0x20e3   :  { %v8474_v37 = vadd.f32 %v8473_v13, %v8393_v0  ;;  %v11643_v13 = vld [vmem:[%s13164_s8] sm:$0xff] }
0x20e5   :  { %11236 = vmatpush3.xpose.msk.msra.mxu1 %vm77_vm0, %v8474_v37 }
0x20e6   :  { %11240 = vmatprep.subr.mxu1 %v11668_v16 }
0x20e8   :  { %11238 = vmatmul.mubr.msk.f32.vlgmr.msra.gmra.mxu1 %vm77_vm0, %v8474_v37 }
0x20e9   :  { %11241 = vmatpush3.xpose.msk.msra.mxu1 %vm77_vm0, %v8479_v28  ;;  %11242 = vmatprep.mubr.msk.f32.mxu1 %vm11669_vm1, %v11668_v16 }
0x20ea   :  { %11245 = vmatprep.subr.mxu1 %v11668_v16 }
0x20ec   :  { %11243 = vmatmul.mubr.msk.f32.vlgmr.msra.gmra.mxu1 %vm77_vm0, %v8479_v28 }
0x20ed   :  { %11247 = vmatprep.mubr.msk.f32.mxu1 %vm11669_vm1, %v11668_v16 }
0x217a   :  { %v11234_v38 = vpop.f32.mrf.mxu0 }
0x217b   :  { %v12977_v29 = vadd.f32 %v11234_v38, %v8393_v0 }
0x217c   :  { %v8483_v39 = vpop.f32.mrf.mxu0 }
0x217d   :  { %v12979_v41 = vadd.f32 %v8483_v39, %v8393_v0  ;;  %11251 = vmatpush3.xpose.msk.msra.mxu0 %vm77_vm0, %v12977_v29  ;;  %v11642_v0 = vld [vmem:[%s13164_s8 + $0x8] sm:$0xff] }
0x217e   :  { %11260 = vmatprep.subr.mxu0 %v11668_v16 }
0x217f   :  { %11246 = vmatpush3.xpose.msk.msra.mxu1 %vm77_vm0, %v12979_v41 }
0x2180   :  { %11253 = vmatmul.mubr.msk.f32.vlgmr.msra.gmra.mxu0 %vm77_vm0, %v12977_v29  ;;  %11255 = vmatprep.subr.mxu1 %v11668_v16 }
0x2181   :  { %11261 = vmatpush3.msra.mxu0 %v8479_v28  ;;  %11262 = vmatprep.mubr.msk.f32.mxu0 %vm11669_vm1, %v11668_v16  ;;  %v11645_v28 = vld [vmem:[%s13165_s9] ss:$0 sm:$0xff] }
0x2182   :  { %11248 = vmatmul.mubr.msk.f32.vlgmr.msra.gmra.mxu1 %vm77_vm0, %v12979_v41  ;;  %11270 = vmatprep.subr.mxu0 %v11668_v16 }
0x2183   :  { %11256 = vmatpush3.msra.mxu1 %v8474_v37  ;;  %11257 = vmatprep.mubr.msk.f32.mxu1 %vm11669_vm1, %v11668_v16  ;;  %v11644_v37 = vld [vmem:[%s13164_s8 + $0x10] sm:$0xff] }
0x2184   :  { %11265 = vmatprep.subr.mxu1 %v11668_v16 }
0x21a8   :  { %v8561_v8 = vpop.f32.mrf.mxu1 }
0x21a9   :  { %v8784_v52 = vmul.f32 0.17677669, %v8561_v8 }
0x21aa   :  { %v11239_v22 = vpop.f32.mrf.mxu1 }
0x21ab   :  { %v8788_v43 = vsel %vm692_vm2, %v8784_v52, -inf }
0x21ac   :  { %8789 = vmax.xlane.f32.xlu1 %v8788_v43  ;;  %v8634_v46 = vpop.f32.mrf.mxu1 }
0x21ad   :  { %v8785_v45 = vmul.f32 0.17677669, %v8634_v46 }
0x21ae   :  { %v11244_v10 = vpop.f32.mrf.mxu1 }
0x21af   :  { %v8791_v54 = vsel %vm692_vm2, %v8785_v45, -inf }
0x21b0   :  { %8792 = vmax.xlane.f32.xlu0 %v8791_v54 }
0x2235   :  { %v8790_v30 = vpop.xlane.xlu1 %8789 }
0x2236   :  { %v8800_v47 = vsub.f32 %v8784_v52, %v8790_v30 }
0x2238   :  { %v8804_v55 = vmul.f32 1.442695, %v8800_v47 }
0x2239   :  { %v8793_v11 = vpop.xlane.xlu0 %8792 }
0x223a   :  { %11567 = vpow2.f32 %v8804_v55  ;;  %v8801_v49 = vsub.f32 %v8785_v45, %v8793_v11 }
0x223c   :  { %v8806_v48 = vmul.f32 1.442695, %v8801_v49 }
0x223e   :  { %11569 = vpow2.f32 %v8806_v48 }
0x2240   :  { %v8780_v53 = vpop.f32.mrf.mxu0 }
0x2241   :  { %v8787_v32 = vmul.f32 0.17677669, %v8780_v53 }
0x2242   :  { %v8707_v50 = vpop.f32.mrf.mxu1  ;;  %v11254_v4 = vpop.f32.mrf.mxu0 }
0x2243   :  { %v8786_v24 = vmul.f32 0.17677669, %v8707_v50  ;;  %v8797_v59 = vsel %vm692_vm2, %v8787_v32, -inf }
0x2244   :  { %v11249_v33 = vpop.f32.mrf.mxu1 }
0x2245   :  { %v8794_v15 = vsel %vm692_vm2, %v8786_v24, -inf }
0x2246   :  { %8795 = vmax.xlane.f32.xlu0 %v8794_v15 }
0x2247   :  { %v11568_v57 = vpop.eup %11567 }
0x2248   :  { %v8812_v40 = vsel %vm692_vm2, %v11568_v57, 0.0 }
0x2249   :  { %8813 = vadd.xlane.f32.xlu1 %v8812_v40 }
0x224a   :  { %8798 = vmax.xlane.f32.xlu0 %v8797_v59 }
0x224b   :  { %v11570_v51 = vpop.eup %11569 }
0x224c   :  { %v8815_v5 = vsel %vm692_vm2, %v11570_v51, 0.0 }
0x224e   :  { %8816 = vadd.xlane.f32.xlu0 %v8815_v5 }
0x22cf   :  { %v8796_v60 = vpop.xlane.xlu0 %8795 }
0x22d0   :  { %v8802_v61 = vsub.f32 %v8786_v24, %v8796_v60 }
0x22d2   :  { %v8808_v62 = vmul.f32 1.442695, %v8802_v61  ;;  %v8814_v56 = vpop.xlane.xlu1 %8813 }
0x22d3   :  { %v8799_v21 = vpop.xlane.xlu0 %8798 }
0x22d4   :  { %11571 = vpow2.f32 %v8808_v62  ;;  %v8803_v42 = vsub.f32 %v8787_v32, %v8799_v21 }
0x22d5   :  { %11573 = vrcp.f32 %v8814_v56 }
0x22d6   :  { %v8810_v26 = vmul.f32 1.442695, %v8803_v42 }
0x22d7   :  { %v8817_v6 = vpop.xlane.xlu0 %8816 }
0x22d8   :  { %11575 = vpow2.f32 %v8810_v26 }
0x22d9   :  { %11577 = vrcp.f32 %v8817_v6 }
0x22e1   :  { %v11572_v27 = vpop.eup %11571 }
0x22e2   :  { %v11574_v3 = vpop.eup %11573  ;;  %v8818_v35 = vsel %vm692_vm2, %v11572_v27, 0.0 }
0x22e3   :  { %v8825_v14 = vmul.f32 %v11574_v3, %v11568_v57  ;;  %8819 = vadd.xlane.f32.xlu1 %v8818_v35 }
0x22e5   :  { %v11576_v44 = vpop.eup %11575  ;;  %11258 = vmatmul.mubr.msk.f32.vlgmr.msra.gmra.mxu1 %vm692_vm2, %v8825_v14 }
0x22e6   :  { %v11578_v2 = vpop.eup %11577  ;;  %11266 = vmatpush3.msra.mxu1 %v12979_v41  ;;  %v8821_v36 = vsel %vm692_vm2, %v11576_v44, 0.0  ;;  %11267 = vmatprep.mubr.msk.f32.mxu1 %vm11669_vm1, %v11668_v16 }
0x22e7   :  { %8822 = vadd.xlane.f32.xlu0 %v8821_v36  ;;  %v8827_v31 = vmul.f32 %v11578_v2, %v11570_v51 }
0x22e9   :  { %11263 = vmatmul.mubr.msk.f32.vlgmr.msra.gmra.mxu0 %vm692_vm2, %v8827_v31 }
0x22ea   :  { %11271 = vmatpush3.msra.mxu0 %v12977_v29  ;;  %11272 = vmatprep.mubr.msk.f32.mxu0 %vm11669_vm1, %v11668_v16 }
0x22eb   :  { %11289 = vmatprep.subr.mxu0 %v11668_v16 }
0x22f4   :  { %9130 = vrot.lane.b32.xlu1 %v11641_v63, %s11672_s18 }
0x22f8   :  { %9126 = vrot.lane.b32.xlu1 %v11642_v0, %s11672_s18 }
0x22fc   :  { %9124 = vrot.lane.b32.xlu1 %v11643_v13, %s11672_s18 }
0x22fd   :  { %9128 = vrot.lane.b32.xlu0 %v11644_v37, %s11672_s18 }
0x2300   :  { %9136 = vrot.lane.b32.xlu1 %v11645_v28, %s11672_s18 }
0x2301   :  { %9264 = vrot.lane.b32.xlu0 %v12010_v9, %s11672_s18 }
0x2304   :  { %9341 = vrot.lane.b32.xlu1 %v12005_v7, %s11672_s18 }
0x2305   :  { %9418 = vrot.lane.b32.xlu0 %v12023_v34, %s11672_s18 }
0x2308   :  { %9495 = vrot.lane.b32.xlu1 %v12014_v17, %s11672_s18 }
0x2309   :  { %9236 = vrot.lane.b32.xlu0 %v12028_v20, %s11672_s18 }
0x230c   :  { %9238 = vrot.lane.b32.xlu1 %v12019_v19, %s11672_s18 }
0x230d   :  { %9240 = vrot.lane.b32.xlu0 %v12040_v25, %s11672_s18 }
0x2310   :  { %9242 = vrot.lane.b32.xlu1 %v12034_v23, %s11672_s18 }
0x236c   :  { %v8820_v38 = vpop.xlane.xlu1 %8819 }
0x236d   :  { %11579 = vrcp.f32 %v8820_v38 }
0x2370   :  { %v9131_v29 = vpop.permute.xlu1 %9130  ;;  %v8823_v39 = vpop.xlane.xlu0 %8822 }
0x2371   :  { %11581 = vrcp.f32 %v8823_v39  ;;  %11275 = vmatprep.subr.mxu1 %v9131_v29 }
0x2374   :  { %v9127_v41 = vpop.permute.xlu1 %9126  ;;  %v9129_v8 = vpop.permute.xlu0 %9128 }
0x2378   :  { %v9125_v52 = vpop.permute.xlu1 %9124  ;;  %v9265_v22 = vpop.permute.xlu0 %9264 }
0x237a   :  { %v11580_v20 = vpop.eup %11579 }
0x237b   :  { %v8829_v43 = vmul.f32 %v11580_v20, %v11572_v27 }
0x237c   :  { %v9137_v46 = vpop.permute.xlu1 %9136  ;;  %v13050_v19 = vpop.permute.xlu0 %9418 }
0x237d   :  { %11268 = vmatmul.mubr.msk.f32.vlgmr.msra.gmra.mxu1 %vm692_vm2, %v8829_v43 }
0x237e   :  { %v11582_v25 = vpop.eup %11581  ;;  %11276 = vmatpush3.msra.mxu1 %v9131_v29 }
0x237f   :  { %v8831_v23 = vmul.f32 %v11582_v25, %v11576_v44  ;;  %11277 = vmatprep.subr.mxu1 %v9129_v8 }
0x2380   :  { %v9342_v45 = vpop.permute.xlu1 %9341  ;;  %v9237_v10 = vpop.permute.xlu0 %9236  ;;  %11278 = vmatpush3.msra.mxu1 %v9129_v8 }
0x2381   :  { %v9248_v54 = vsel %vm77_vm0, %v9237_v10, 0.0  ;;  %11273 = vmatmul.mubr.msk.f32.vlgmr.msra.gmra.mxu0 %vm692_vm2, %v8831_v23  ;;  %11279 = vmatprep.subr.mxu1 %v9127_v41 }
0x2382   :  { %9249 = vadd.xlane.f32.xlu0 %v9248_v54  ;;  %11280 = vmatpush3.msra.mxu1 %v9127_v41 }
0x2383   :  { %11281 = vmatprep.subr.mxu1 %v9125_v52  ;;  %11291 = vmatprep.mubr.msk.f32.mxu0 %vm11669_vm1, %v11668_v16 }
0x2384   :  { %v9496_v30 = vpop.permute.xlu1 %9495  ;;  %v9241_v47 = vpop.permute.xlu0 %9240  ;;  %11282 = vmatpush3.msra.mxu1 %v9125_v52 }
0x2385   :  { %v9254_v55 = vsel %vm77_vm0, %v9241_v47, 0.0  ;;  %11304 = vmatprep.subr.mxu1 %v11668_v16 }
0x2386   :  { %9255 = vadd.xlane.f32.xlu0 %v9254_v55 }
0x2388   :  { %v9239_v11 = vpop.permute.xlu1 %9238 }
0x2389   :  { %v9251_v49 = vsel %vm77_vm0, %v9239_v11, 0.0 }
0x238a   :  { %9252 = vadd.xlane.f32.xlu1 %v9251_v49 }
0x238c   :  { %v9243_v48 = vpop.permute.xlu1 %9242 }
0x238d   :  { %v9257_v53 = vsel %vm77_vm0, %v9243_v48, 0.0 }
0x238e   :  { %9258 = vadd.xlane.f32.xlu1 %v9257_v53 }
0x23a5   :  { %v8901_v50 = vpop.f32.mrf.mxu1 }
0x23a6   :  { %11283 = vmatprep.mubr.msk.f32.mxu1 %vm77_vm0, %v8901_v50 }
0x23a7   :  { %v11259_v4 = vpop.f32.mrf.mxu1 }
0x23a9   :  { %v8974_v24 = vpop.f32.mrf.mxu0 }
0x23aa   :  { %11284 = vmatmul.mubr.msk.f32.vlgmr.msra.gmra.mxu1 %vm77_vm0, %v8974_v24 }
0x23ab   :  { %v11264_v33 = vpop.f32.mrf.mxu0 }
0x240b   :  { %v9250_v2 = vpop.xlane.xlu0 %9249 }
0x240c   :  { %v9260_v31 = vmul.f32 0.17677669, %v9250_v2 }
0x240f   :  { %v9256_v36 = vpop.xlane.xlu0 %9255 }
0x2410   :  { %v9262_v4 = vmul.f32 0.17677669, %v9256_v36 }
0x2413   :  { %v9253_v63 = vpop.xlane.xlu1 %9252 }
0x2414   :  { %v9261_v37 = vmul.f32 0.17677669, %v9253_v63 }
0x2417   :  { %v9259_v49 = vpop.xlane.xlu1 %9258 }
0x2418   :  { %v9263_v53 = vmul.f32 0.17677669, %v9259_v49 }
0x243d   :  { %v9047_v32 = vpop.f32.mrf.mxu1 }
0x243e   :  { %11286 = vmatprep.mubr.msk.f32.mxu1 %vm77_vm0, %v9047_v32 }
0x243f   :  { %v11269_v15 = vpop.f32.mrf.mxu1 }
0x2441   :  { %v9120_v57 = vpop.f32.mrf.mxu0 }
0x2442   :  { %11287 = vmatmul.mubr.msk.f32.gmra.mxu1 %vm77_vm0, %v9120_v57 }
0x2443   :  { %v11274_v40 = vpop.f32.mrf.mxu0  ;;  %11306 = vmatprep.mubr.msk.f32.mxu1 %vm11669_vm1, %v11668_v16 }
0x246a   :  { %v11285_v59 = vpop.f32.mrf.mxu1 }
0x246b   :  { %v9223_v60 = vadd.f32 %v11285_v59, %v9137_v46 }
0x246c   :  { %v9217_v51 = vpop.f32.mrf.mxu1 }
0x246d   :  { %v9218_v5 = vadd.f32 %v9217_v51, %v9137_v46 }
0x246f   :  { %11290 = vmatpush3.xpose.msk.msra.mxu0 %vm77_vm0, %v9218_v5 }
0x2470   :  { %11294 = vmatprep.subr.mxu0 %v11668_v16 }
0x2472   :  { %11292 = vmatmul.mubr.msk.f32.vlgmr.msra.gmra.mxu0 %vm77_vm0, %v9265_v22 }
0x2473   :  { %11295 = vmatpush3.xpose.msk.msra.mxu0 %vm77_vm0, %v9223_v60  ;;  %11296 = vmatprep.mubr.msk.f32.mxu0 %vm11669_vm1, %v11668_v16 }
0x2474   :  { %11299 = vmatprep.subr.mxu0 %v11668_v16 }
0x2476   :  { %11297 = vmatmul.mubr.msk.f32.vlgmr.msra.gmra.mxu0 %vm77_vm0, %v9342_v45 }
0x2477   :  { %11301 = vmatprep.mubr.msk.f32.mxu0 %vm11669_vm1, %v11668_v16 }
0x2502   :  { %v11288_v61 = vpop.f32.mrf.mxu1 }
0x2503   :  { %v13077_v62 = vadd.f32 %v11288_v61, %v9137_v46 }
0x2504   :  { %v9227_v56 = vpop.f32.mrf.mxu1 }
0x2505   :  { %v13079_v21 = vadd.f32 %v9227_v56, %v9137_v46  ;;  %11305 = vmatpush3.xpose.msk.msra.mxu1 %vm77_vm0, %v13077_v62 }
0x2506   :  { %11314 = vmatprep.subr.mxu1 %v11668_v16 }
0x2507   :  { %11300 = vmatpush3.xpose.msk.msra.mxu0 %vm77_vm0, %v13079_v21 }
0x2508   :  { %11307 = vmatmul.mubr.msk.f32.vlgmr.msra.gmra.mxu1 %vm77_vm0, %v9496_v30  ;;  %11309 = vmatprep.subr.mxu0 %v11668_v16 }
0x2509   :  { %11315 = vmatpush3.msra.mxu1 %v9223_v60  ;;  %11316 = vmatprep.mubr.msk.f32.mxu1 %vm11669_vm1, %v11668_v16 }
0x250a   :  { %11302 = vmatmul.mubr.msk.f32.vlgmr.msra.gmra.mxu0 %vm77_vm0, %v13050_v19  ;;  %11324 = vmatprep.subr.mxu1 %v11668_v16 }
0x250b   :  { %11310 = vmatpush3.msra.mxu0 %v9218_v5  ;;  %11311 = vmatprep.mubr.msk.f32.mxu0 %vm11669_vm1, %v11668_v16 }
0x250c   :  { %11319 = vmatprep.subr.mxu0 %v11668_v16 }
0x2532   :  { %v9337_v42 = vpop.f32.mrf.mxu0 }
0x2533   :  { %v9572_v26 = vmul.f32 0.17677669, %v9337_v42 }
0x2534   :  { %v11293_v6 = vpop.f32.mrf.mxu0 }
0x2535   :  { %v9576_v27 = vsel %vm692_vm2, %v9572_v26, -inf }
0x2536   :  { %9577 = vmax.xlane.f32.xlu0 %v9576_v27  ;;  %v9414_v3 = vpop.f32.mrf.mxu0 }
0x2537   :  { %v9573_v35 = vmul.f32 0.17677669, %v9414_v3 }
0x2538   :  { %v11298_v14 = vpop.f32.mrf.mxu0 }
0x2539   :  { %v9579_v44 = vsel %vm692_vm2, %v9573_v35, -inf }
0x253a   :  { %9580 = vmax.xlane.f32.xlu0 %v9579_v44 }
0x25bf   :  { %v9578_v0 = vpop.xlane.xlu0 %9577 }
0x25c0   :  { %v9588_v13 = vmax.f32 %v9578_v0, %v9260_v31 }
0x25c2   :  { %v9592_v28 = vsub.f32 %v9572_v26, %v9588_v13  ;;  %v9604_v38 = vsub.f32 %v9260_v31, %v9588_v13 }
0x25c3   :  { %v9581_v29 = vpop.xlane.xlu0 %9580 }
0x25c4   :  { %v9596_v39 = vmul.f32 1.442695, %v9592_v28  ;;  %v9589_v41 = vmax.f32 %v9581_v29, %v9261_v37  ;;  %v9608_v11 = vmul.f32 1.442695, %v9604_v38 }
0x25c6   :  { %11583 = vpow2.f32 %v9596_v39  ;;  %v9593_v8 = vsub.f32 %v9573_v35, %v9589_v41  ;;  %v9605_v52 = vsub.f32 %v9261_v37, %v9589_v41 }
0x25c8   :  { %v9598_v22 = vmul.f32 1.442695, %v9593_v8  ;;  %v9568_v20 = vpop.f32.mrf.mxu1  ;;  %v9610_v48 = vmul.f32 1.442695, %v9605_v52 }
0x25c9   :  { %v9575_v43 = vmul.f32 0.17677669, %v9568_v20 }
0x25ca   :  { %11585 = vpow2.f32 %v9598_v22  ;;  %v9491_v46 = vpop.f32.mrf.mxu0  ;;  %v11308_v19 = vpop.f32.mrf.mxu1 }
0x25cb   :  { %v9574_v25 = vmul.f32 0.17677669, %v9491_v46  ;;  %v9585_v23 = vsel %vm692_vm2, %v9575_v43, -inf  ;;  %11587 = vpow2.f32 %v9608_v11 }
0x25cc   :  { %9586 = vmax.xlane.f32.xlu1 %v9585_v23  ;;  %v11303_v45 = vpop.f32.mrf.mxu0  ;;  %11589 = vpow2.f32 %v9610_v48 }
0x25cd   :  { %v9582_v10 = vsel %vm692_vm2, %v9574_v25, -inf }
0x25ce   :  { %9583 = vmax.xlane.f32.xlu0 %v9582_v10 }
0x25d3   :  { %v11584_v54 = vpop.eup %11583 }
0x25d4   :  { %v9616_v30 = vsel %vm692_vm2, %v11584_v54, 0.0 }
0x25d5   :  { %9617 = vadd.xlane.f32.xlu0 %v9616_v30 }
0x25d7   :  { %v11586_v47 = vpop.eup %11585 }
0x25d8   :  { %v9619_v55 = vsel %vm692_vm2, %v11586_v47, 0.0  ;;  %v11588_v60 = vpop.eup %11587 }
0x25d9   :  { %9620 = vadd.xlane.f32.xlu1 %v9619_v55  ;;  %v11590_v42 = vpop.eup %11589 }
0x2655   :  { %v9587_v50 = vpop.xlane.xlu1 %9586 }
0x2656   :  { %v9591_v24 = vmax.f32 %v9587_v50, %v9263_v53 }
0x2657   :  { %v9584_v33 = vpop.xlane.xlu0 %9583 }
0x2658   :  { %v9595_v32 = vsub.f32 %v9575_v43, %v9591_v24  ;;  %v9607_v15 = vsub.f32 %v9263_v53, %v9591_v24  ;;  %v9590_v57 = vmax.f32 %v9584_v33, %v9262_v4 }
0x265a   :  { %v9602_v40 = vmul.f32 1.442695, %v9595_v32  ;;  %v9594_v59 = vsub.f32 %v9574_v25, %v9590_v57  ;;  %v9606_v51 = vsub.f32 %v9262_v4, %v9590_v57  ;;  %v9990_v4 = vld [vmem:[%s13166_s10 + $0x70] sm:$0xff] }
0x265c   :  { %11591 = vpow2.f32 %v9602_v40  ;;  %v9600_v5 = vmul.f32 1.442695, %v9594_v59  ;;  %v9988_v59 = vld [vmem:[%s13166_s10 + $0x60] sm:$0xff] }
0x265e   :  { %11593 = vpow2.f32 %v9600_v5  ;;  %v9618_v61 = vpop.xlane.xlu0 %9617 }
0x265f   :  { %v9628_v56 = vadd.f32 %v11588_v60, %v9618_v61 }
0x2661   :  { %11595 = vrcp.f32 %v9628_v56 }
0x2662   :  { %v9621_v26 = vpop.xlane.xlu1 %9620 }
0x2663   :  { %v9629_v6 = vadd.f32 %v11590_v42, %v9621_v26 }
0x2665   :  { %11597 = vrcp.f32 %v9629_v6 }
0x2669   :  { %v11592_v27 = vpop.eup %11591 }
0x266a   :  { %v9625_v3 = vsel %vm692_vm2, %v11592_v27, 0.0 }
0x266b   :  { %v11594_v35 = vpop.eup %11593  ;;  %9626 = vadd.xlane.f32.xlu1 %v9625_v3 }
0x266c   :  { %v9622_v14 = vsel %vm692_vm2, %v11594_v35, 0.0 }
0x266d   :  { %9623 = vadd.xlane.f32.xlu0 %v9622_v14 }
0x266e   :  { %v11596_v44 = vpop.eup %11595 }
0x266f   :  { %v9640_v2 = vmul.f32 %v11596_v44, %v11584_v54  ;;  %v9644_v36 = vmul.f32 %v11596_v44, %v11588_v60 }
0x2671   :  { %11312 = vmatmul.mubr.msk.f32.vlgmr.msra.gmra.mxu0 %vm692_vm2, %v9640_v2  ;;  %v9648_v31 = vmul.f32 %v9644_v36, %v12010_v9 }
0x2672   :  { %v11598_v63 = vpop.eup %11597  ;;  %11320 = vmatpush3.msra.mxu0 %v13079_v21  ;;  %11321 = vmatprep.mubr.msk.f32.mxu0 %vm11669_vm1, %v11668_v16 }
0x2673   :  { %v9641_v0 = vmul.f32 %v11598_v63, %v11586_v47  ;;  %v9645_v13 = vmul.f32 %v11598_v63, %v11590_v42  ;;  %v9652_v37 = vsel %vm8039_vm5, %v9648_v31, 0.0 }
0x2674   :  { %v9653_v28 = vrot.slane %v9652_v37, 4 }
0x2675   :  { %11317 = vmatmul.mubr.msk.f32.vlgmr.msra.gmra.mxu1 %vm692_vm2, %v9641_v0  ;;  %v9649_v38 = vmul.f32 %v9645_v13, %v12005_v7  ;;  %v9614_v7 = vmul.f32 1.442695, %v9607_v15  ;;  %v9989_v15 = vld [vmem:[%s13166_s10 + $0x68] sm:$0xff] }
0x2676   :  { %11325 = vmatpush3.msra.mxu1 %v13077_v62  ;;  %v9654_v29 = vadd.f32 %v9653_v28, %v9652_v37  ;;  %11326 = vmatprep.mubr.msk.f32.mxu1 %vm11669_vm1, %v11668_v16  ;;  %v9991_v16 = vld [vmem:[%s13166_s10 + $0x78] sm:$0xff]  ;;  %v9612_v62 = vmul.f32 1.442695, %v9606_v51 }
0x2677   :  { %v9659_v9 = vsel %vm8039_vm5, %v9649_v38, 0.0  ;;  %11329 = vmatprep.subr.mxu0 %v9991_v16  ;;  %11599 = vpow2.f32 %v9614_v7 }
0x2678   :  { %v9660_v21 = vrot.slane %v9659_v9, 4  ;;  %v9655_v39 = vrot.slane %v9654_v29, 2  ;;  %11601 = vpow2.f32 %v9612_v62 }
0x267a   :  { %v9661_v41 = vadd.f32 %v9660_v21, %v9659_v9  ;;  %v9656_v8 = vadd.f32 %v9655_v39, %v9654_v29  ;;  %v10345_v39 = vld [vmem:[%s13167_s11] ss:$0 sm:$0xff]  ;;  %s11673_s11 = smov [#allocation2]  }
0x267b   :  { %s10125_s29 = sshll.u32 %s11673_s11, 4  ;;  %s10126_s29 = int_to_ptr.vmem [resolvable:$true] %s10125_s29 }
0x267c   :  { %v9662_v52 = vrot.slane %v9661_v41, 2  ;;  %v9657_v22 = vrot.slane %v9656_v8, 1  ;;  %s11646_s30 = scalar_lea.vmem %s10126_s29, 512  ;;  %p11651_p1 = scmp.lt.s32.totalorder %s10126_s29, %s10126_s29 }
0x267d   :  { %p11647_p0 = scmp.ne.s32.totalorder %s10126_s29, %s11646_s30  ;;  %p11652_p2 = scmp.lt.s32.totalorder %s11646_s30, %s11646_s30 }
0x267e   :  { %v9663_v20 = vadd.f32 %v9662_v52, %v9661_v41  ;;  %v9658_v46 = vadd.f32 %v9657_v22, %v9656_v8 }
0x267f   :  { %p11653_p3 = por %p11652_p2, %p11651_p1 }
0x2680   :  { %v9664_v43 = vrot.slane %v9663_v20, 1 }
0x2681   :  { %p11654_p4 = pnand %p11653_p3, %p11647_p0 }
0x2682   :  { %v9665_v19 = vadd.f32 %v9664_v43, %v9663_v20 }
0x2683   :  { %9681 = vrot.lane.b32.xlu0 %v9658_v46, %s11672_s18 }
0x2684   :  { %9758 = vrot.lane.b32.xlu1 %v9665_v19, %s11672_s18  ;;  %v11600_v25 = vpop.eup %11599 }
0x2685   :  { %v11602_v10 = vpop.eup %11601 }
0x26f4   :  { %v9627_v23 = vpop.xlane.xlu1 %9626 }
0x26f5   :  { %v9631_v45 = vadd.f32 %v11600_v25, %v9627_v23 }
0x26f6   :  { %v9624_v54 = vpop.xlane.xlu0 %9623 }
0x26f7   :  { %11603 = vrcp.f32 %v9631_v45  ;;  %v9630_v30 = vadd.f32 %v11602_v10, %v9624_v54 }
0x26f8   :  { %v9759_v44 = vpop.permute.xlu1 %9758 }
0x26f9   :  { %11605 = vrcp.f32 %v9630_v30 }
0x2704   :  { %v11604_v47 = vpop.eup %11603 }
0x2705   :  { %v9643_v55 = vmul.f32 %v11604_v47, %v11592_v27  ;;  %v9647_v11 = vmul.f32 %v11604_v47, %v11600_v25  ;;  %v9682_v27 = vpop.permute.xlu0 %9681 }
0x2706   :  { %v11606_v49 = vpop.eup %11605 }
0x2707   :  { %v9642_v48 = vmul.f32 %v11606_v49, %v11594_v35  ;;  %v9646_v53 = vmul.f32 %v11606_v49, %v11602_v10  ;;  %11327 = vmatmul.mubr.msk.f32.vlgmr.msra.gmra.mxu1 %vm692_vm2, %v9643_v55  ;;  %v9651_v50 = vmul.f32 %v9647_v11, %v12014_v17 }
0x2709   :  { %11322 = vmatmul.mubr.msk.f32.vlgmr.msra.gmra.mxu0 %vm692_vm2, %v9642_v48  ;;  %v9650_v24 = vmul.f32 %v9646_v53, %v12023_v34  ;;  %v9673_v33 = vsel %vm8039_vm5, %v9651_v50, 0.0 }
0x270a   :  { %v9674_v32 = vrot.slane %v9673_v33, 4  ;;  %11330 = vmatpush3.msra.mxu0 %v9991_v16 }
0x270b   :  { %v9666_v57 = vsel %vm8039_vm5, %v9650_v24, 0.0  ;;  %11331 = vmatprep.subr.mxu0 %v9990_v4 }
0x270c   :  { %v9667_v17 = vrot.slane %v9666_v57, 4  ;;  %v9675_v40 = vadd.f32 %v9674_v32, %v9673_v33  ;;  %11332 = vmatpush3.msra.mxu0 %v9990_v4 }
0x270d   :  { %11333 = vmatprep.subr.mxu0 %v9989_v15 }
0x270e   :  { %v9668_v34 = vadd.f32 %v9667_v17, %v9666_v57  ;;  %v9676_v51 = vrot.slane %v9675_v40, 2  ;;  %11334 = vmatpush3.msra.mxu0 %v9989_v15 }
0x270f   :  { %11335 = vmatprep.subr.mxu0 %v9988_v59 }
0x2710   :  { %v9669_v5 = vrot.slane %v9668_v34, 2  ;;  %11336 = vmatpush3.msra.mxu0 %v9988_v59  ;;  %v9677_v61 = vadd.f32 %v9676_v51, %v9675_v40 }
0x2712   :  { %v9670_v60 = vadd.f32 %v9669_v5, %v9668_v34  ;;  %v9678_v26 = vrot.slane %v9677_v61, 1 }
0x2714   :  { %v9671_v56 = vrot.slane %v9670_v60, 1  ;;  %v9679_v6 = vadd.f32 %v9678_v26, %v9677_v61 }
0x2716   :  { %v9672_v42 = vadd.f32 %v9671_v56, %v9670_v60 }
0x2718   :  { %9835 = vrot.lane.b32.xlu1 %v9672_v42, %s11672_s18 }
0x271c   :  { %9912 = vrot.lane.b32.xlu1 %v9679_v6, %s11672_s18 }
0x2731   :  { %v9753_v3 = vpop.f32.mrf.mxu0 }
0x2732   :  { %v9754_v35 = vadd.f32 %v9753_v3, %v9682_v27 }
0x2733   :  { %v11313_v14 = vpop.f32.mrf.mxu0 }
0x2734   :  { %11337 = vmatprep.mubr.msk.f32.mxu0 %vm77_vm0, %v9754_v35 }
0x2735   :  { %v9830_v2 = vpop.f32.mrf.mxu1 }
0x2736   :  { %v9831_v36 = vadd.f32 %v9830_v2, %v9759_v44 }
0x2737   :  { %v11318_v31 = vpop.f32.mrf.mxu1 }
0x2738   :  { %11338 = vmatmul.mubr.msk.f32.vlgmr.msra.gmra.mxu0 %vm77_vm0, %v9831_v36 }
0x278a   :  { %v9836_v63 = vpop.permute.xlu1 %9835 }
0x278e   :  { %v9913_v28 = vpop.permute.xlu1 %9912 }
0x27c7   :  { %v9984_v0 = vpop.f32.mrf.mxu1 }
0x27c8   :  { %v9985_v29 = vadd.f32 %v9984_v0, %v9913_v28 }
0x27c9   :  { %v9907_v13 = vpop.f32.mrf.mxu0  ;;  %v11328_v37 = vpop.f32.mrf.mxu1 }
0x27ca   :  { %v9908_v38 = vadd.f32 %v9907_v13, %v9836_v63 }
0x27cb   :  { %v11323_v9 = vpop.f32.mrf.mxu0 }
0x27cc   :  { %11340 = vmatprep.mubr.msk.f32.mxu0 %vm77_vm0, %v9908_v38 }
0x27cd   :  { %11341 = vmatmul.mubr.msk.f32.gmra.mxu0 %vm77_vm0, %v9985_v29 }
0x27f8   :  { %v11339_v21 = vpop.f32.mrf.mxu0 }
0x27f9   :  { %v10090_v41 = vadd.f32 %v11339_v21, %v12875_v12 }
0x27fa   :  { %v10070_v8 = vpop.f32.mrf.mxu0 }
0x27fb   :  { %v10101_v52 = vadd.f32 %v10345_v39, %v10090_v41  ;;  %v10089_v22 = vadd.f32 %v10070_v8, %v12877_v58 }
0x27fd   :  { %vm10105_vm6 = vcmp.ge.f32.partialorder %v10101_v52, 0.0  ;;  %v10109_v20 = vmul.f32 0.2, %v10101_v52  ;;  %v10100_v43 = vadd.f32 %v10345_v39, %v10089_v22 }
0x27ff   :  { %v10113_v46 = vsel %vm10105_vm6, %v10101_v52, %v10109_v20  ;;  %vm10104_vm7 = vcmp.ge.f32.partialorder %v10100_v43, 0.0  ;;  %v10108_v19 = vmul.f32 0.2, %v10100_v43 }
0x2800   :  { %10117 = vst.msk [vmem:[#allocation2 + $0x8] sm:$0xff] %vm77_vm0, %v10113_v46 }
0x2801   :  { %v10112_v16 = vsel %vm10104_vm7, %v10100_v43, %v10108_v19 }
0x2802   :  { %10116 = vst.msk [vmem:[#allocation2] sm:$0xff] %vm77_vm0, %v10112_v16 }
0x288d   :  { %v11342_v7 = vpop.f32.mrf.mxu0 }
0x288e   :  { %v10092_v62 = vadd.f32 %v11342_v7, %v12881_v1 }
0x288f   :  { %v10080_v25 = vpop.f32.mrf.mxu0 }
0x2890   :  { %v10103_v12 = vadd.f32 %v10345_v39, %v10092_v62  ;;  %v10091_v23 = vadd.f32 %v10080_v25, %v12884_v18 }
0x2892   :  { %vm10107_vm8 = vcmp.ge.f32.partialorder %v10103_v12, 0.0  ;;  %v10111_v58 = vmul.f32 0.2, %v10103_v12  ;;  %v10102_v45 = vadd.f32 %v10345_v39, %v10091_v23 }
0x2894   :  { %v10115_v10 = vsel %vm10107_vm8, %v10103_v12, %v10111_v58  ;;  %vm10106_vm9 = vcmp.ge.f32.partialorder %v10102_v45, 0.0  ;;  %v10110_v54 = vmul.f32 0.2, %v10102_v45 }
0x2895   :  { %10119 = vst.msk [vmem:[#allocation2 + $0x18] sm:$0xff] %vm77_vm0, %v10115_v10 }
0x2896   :  { %v10114_v30 = vsel %vm10106_vm9, %v10102_v45, %v10110_v54 }
0x2897   :  { %10118 = vst.msk [vmem:[#allocation2 + $0x10] sm:$0xff] %vm77_vm0, %v10114_v30 }
0x2898   :  { %11657 = shalt.err (!%p11654_p4)
}
0x2899   :  { %s11674_s13 = smov 128   ;;  %s11675_s14 = smov 8  }
0x289a   :  { %10131 = dma.vmem_to_hbm [thread:$0]  %s10126_s29, 512, %s13168_s12, [#allocation3], %s11674_s13, %s11674_s13, %s11675_s14  }
0x289b   :  { %11666 = dma.done.wait [#allocation3], 512  }
0x289c   :  { %11667 = vsyncadd [#allocation3], 4294966784 }
0x289d   :  { %10135 = vsyncpa [#allocation3], 1 }

</bundles_post_ra>
